<compile_context>
chip_gen: v7x
topology: tpu7x:2x2x1
jax: 0.10.0
libtpu: 0.0.40
codegen_flags: <defaults>
</compile_context>

<pallas_src>
import jax
import jax.numpy as jnp
from jax.experimental import pallas as pl
from jax.experimental.pallas import tpu as pltpu

# ---- model hyperparameters (consistent with the module) ----
BLOCK_SIZE = 20
HEIGHT = 160
WIDTH = 160
GRID_HEIGHT = HEIGHT // BLOCK_SIZE   # 8
GRID_WIDTH = WIDTH // BLOCK_SIZE     # 8

INPUT_CHANNELS = 4
CONV1_CH = 32
CONV2_CH = 64
OUTPUT_SIZE = 4
BATCH = 2

_LEFT_PAD = 8   # sublane-aligned left halo pad inside the padded VMEM scratch


# ------------------------------- fused kernel ------------------------------ #
def cnn_qnet_kernel(x_ref, w1_ref, b1_ref, w2_ref, b2_ref,
                    wfc_ref, mask_ref, rsel_ref, nsel_ref, bfc_ref,
                    o_ref,
                    xp1_ref, p1_ref, xp2_ref, p2_ref):
    """Fused conv1+ReLU -> conv2+ReLU -> fc.

    x_ref   : (N, H, W, Cin)  NHWC f32 input
    w*_ref  : im2col conv weights (9*Cin, Cout) bf16 ; b*_ref (1, Cout) f32
    wfc_ref : (C2, H*W*O) bf16   -- fc weight, columns indexed by p*O + o
    mask_ref: (N*H*W, H*W*O) f32 -- 1 where (row % H*W) == (col // O)
    rsel_ref: (H*W*O, O) f32     -- sums the p-column-groups per output o
    nsel_ref: (N, N*H*W) f32     -- sums rows belonging to each batch element
    bfc_ref : (1, O) f32
    o_ref   : (N, O) f32
    xp*/p*  : VMEM scratch (padded maps / im2col patch slabs)
    """
    N, H, W, Cin = x_ref.shape
    C1 = w1_ref.shape[-1]
    M = N * H * W
    L = _LEFT_PAD

    def conv3x3_relu(x_nhwc, xp_ref, p_ref, w_ref, b_ref, cin):
        # zero-filled padded scratch; interior stored at sublane-aligned offset L
        xp_ref[...] = jnp.zeros_like(xp_ref)
        xp_ref[:, 1:H + 1, L:L + W, :] = x_nhwc
        xp = xp_ref[...]
        # im2col: 9 shifted windows -> lane-slices of one (M, 9*cin) patch slab
        for k in range(9):
            dy, dx = divmod(k, 3)
            p_ref[:, k * cin:(k + 1) * cin] = (
                xp[:, dy:dy + H, (L - 1) + dx:(L - 1) + dx + W, :].reshape(M, cin))
        # single MXU dot (bf16 operands, f32 accumulation) + bias + ReLU
        acc = jnp.dot(p_ref[...].astype(jnp.bfloat16), w_ref[...],
                      preferred_element_type=jnp.float32)
        return jnp.maximum(acc + b_ref[...], 0.0)          # (M, Cout) f32

    # ---- conv1 / conv2, activations kept as (M, C) lane-dense slabs ----
    h1 = conv3x3_relu(x_ref[...], xp1_ref, p1_ref, w1_ref, b1_ref, Cin)       # (M, 32)
    h2 = conv3x3_relu(h1.reshape(N, H, W, C1), xp2_ref, p2_ref,
                      w2_ref, b2_ref, C1)                                     # (M, 64)

    # ---- fc: exact NCHW-flatten Linear via matmuls (no sublane->lane reshape) ----
    # t[r, p*O+o] = sum_c h2[r, c] * W_fc[c*HW + p, o]
    t = jnp.dot(h2.astype(jnp.bfloat16), wfc_ref[...],
                preferred_element_type=jnp.float32)                           # (M, HW*O)
    t = t * mask_ref[...]                      # keep only columns with p == (row % HW)
    per_pixel = jnp.dot(t, rsel_ref[...],
                        preferred_element_type=jnp.float32)                   # (M, O)
    out = jnp.dot(nsel_ref[...], per_pixel,
                  preferred_element_type=jnp.float32)                         # (N, O)
    o_ref[...] = (out + bfc_ref[...]).astype(o_ref.dtype)


# --------------------------------- wrapper --------------------------------- #
_VMEM = pl.BlockSpec(memory_space=pltpu.MemorySpace.VMEM)


@jax.jit
def cnn_qnet_forward(kparams, x_nchw):
    """Forward pass matching CNN_QNet.forward on an NCHW input."""
    x = jnp.transpose(x_nchw, (0, 2, 3, 1))        # NCHW -> NHWC (tiny, one-time)
    N, H, W, Cin = x.shape
    M = N * H * W
    wpad = _LEFT_PAD + W + 1
    return pl.pallas_call(
        cnn_qnet_kernel,
        out_shape=jax.ShapeDtypeStruct((N, OUTPUT_SIZE), jnp.float32),
        in_specs=[_VMEM] * 10,
        out_specs=_VMEM,
        scratch_shapes=[
            pltpu.VMEM((N, H + 2, wpad, Cin), jnp.float32),       # padded input
            pltpu.VMEM((M, 9 * Cin), jnp.float32),                # conv1 patch slab
            pltpu.VMEM((N, H + 2, wpad, CONV1_CH), jnp.float32),  # padded conv1 out
            pltpu.VMEM((M, 9 * CONV1_CH), jnp.float32),           # conv2 patch slab
        ],
    )(x, kparams["w1m"], kparams["b1"], kparams["w2m"], kparams["b2"],
      kparams["wfcm"], kparams["mask"], kparams["rsel"], kparams["nsel"],
      kparams["bfc"])


# --------------------------- params / weight prep -------------------------- #
def _bf16_round(x):
    # weights are stored at bf16 precision (MXU-native); both kernel and reference
    # see the exact same (rounded) parameter values.
    return x.astype(jnp.bfloat16).astype(jnp.float32)


def init_params(key):
    k = jax.random.split(key, 6)
    fc_in = CONV2_CH * GRID_HEIGHT * GRID_WIDTH
    return {
        # conv weights in HWIO, fc weight as (K, O) with K = NCHW flatten (c*HW + p)
        "w1": _bf16_round(0.05 * jax.random.normal(k[0], (3, 3, INPUT_CHANNELS, CONV1_CH), jnp.float32)),
        "b1": 0.05 * jax.random.normal(k[1], (CONV1_CH,), jnp.float32),
        "w2": _bf16_round(0.05 * jax.random.normal(k[2], (3, 3, CONV1_CH, CONV2_CH), jnp.float32)),
        "b2": 0.05 * jax.random.normal(k[3], (CONV2_CH,), jnp.float32),
        "w_fc": _bf16_round(0.05 * jax.random.normal(k[4], (fc_in, OUTPUT_SIZE), jnp.float32)),
        "b_fc": 0.05 * jax.random.normal(k[5], (OUTPUT_SIZE,), jnp.float32),
    }


def prepare_kernel_params(params):
    """One-time host-side re-layout of the weights for the fused kernel."""
    HW = GRID_HEIGHT * GRID_WIDTH
    O = OUTPUT_SIZE
    M = BATCH * HW
    # im2col conv weights: (3,3,Cin,Cout) -> (9*Cin, Cout), row index (dy*3+dx)*Cin + c
    w1m = params["w1"].reshape(9 * INPUT_CHANNELS, CONV1_CH).astype(jnp.bfloat16)
    w2m = params["w2"].reshape(9 * CONV1_CH, CONV2_CH).astype(jnp.bfloat16)
    # fc weight (K=c*HW+p, O) -> (C2, HW*O) so wfcm[c, p*O+o] = w_fc[c*HW+p, o]
    wfcm = params["w_fc"].reshape(CONV2_CH, HW * O).astype(jnp.bfloat16)
    # block-diagonal selection mask and reduction selectors (constants)
    row_p = jnp.arange(M, dtype=jnp.int32)[:, None] % HW
    col_p = jnp.arange(HW * O, dtype=jnp.int32)[None, :] // O
    mask = (row_p == col_p).astype(jnp.float32)                       # (M, HW*O)
    rsel = jnp.tile(jnp.eye(O, dtype=jnp.float32), (HW, 1))           # (HW*O, O)
    nsel = jnp.repeat(jnp.eye(BATCH, dtype=jnp.float32), HW, axis=1)  # (N, M)
    return {
        "w1m": w1m, "b1": params["b1"].reshape(1, CONV1_CH),
        "w2m": w2m, "b2": params["b2"].reshape(1, CONV2_CH),
        "wfcm": wfcm, "mask": mask, "rsel": rsel, "nsel": nsel,
        "bfc": params["b_fc"].reshape(1, O),
    }


# -------------------------------- reference -------------------------------- #
def reference_forward(params, x_nchw):
    """Pure-JAX reference (mirrors F.conv2d / flatten / Linear semantics)."""
    def conv(x, w_hwio, b):
        y = jax.lax.conv_general_dilated(
            x, w_hwio, window_strides=(1, 1), padding="SAME",
            dimension_numbers=("NCHW", "HWIO", "NCHW"))
        return jax.nn.relu(y + b[None, :, None, None])

    x = conv(x_nchw, params["w1"], params["b1"])
    x = conv(x, params["w2"], params["b2"])
    x = x.reshape(x.shape[0], -1)                 # NCHW flatten, as in PyTorch
    return x @ params["w_fc"] + params["b_fc"]


# ----------------------------------- main ----------------------------------- #
if __name__ == "__main__":
    key = jax.random.PRNGKey(0)
    kx, kp = jax.random.split(key)

    x = jax.random.normal(
        kx, (BATCH, INPUT_CHANNELS, GRID_HEIGHT, GRID_WIDTH), jnp.float32)
    params = init_params(kp)
    kparams = prepare_kernel_params(params)

    out = jax.block_until_ready(cnn_qnet_forward(kparams, x))
    ref = jax.block_until_ready(reference_forward(params, x))

    assert out.shape == (BATCH, OUTPUT_SIZE), out.shape
    assert jnp.allclose(out, ref, rtol=2e-2, atol=2e-2), (
        "mismatch vs reference: max abs diff = "
        f"{float(jnp.max(jnp.abs(out - ref)))}"
    )
    print("KERNEL_OK")
</pallas_src>

<mosaic_0001>
module attributes {stable_mosaic.version = 11 : i64} {
  func.func @cnn_qnet_kernel(%arg0: memref<2x8x8x4xf32, #tpu.memory_space<vmem>>, %arg1: memref<36x32xbf16, #tpu.memory_space<vmem>>, %arg2: memref<1x32xf32, #tpu.memory_space<vmem>>, %arg3: memref<288x64xbf16, #tpu.memory_space<vmem>>, %arg4: memref<1x64xf32, #tpu.memory_space<vmem>>, %arg5: memref<64x256xbf16, #tpu.memory_space<vmem>>, %arg6: memref<128x256xf32, #tpu.memory_space<vmem>>, %arg7: memref<256x4xf32, #tpu.memory_space<vmem>>, %arg8: memref<2x128xf32, #tpu.memory_space<vmem>>, %arg9: memref<1x4xf32, #tpu.memory_space<vmem>>, %arg10: memref<2x4xf32, #tpu.memory_space<vmem>>, %arg11: memref<2x10x17x4xf32, #tpu.memory_space<vmem>>, %arg12: memref<128x36xf32, #tpu.memory_space<vmem>>, %arg13: memref<2x10x17x32xf32, #tpu.memory_space<vmem>>, %arg14: memref<128x288xf32, #tpu.memory_space<vmem>>) attributes {dimension_semantics = [], scalar_prefetch = 0 : i64, scratch_operands = 4 : i64, tpu.core_type = #tpu.core_type<tc>} {
    %c0 = arith.constant 0 : index
    %c0_0 = arith.constant 0 : index
    %c0_1 = arith.constant 0 : index
    %c0_2 = arith.constant 0 : index
    %0 = vector.load %arg0[%c0, %c0_0, %c0_1, %c0_2] : memref<2x8x8x4xf32, #tpu.memory_space<vmem>>, vector<2x8x8x4xf32>
    %cst = arith.constant 0.000000e+00 : f32
    %1 = vector.broadcast %cst : f32 to vector<2x10x17x4xf32>
    %c0_3 = arith.constant 0 : index
    %c0_4 = arith.constant 0 : index
    %c0_5 = arith.constant 0 : index
    %c0_6 = arith.constant 0 : index
    %2 = vector.load %arg11[%c0_3, %c0_4, %c0_5, %c0_6] : memref<2x10x17x4xf32, #tpu.memory_space<vmem>>, vector<2x10x17x4xf32>
    tpu.vector_store %arg11[%c0_3, %c0_4, %c0_5, %c0_6], %1 {strides = array<i32>} : memref<2x10x17x4xf32, #tpu.memory_space<vmem>>, vector<2x10x17x4xf32>,
    %c0_7 = arith.constant 0 : index
    %c1 = arith.constant 1 : index
    %c8 = arith.constant 8 : index
    %c0_8 = arith.constant 0 : index
    %3 = vector.load %arg11[%c0_7, %c1, %c8, %c0_8] : memref<2x10x17x4xf32, #tpu.memory_space<vmem>>, vector<2x8x8x4xf32>
    tpu.vector_store %arg11[%c0_7, %c1, %c8, %c0_8], %0 {strides = array<i32>} : memref<2x10x17x4xf32, #tpu.memory_space<vmem>>, vector<2x8x8x4xf32>,
    %c0_9 = arith.constant 0 : index
    %c0_10 = arith.constant 0 : index
    %c0_11 = arith.constant 0 : index
    %c0_12 = arith.constant 0 : index
    %4 = vector.load %arg11[%c0_9, %c0_10, %c0_11, %c0_12] : memref<2x10x17x4xf32, #tpu.memory_space<vmem>>, vector<2x10x17x4xf32>
    %5 = vector.extract_strided_slice %4 {offsets = [0, 0, 7, 0], sizes = [2, 8, 8, 4], strides = [1, 1, 1, 1]} : vector<2x10x17x4xf32> to vector<2x8x8x4xf32>
    %6 = vector.shape_cast %5 : vector<2x8x8x4xf32> to vector<128x4xf32>
    %c0_13 = arith.constant 0 : index
    %c0_14 = arith.constant 0 : index
    %7 = vector.load %arg12[%c0_13, %c0_14] : memref<128x36xf32, #tpu.memory_space<vmem>>, vector<128x4xf32>
    tpu.vector_store %arg12[%c0_13, %c0_14], %6 {strides = array<i32>} : memref<128x36xf32, #tpu.memory_space<vmem>>, vector<128x4xf32>,
    %8 = vector.extract_strided_slice %4 {offsets = [0, 0, 8, 0], sizes = [2, 8, 8, 4], strides = [1, 1, 1, 1]} : vector<2x10x17x4xf32> to vector<2x8x8x4xf32>
    %9 = vector.shape_cast %8 : vector<2x8x8x4xf32> to vector<128x4xf32>
    %c0_15 = arith.constant 0 : index
    %c4 = arith.constant 4 : index
    %10 = vector.load %arg12[%c0_15, %c4] : memref<128x36xf32, #tpu.memory_space<vmem>>, vector<128x4xf32>
    tpu.vector_store %arg12[%c0_15, %c4], %9 {strides = array<i32>} : memref<128x36xf32, #tpu.memory_space<vmem>>, vector<128x4xf32>,
    %11 = vector.extract_strided_slice %4 {offsets = [0, 0, 9, 0], sizes = [2, 8, 8, 4], strides = [1, 1, 1, 1]} : vector<2x10x17x4xf32> to vector<2x8x8x4xf32>
    %12 = vector.shape_cast %11 : vector<2x8x8x4xf32> to vector<128x4xf32>
    %c0_16 = arith.constant 0 : index
    %c8_17 = arith.constant 8 : index
    %13 = vector.load %arg12[%c0_16, %c8_17] : memref<128x36xf32, #tpu.memory_space<vmem>>, vector<128x4xf32>
    tpu.vector_store %arg12[%c0_16, %c8_17], %12 {strides = array<i32>} : memref<128x36xf32, #tpu.memory_space<vmem>>, vector<128x4xf32>,
    %14 = vector.extract_strided_slice %4 {offsets = [0, 1, 7, 0], sizes = [2, 8, 8, 4], strides = [1, 1, 1, 1]} : vector<2x10x17x4xf32> to vector<2x8x8x4xf32>
    %15 = vector.shape_cast %14 : vector<2x8x8x4xf32> to vector<128x4xf32>
    %c0_18 = arith.constant 0 : index
    %c12 = arith.constant 12 : index
    %16 = vector.load %arg12[%c0_18, %c12] : memref<128x36xf32, #tpu.memory_space<vmem>>, vector<128x4xf32>
    tpu.vector_store %arg12[%c0_18, %c12], %15 {strides = array<i32>} : memref<128x36xf32, #tpu.memory_space<vmem>>, vector<128x4xf32>,
    %17 = vector.extract_strided_slice %4 {offsets = [0, 1, 8, 0], sizes = [2, 8, 8, 4], strides = [1, 1, 1, 1]} : vector<2x10x17x4xf32> to vector<2x8x8x4xf32>
    %18 = vector.shape_cast %17 : vector<2x8x8x4xf32> to vector<128x4xf32>
    %c0_19 = arith.constant 0 : index
    %c16 = arith.constant 16 : index
    %19 = vector.load %arg12[%c0_19, %c16] : memref<128x36xf32, #tpu.memory_space<vmem>>, vector<128x4xf32>
    tpu.vector_store %arg12[%c0_19, %c16], %18 {strides = array<i32>} : memref<128x36xf32, #tpu.memory_space<vmem>>, vector<128x4xf32>,
    %20 = vector.extract_strided_slice %4 {offsets = [0, 1, 9, 0], sizes = [2, 8, 8, 4], strides = [1, 1, 1, 1]} : vector<2x10x17x4xf32> to vector<2x8x8x4xf32>
    %21 = vector.shape_cast %20 : vector<2x8x8x4xf32> to vector<128x4xf32>
    %c0_20 = arith.constant 0 : index
    %c20 = arith.constant 20 : index
    %22 = vector.load %arg12[%c0_20, %c20] : memref<128x36xf32, #tpu.memory_space<vmem>>, vector<128x4xf32>
    tpu.vector_store %arg12[%c0_20, %c20], %21 {strides = array<i32>} : memref<128x36xf32, #tpu.memory_space<vmem>>, vector<128x4xf32>,
    %23 = vector.extract_strided_slice %4 {offsets = [0, 2, 7, 0], sizes = [2, 8, 8, 4], strides = [1, 1, 1, 1]} : vector<2x10x17x4xf32> to vector<2x8x8x4xf32>
    %24 = vector.shape_cast %23 : vector<2x8x8x4xf32> to vector<128x4xf32>
    %c0_21 = arith.constant 0 : index
    %c24 = arith.constant 24 : index
    %25 = vector.load %arg12[%c0_21, %c24] : memref<128x36xf32, #tpu.memory_space<vmem>>, vector<128x4xf32>
    tpu.vector_store %arg12[%c0_21, %c24], %24 {strides = array<i32>} : memref<128x36xf32, #tpu.memory_space<vmem>>, vector<128x4xf32>,
    %26 = vector.extract_strided_slice %4 {offsets = [0, 2, 8, 0], sizes = [2, 8, 8, 4], strides = [1, 1, 1, 1]} : vector<2x10x17x4xf32> to vector<2x8x8x4xf32>
    %27 = vector.shape_cast %26 : vector<2x8x8x4xf32> to vector<128x4xf32>
    %c0_22 = arith.constant 0 : index
    %c28 = arith.constant 28 : index
    %28 = vector.load %arg12[%c0_22, %c28] : memref<128x36xf32, #tpu.memory_space<vmem>>, vector<128x4xf32>
    tpu.vector_store %arg12[%c0_22, %c28], %27 {strides = array<i32>} : memref<128x36xf32, #tpu.memory_space<vmem>>, vector<128x4xf32>,
    %29 = vector.extract_strided_slice %4 {offsets = [0, 2, 9, 0], sizes = [2, 8, 8, 4], strides = [1, 1, 1, 1]} : vector<2x10x17x4xf32> to vector<2x8x8x4xf32>
    %30 = vector.shape_cast %29 : vector<2x8x8x4xf32> to vector<128x4xf32>
    %c0_23 = arith.constant 0 : index
    %c32 = arith.constant 32 : index
    %31 = vector.load %arg12[%c0_23, %c32] : memref<128x36xf32, #tpu.memory_space<vmem>>, vector<128x4xf32>
    tpu.vector_store %arg12[%c0_23, %c32], %30 {strides = array<i32>} : memref<128x36xf32, #tpu.memory_space<vmem>>, vector<128x4xf32>,
    %c0_24 = arith.constant 0 : index
    %c0_25 = arith.constant 0 : index
    %32 = vector.load %arg12[%c0_24, %c0_25] : memref<128x36xf32, #tpu.memory_space<vmem>>, vector<128x36xf32>
    %33 = arith.truncf %32 : vector<128x36xf32> to vector<128x36xbf16>
    %c0_26 = arith.constant 0 : index
    %c0_27 = arith.constant 0 : index
    %34 = vector.load %arg1[%c0_26, %c0_27] : memref<36x32xbf16, #tpu.memory_space<vmem>>, vector<36x32xbf16>
    %cst_28 = arith.constant dense<0.000000e+00> : vector<128x32xf32>
    %35 = tpu.matmul %33, %34, %cst_28 {dimension_numbers = #tpu.dot_dimension_numbers<[1], [0], [0], [1], [0, 0, 1, 1], [], []>} : vector<128x36xbf16>, vector<36x32xbf16>, vector<128x32xf32> -> vector<128x32xf32>
    %c0_29 = arith.constant 0 : index
    %c0_30 = arith.constant 0 : index
    %36 = vector.load %arg2[%c0_29, %c0_30] : memref<1x32xf32, #tpu.memory_space<vmem>>, vector<1x32xf32>
    %37 = vector.broadcast %36 : vector<1x32xf32> to vector<128x32xf32>
    %38 = arith.addf %35, %37 : vector<128x32xf32>
    %cst_31 = arith.constant 0.000000e+00 : f32
    %39 = vector.broadcast %cst_31 : f32 to vector<128x32xf32>
    %40 = arith.maximumf %38, %39 : vector<128x32xf32>
    %41 = vector.shape_cast %40 : vector<128x32xf32> to vector<2x8x8x32xf32>
    %cst_32 = arith.constant 0.000000e+00 : f32
    %42 = vector.broadcast %cst_32 : f32 to vector<2x10x17x32xf32>
    %c0_33 = arith.constant 0 : index
    %c0_34 = arith.constant 0 : index
    %c0_35 = arith.constant 0 : index
    %c0_36 = arith.constant 0 : index
    %43 = vector.load %arg13[%c0_33, %c0_34, %c0_35, %c0_36] : memref<2x10x17x32xf32, #tpu.memory_space<vmem>>, vector<2x10x17x32xf32>
    tpu.vector_store %arg13[%c0_33, %c0_34, %c0_35, %c0_36], %42 {strides = array<i32>} : memref<2x10x17x32xf32, #tpu.memory_space<vmem>>, vector<2x10x17x32xf32>,
    %c0_37 = arith.constant 0 : index
    %c1_38 = arith.constant 1 : index
    %c8_39 = arith.constant 8 : index
    %c0_40 = arith.constant 0 : index
    %44 = vector.load %arg13[%c0_37, %c1_38, %c8_39, %c0_40] : memref<2x10x17x32xf32, #tpu.memory_space<vmem>>, vector<2x8x8x32xf32>
    tpu.vector_store %arg13[%c0_37, %c1_38, %c8_39, %c0_40], %41 {strides = array<i32>} : memref<2x10x17x32xf32, #tpu.memory_space<vmem>>, vector<2x8x8x32xf32>,
    %c0_41 = arith.constant 0 : index
    %c0_42 = arith.constant 0 : index
    %c0_43 = arith.constant 0 : index
    %c0_44 = arith.constant 0 : index
    %45 = vector.load %arg13[%c0_41, %c0_42, %c0_43, %c0_44] : memref<2x10x17x32xf32, #tpu.memory_space<vmem>>, vector<2x10x17x32xf32>
    %46 = vector.extract_strided_slice %45 {offsets = [0, 0, 7, 0], sizes = [2, 8, 8, 32], strides = [1, 1, 1, 1]} : vector<2x10x17x32xf32> to vector<2x8x8x32xf32>
    %47 = vector.shape_cast %46 : vector<2x8x8x32xf32> to vector<128x32xf32>
    %c0_45 = arith.constant 0 : index
    %c0_46 = arith.constant 0 : index
    %48 = vector.load %arg14[%c0_45, %c0_46] : memref<128x288xf32, #tpu.memory_space<vmem>>, vector<128x32xf32>
    tpu.vector_store %arg14[%c0_45, %c0_46], %47 {strides = array<i32>} : memref<128x288xf32, #tpu.memory_space<vmem>>, vector<128x32xf32>,
    %49 = vector.extract_strided_slice %45 {offsets = [0, 0, 8, 0], sizes = [2, 8, 8, 32], strides = [1, 1, 1, 1]} : vector<2x10x17x32xf32> to vector<2x8x8x32xf32>
    %50 = vector.shape_cast %49 : vector<2x8x8x32xf32> to vector<128x32xf32>
    %c0_47 = arith.constant 0 : index
    %c32_48 = arith.constant 32 : index
    %51 = vector.load %arg14[%c0_47, %c32_48] : memref<128x288xf32, #tpu.memory_space<vmem>>, vector<128x32xf32>
    tpu.vector_store %arg14[%c0_47, %c32_48], %50 {strides = array<i32>} : memref<128x288xf32, #tpu.memory_space<vmem>>, vector<128x32xf32>,
    %52 = vector.extract_strided_slice %45 {offsets = [0, 0, 9, 0], sizes = [2, 8, 8, 32], strides = [1, 1, 1, 1]} : vector<2x10x17x32xf32> to vector<2x8x8x32xf32>
    %53 = vector.shape_cast %52 : vector<2x8x8x32xf32> to vector<128x32xf32>
    %c0_49 = arith.constant 0 : index
    %c64 = arith.constant 64 : index
    %54 = vector.load %arg14[%c0_49, %c64] : memref<128x288xf32, #tpu.memory_space<vmem>>, vector<128x32xf32>
    tpu.vector_store %arg14[%c0_49, %c64], %53 {strides = array<i32>} : memref<128x288xf32, #tpu.memory_space<vmem>>, vector<128x32xf32>,
    %55 = vector.extract_strided_slice %45 {offsets = [0, 1, 7, 0], sizes = [2, 8, 8, 32], strides = [1, 1, 1, 1]} : vector<2x10x17x32xf32> to vector<2x8x8x32xf32>
    %56 = vector.shape_cast %55 : vector<2x8x8x32xf32> to vector<128x32xf32>
    %c0_50 = arith.constant 0 : index
    %c96 = arith.constant 96 : index
    %57 = vector.load %arg14[%c0_50, %c96] : memref<128x288xf32, #tpu.memory_space<vmem>>, vector<128x32xf32>
    tpu.vector_store %arg14[%c0_50, %c96], %56 {strides = array<i32>} : memref<128x288xf32, #tpu.memory_space<vmem>>, vector<128x32xf32>,
    %58 = vector.extract_strided_slice %45 {offsets = [0, 1, 8, 0], sizes = [2, 8, 8, 32], strides = [1, 1, 1, 1]} : vector<2x10x17x32xf32> to vector<2x8x8x32xf32>
    %59 = vector.shape_cast %58 : vector<2x8x8x32xf32> to vector<128x32xf32>
    %c0_51 = arith.constant 0 : index
    %c128 = arith.constant 128 : index
    %60 = vector.load %arg14[%c0_51, %c128] : memref<128x288xf32, #tpu.memory_space<vmem>>, vector<128x32xf32>
    tpu.vector_store %arg14[%c0_51, %c128], %59 {strides = array<i32>} : memref<128x288xf32, #tpu.memory_space<vmem>>, vector<128x32xf32>,
    %61 = vector.extract_strided_slice %45 {offsets = [0, 1, 9, 0], sizes = [2, 8, 8, 32], strides = [1, 1, 1, 1]} : vector<2x10x17x32xf32> to vector<2x8x8x32xf32>
    %62 = vector.shape_cast %61 : vector<2x8x8x32xf32> to vector<128x32xf32>
    %c0_52 = arith.constant 0 : index
    %c160 = arith.constant 160 : index
    %63 = vector.load %arg14[%c0_52, %c160] : memref<128x288xf32, #tpu.memory_space<vmem>>, vector<128x32xf32>
    tpu.vector_store %arg14[%c0_52, %c160], %62 {strides = array<i32>} : memref<128x288xf32, #tpu.memory_space<vmem>>, vector<128x32xf32>,
    %64 = vector.extract_strided_slice %45 {offsets = [0, 2, 7, 0], sizes = [2, 8, 8, 32], strides = [1, 1, 1, 1]} : vector<2x10x17x32xf32> to vector<2x8x8x32xf32>
    %65 = vector.shape_cast %64 : vector<2x8x8x32xf32> to vector<128x32xf32>
    %c0_53 = arith.constant 0 : index
    %c192 = arith.constant 192 : index
    %66 = vector.load %arg14[%c0_53, %c192] : memref<128x288xf32, #tpu.memory_space<vmem>>, vector<128x32xf32>
    tpu.vector_store %arg14[%c0_53, %c192], %65 {strides = array<i32>} : memref<128x288xf32, #tpu.memory_space<vmem>>, vector<128x32xf32>,
    %67 = vector.extract_strided_slice %45 {offsets = [0, 2, 8, 0], sizes = [2, 8, 8, 32], strides = [1, 1, 1, 1]} : vector<2x10x17x32xf32> to vector<2x8x8x32xf32>
    %68 = vector.shape_cast %67 : vector<2x8x8x32xf32> to vector<128x32xf32>
    %c0_54 = arith.constant 0 : index
    %c224 = arith.constant 224 : index
    %69 = vector.load %arg14[%c0_54, %c224] : memref<128x288xf32, #tpu.memory_space<vmem>>, vector<128x32xf32>
    tpu.vector_store %arg14[%c0_54, %c224], %68 {strides = array<i32>} : memref<128x288xf32, #tpu.memory_space<vmem>>, vector<128x32xf32>,
    %70 = vector.extract_strided_slice %45 {offsets = [0, 2, 9, 0], sizes = [2, 8, 8, 32], strides = [1, 1, 1, 1]} : vector<2x10x17x32xf32> to vector<2x8x8x32xf32>
    %71 = vector.shape_cast %70 : vector<2x8x8x32xf32> to vector<128x32xf32>
    %c0_55 = arith.constant 0 : index
    %c256 = arith.constant 256 : index
    %72 = vector.load %arg14[%c0_55, %c256] : memref<128x288xf32, #tpu.memory_space<vmem>>, vector<128x32xf32>
    tpu.vector_store %arg14[%c0_55, %c256], %71 {strides = array<i32>} : memref<128x288xf32, #tpu.memory_space<vmem>>, vector<128x32xf32>,
    %c0_56 = arith.constant 0 : index
    %c0_57 = arith.constant 0 : index
    %73 = vector.load %arg14[%c0_56, %c0_57] : memref<128x288xf32, #tpu.memory_space<vmem>>, vector<128x288xf32>
    %74 = arith.truncf %73 : vector<128x288xf32> to vector<128x288xbf16>
    %c0_58 = arith.constant 0 : index
    %c0_59 = arith.constant 0 : index
    %75 = vector.load %arg3[%c0_58, %c0_59] : memref<288x64xbf16, #tpu.memory_space<vmem>>, vector<288x64xbf16>
    %cst_60 = arith.constant dense<0.000000e+00> : vector<128x64xf32>
    %76 = tpu.matmul %74, %75, %cst_60 {dimension_numbers = #tpu.dot_dimension_numbers<[1], [0], [0], [1], [0, 0, 1, 1], [], []>} : vector<128x288xbf16>, vector<288x64xbf16>, vector<128x64xf32> -> vector<128x64xf32>
    %c0_61 = arith.constant 0 : index
    %c0_62 = arith.constant 0 : index
    %77 = vector.load %arg4[%c0_61, %c0_62] : memref<1x64xf32, #tpu.memory_space<vmem>>, vector<1x64xf32>
    %78 = vector.broadcast %77 : vector<1x64xf32> to vector<128x64xf32>
    %79 = arith.addf %76, %78 : vector<128x64xf32>
    %cst_63 = arith.constant 0.000000e+00 : f32
    %80 = vector.broadcast %cst_63 : f32 to vector<128x64xf32>
    %81 = arith.maximumf %79, %80 : vector<128x64xf32>
    %82 = arith.truncf %81 : vector<128x64xf32> to vector<128x64xbf16>
    %c0_64 = arith.constant 0 : index
    %c0_65 = arith.constant 0 : index
    %83 = vector.load %arg5[%c0_64, %c0_65] : memref<64x256xbf16, #tpu.memory_space<vmem>>, vector<64x256xbf16>
    %cst_66 = arith.constant dense<0.000000e+00> : vector<128x256xf32>
    %84 = tpu.matmul %82, %83, %cst_66 {dimension_numbers = #tpu.dot_dimension_numbers<[1], [0], [0], [1], [0, 0, 1, 1], [], []>} : vector<128x64xbf16>, vector<64x256xbf16>, vector<128x256xf32> -> vector<128x256xf32>
    %c0_67 = arith.constant 0 : index
    %c0_68 = arith.constant 0 : index
    %85 = vector.load %arg6[%c0_67, %c0_68] : memref<128x256xf32, #tpu.memory_space<vmem>>, vector<128x256xf32>
    %86 = arith.mulf %84, %85 : vector<128x256xf32>
    %c0_69 = arith.constant 0 : index
    %c0_70 = arith.constant 0 : index
    %87 = vector.load %arg7[%c0_69, %c0_70] : memref<256x4xf32, #tpu.memory_space<vmem>>, vector<256x4xf32>
    %cst_71 = arith.constant dense<0.000000e+00> : vector<128x4xf32>
    %88 = tpu.matmul %86, %87, %cst_71 {dimension_numbers = #tpu.dot_dimension_numbers<[1], [0], [0], [1], [0, 0, 1, 1], [], []>} : vector<128x256xf32>, vector<256x4xf32>, vector<128x4xf32> -> vector<128x4xf32>
    %c0_72 = arith.constant 0 : index
    %c0_73 = arith.constant 0 : index
    %89 = vector.load %arg8[%c0_72, %c0_73] : memref<2x128xf32, #tpu.memory_space<vmem>>, vector<2x128xf32>
    %cst_74 = arith.constant dense<0.000000e+00> : vector<2x4xf32>
    %90 = tpu.matmul %89, %88, %cst_74 {dimension_numbers = #tpu.dot_dimension_numbers<[1], [0], [0], [1], [0, 0, 1, 1], [], []>} : vector<2x128xf32>, vector<128x4xf32>, vector<2x4xf32> -> vector<2x4xf32>
    %c0_75 = arith.constant 0 : index
    %c0_76 = arith.constant 0 : index
    %91 = vector.load %arg9[%c0_75, %c0_76] : memref<1x4xf32, #tpu.memory_space<vmem>>, vector<1x4xf32>
    %92 = vector.broadcast %91 : vector<1x4xf32> to vector<2x4xf32>
    %93 = arith.addf %90, %92 : vector<2x4xf32>
    %c0_77 = arith.constant 0 : index
    %c0_78 = arith.constant 0 : index
    %94 = vector.load %arg10[%c0_77, %c0_78] : memref<2x4xf32, #tpu.memory_space<vmem>>, vector<2x4xf32>
    tpu.vector_store %arg10[%c0_77, %c0_78], %93 {strides = array<i32>} : memref<2x4xf32, #tpu.memory_space<vmem>>, vector<2x4xf32>,
    return
  }
}

</mosaic_0001>

<bundles_post_ra>
// kernel: cnn_qnet_forward.1
= control target key start
LH: loop header
LB: loop body
LE: loop exit
PB: predicated region body
PF: predicated region fallthrough
CT: control target
= control target key end

     0   :  { %vm53_vm0 = vcmask 31744   ;;  %v3351_v3 = vmov 0.0   ;;  %vm56_vm1 = vcmask 24576   ;;  %s3352_s15 = smov 4   ;;  %vm386_vm2 = vcmask 1046528   ;;  %s3353_s16 = smov 8   ;;  %s5113_s0 = inlined_call_operand.vmem [shape: f32[2,8,8,4], index: 0, kind: input, shape index: {}]   ;;  %s5114_s1 = inlined_call_operand.vmem [shape: bf16[36,32], index: 1, kind: input, shape index: {}]   ;;  %s5115_s2 = inlined_call_operand.vmem [shape: f32[1,32], index: 2, kind: input, shape index: {}]   ;;  %s5116_s3 = inlined_call_operand.vmem [shape: bf16[288,64], index: 3, kind: input, shape index: {}]   ;;  %s5117_s4 = inlined_call_operand.vmem [shape: f32[1,64], index: 4, kind: input, shape index: {}]   ;;  %s5118_s5 = inlined_call_operand.vmem [shape: bf16[64,256], index: 5, kind: input, shape index: {}]   ;;  %s5119_s6 = inlined_call_operand.vmem [shape: f32[128,256], index: 6, kind: input, shape index: {}]   ;;  %s5120_s7 = inlined_call_operand.vmem [shape: f32[256,4], index: 7, kind: input, shape index: {}]   ;;  %s5121_s8 = inlined_call_operand.vmem [shape: f32[2,128], index: 8, kind: input, shape index: {}]   ;;  %s5122_s9 = inlined_call_operand.vmem [shape: f32[1,4], index: 9, kind: input, shape index: {}]   ;;  %s5123_s10 = inlined_call_operand.hbm [shape: f32[2,4], index: 10, kind: output, shape index: {}]  }
   0x1   :  { %v38_v0 = vld [vmem:[%s5113_s0 + $0x8] sm:$0xff]  ;;  %v39_v1 = vld [vmem:[%s5113_s0 + $0x10] sm:$0xff]  ;;  %v37_v2 = vld [vmem:[%s5113_s0] sm:$0xff]  ;;  %55 = vst.msk [vmem:[#allocation2 + $0x8] sm:$0xff] %vm53_vm0, %v3351_v3  ;;  %vm224_vm3 = vcmask 1040384   ;;  %s3354_s19 = smov 12  }
   0x2   :  { %54 = vst.msk [vmem:[#allocation2] sm:$0xff] %vm53_vm0, %v3351_v3  ;;  %58 = vst.msk [vmem:[#allocation2 + $0x18] sm:$0xff] %vm53_vm0, %v3351_v3  ;;  %v40_v4 = vld [vmem:[%s5113_s0 + $0x18] sm:$0xff]  ;;  %v41_v5 = vld [vmem:[%s5113_s0 + $0x20] sm:$0xff]  ;;  %s3355_s20 = smov 16  }
   0x3   :  { %59 = vst.msk [vmem:[#allocation2 + $0x20] sm:$0xff] %vm53_vm0, %v3351_v3  ;;  %61 = vst.msk [vmem:[#allocation2 + $0x30] sm:$0xff] %vm53_vm0, %v3351_v3  ;;  %v43_v6 = vld [vmem:[%s5113_s0 + $0x30] sm:$0xff]  ;;  %v42_v7 = vld [vmem:[%s5113_s0 + $0x28] sm:$0xff] }
   0x4   :  { %62 = vst.msk [vmem:[#allocation2 + $0x38] sm:$0xff] %vm53_vm0, %v3351_v3  ;;  %64 = vst.msk [vmem:[#allocation2 + $0x48] sm:$0xff] %vm53_vm0, %v3351_v3  ;;  %v44_v8 = vld [vmem:[%s5113_s0 + $0x38] sm:$0xff]  ;;  %v45_v9 = vld [vmem:[%s5113_s0 + $0x40] sm:$0xff] }
   0x5   :  { %65 = vst.msk [vmem:[#allocation2 + $0x50] sm:$0xff] %vm53_vm0, %v3351_v3  ;;  %67 = vst.msk [vmem:[#allocation2 + $0x60] sm:$0xff] %vm53_vm0, %v3351_v3  ;;  %v47_v10 = vld [vmem:[%s5113_s0 + $0x50] sm:$0xff]  ;;  %v46_v11 = vld [vmem:[%s5113_s0 + $0x48] sm:$0xff] }
   0x6   :  { %68 = vst.msk [vmem:[#allocation2 + $0x68] sm:$0xff] %vm53_vm0, %v3351_v3  ;;  %70 = vst.msk [vmem:[#allocation2 + $0x78] sm:$0xff] %vm53_vm0, %v3351_v3 }
   0x7   :  { %71 = vst.msk [vmem:[#allocation2 + $0x80] sm:$0xff] %vm53_vm0, %v3351_v3  ;;  %73 = vst.msk [vmem:[#allocation2 + $0x90] sm:$0xff] %vm53_vm0, %v3351_v3 }
   0x8   :  { %74 = vst.msk [vmem:[#allocation2 + $0x98] sm:$0xff] %vm53_vm0, %v3351_v3  ;;  %76 = vst.msk [vmem:[#allocation2 + $0xa8] sm:$0xff] %vm53_vm0, %v3351_v3  ;;  %v3585_v12 = vld [vmem:[#allocation2 + $0x8] sm:$0xff] }
   0x9   :  { %77 = vst.msk [vmem:[#allocation2 + $0xb0] sm:$0xff] %vm53_vm0, %v3351_v3  ;;  %79 = vst.msk [vmem:[#allocation2 + $0xc0] sm:$0xff] %vm53_vm0, %v3351_v3  ;;  %v135_v14 = vld [vmem:[#allocation2 + $0x18] sm:$0xff]  ;;  %305 = vrot.lane.b32.xlu0 %v3585_v12, %s3352_s15  ;;  %v387_v15 = vrot.slane %v3585_v12, 1  ;;  %v132_v60 = vld [vmem:[#allocation2] sm:$0xff]  ;;  %v226_v61 = vrot.slane %v3585_v12, 7 }
   0xa   :  { %80 = vst.msk [vmem:[#allocation2 + $0xc8] sm:$0xff] %vm53_vm0, %v3351_v3  ;;  %82 = vst.msk [vmem:[#allocation2 + $0xd8] sm:$0xff] %vm53_vm0, %v3351_v3  ;;  %v138_v13 = vld [vmem:[#allocation2 + $0x30] sm:$0xff]  ;;  %v228_v34 = vrot.slane %v135_v14, 7 }
   0xb   :  { %83 = vst.msk [vmem:[#allocation2 + $0xe0] sm:$0xff] %vm53_vm0, %v3351_v3  ;;  %85 = vst.msk [vmem:[#allocation2 + $0xf0] sm:$0xff] %vm53_vm0, %v3351_v3  ;;  %v231_v22 = vrot.slane %v138_v13, 7  ;;  %v141_v36 = vld [vmem:[#allocation2 + $0x48] sm:$0xff] }
   0xc   :  { %86 = vst.msk [vmem:[#allocation2 + $0xf8] sm:$0xff] %vm53_vm0, %v3351_v3  ;;  %88 = vst.msk [vmem:[#allocation2 + $0x108] sm:$0xff] %vm53_vm0, %v3351_v3  ;;  %v144_v30 = vld [vmem:[#allocation2 + $0x60] sm:$0xff]  ;;  %v234_v45 = vrot.slane %v141_v36, 7 }
   0xd   :  { %89 = vst.msk [vmem:[#allocation2 + $0x110] sm:$0xff] %vm53_vm0, %v3351_v3  ;;  %91 = vst.msk [vmem:[#allocation2 + $0x120] sm:$0xff] %vm53_vm0, %v3351_v3  ;;  %v147_v37 = vld [vmem:[#allocation2 + $0x78] sm:$0xff]  ;;  %v237_v41 = vrot.slane %v144_v30, 7 }
   0xe   :  { %92 = vst.msk [vmem:[#allocation2 + $0x128] sm:$0xff] %vm53_vm0, %v3351_v3  ;;  %94 = vst.msk [vmem:[#allocation2 + $0x138] sm:$0xff] %vm53_vm0, %v3351_v3  ;;  %v240_v47 = vrot.slane %v147_v37, 7  ;;  %v150_v51 = vld [vmem:[#allocation2 + $0x90] sm:$0xff] }
   0xf   :  { %95 = vst.msk [vmem:[#allocation2 + $0x140] sm:$0xff] %vm53_vm0, %v3351_v3  ;;  %97 = vst.msk [vmem:[#allocation2 + $0x150] sm:$0xff] %vm53_vm0, %v3351_v3  ;;  %v153_v54 = vld [vmem:[#allocation2 + $0xa8] sm:$0xff]  ;;  %v243_v57 = vrot.slane %v150_v51, 7 }
  0x10   :  { %98 = vst.msk [vmem:[#allocation2 + $0x158] sm:$0xff] %vm53_vm0, %v3351_v3  ;;  %100 = vst.msk [vmem:[#allocation2 + $0x168] sm:$0xff] %vm53_vm0, %v3351_v3  ;;  %v246_v62 = vrot.slane %v153_v54, 7 }
  0x11   :  { %101 = vst.msk [vmem:[#allocation2 + $0x170] sm:$0xff] %vm53_vm0, %v3351_v3  ;;  %103 = vst.msk [vmem:[#allocation2 + $0x180] sm:$0xff] %vm53_vm0, %v3351_v3 }
  0x12   :  { %104 = vst.msk [vmem:[#allocation2 + $0x188] sm:$0xff] %vm53_vm0, %v3351_v3  ;;  %106 = vst.msk [vmem:[#allocation2 + $0x198] sm:$0xff] %vm53_vm0, %v3351_v3 }
  0x13   :  { %107 = vst.msk [vmem:[#allocation2 + $0x1a0] sm:$0xff] %vm53_vm0, %v3351_v3  ;;  %109 = vst.msk [vmem:[#allocation2 + $0x1b0] sm:$0xff] %vm53_vm0, %v3351_v3 }
  0x14   :  { %110 = vst.msk [vmem:[#allocation2 + $0x1b8] sm:$0xff] %vm53_vm0, %v3351_v3  ;;  %112 = vst.msk [vmem:[#allocation2 + $0x1c8] sm:$0xff] %vm53_vm0, %v3351_v3 }
  0x15   :  { %113 = vst.msk [vmem:[#allocation2 + $0x1d0] sm:$0xff] %vm53_vm0, %v3351_v3  ;;  %117 = vst.msk [vmem:[#allocation2 + $0x38] sm:$0xff] %vm53_vm0, %v38_v0  ;;  %v48_v0 = vld [vmem:[%s5113_s0 + $0x58] sm:$0xff] }
  0x16   :  { %118 = vst.msk [vmem:[#allocation2 + $0x50] sm:$0xff] %vm53_vm0, %v39_v1  ;;  %116 = vst.msk [vmem:[#allocation2 + $0x20] sm:$0xff] %vm53_vm0, %v37_v2  ;;  %v171_v12 = vld [vmem:[#allocation2 + $0x138] sm:$0xff] }
  0x17   :  { %57 = vst.msk [vmem:[#allocation2 + $0x10] sm:$0x1] %vm56_vm1, %v3351_v3  ;;  %60 = vst.msk [vmem:[#allocation2 + $0x28] sm:$0x1] %vm56_vm1, %v3351_v3 }
  0x18   :  { %63 = vst.msk [vmem:[#allocation2 + $0x40] sm:$0x1] %vm56_vm1, %v3351_v3  ;;  %66 = vst.msk [vmem:[#allocation2 + $0x58] sm:$0x1] %vm56_vm1, %v3351_v3 }
  0x19   :  { %69 = vst.msk [vmem:[#allocation2 + $0x70] sm:$0x1] %vm56_vm1, %v3351_v3  ;;  %72 = vst.msk [vmem:[#allocation2 + $0x88] sm:$0x1] %vm56_vm1, %v3351_v3 }
  0x1a   :  { %75 = vst.msk [vmem:[#allocation2 + $0xa0] sm:$0x1] %vm56_vm1, %v3351_v3  ;;  %78 = vst.msk [vmem:[#allocation2 + $0xb8] sm:$0x1] %vm56_vm1, %v3351_v3 }
  0x1b   :  { %81 = vst.msk [vmem:[#allocation2 + $0xd0] sm:$0x1] %vm56_vm1, %v3351_v3  ;;  %84 = vst.msk [vmem:[#allocation2 + $0xe8] sm:$0x1] %vm56_vm1, %v3351_v3 }
  0x1c   :  { %87 = vst.msk [vmem:[#allocation2 + $0x100] sm:$0x1] %vm56_vm1, %v3351_v3  ;;  %90 = vst.msk [vmem:[#allocation2 + $0x118] sm:$0x1] %vm56_vm1, %v3351_v3  ;;  %v3590_v16 = vld [vmem:[#allocation2 + $0x38] sm:$0xff] }
  0x1d   :  { %93 = vst.msk [vmem:[#allocation2 + $0x130] sm:$0x1] %vm56_vm1, %v3351_v3  ;;  %96 = vst.msk [vmem:[#allocation2 + $0x148] sm:$0x1] %vm56_vm1, %v3351_v3  ;;  %v3592_v17 = vld [vmem:[#allocation2 + $0x50] sm:$0xff]  ;;  %v3594_v18 = vld [vmem:[#allocation2 + $0x20] sm:$0xff]  ;;  %309 = vrot.lane.b32.xlu1 %v3590_v16, %s3352_s15 }
  0x1e   :  { %99 = vst.msk [vmem:[#allocation2 + $0x160] sm:$0x1] %vm56_vm1, %v3351_v3  ;;  %102 = vst.msk [vmem:[#allocation2 + $0x178] sm:$0x1] %vm56_vm1, %v3351_v3  ;;  %v134_v19 = vld [vmem:[#allocation2 + $0x10] sm:$0x1]  ;;  %307 = vrot.lane.b32.xlu0 %v3594_v18, %s3352_s15 }
  0x1f   :  { %105 = vst.msk [vmem:[#allocation2 + $0x190] sm:$0x1] %vm56_vm1, %v3351_v3  ;;  %108 = vst.msk [vmem:[#allocation2 + $0x1a8] sm:$0x1] %vm56_vm1, %v3351_v3  ;;  %v137_v20 = vld [vmem:[#allocation2 + $0x28] sm:$0x1] }
  0x20   :  { %111 = vst.msk [vmem:[#allocation2 + $0x1c0] sm:$0x1] %vm56_vm1, %v3351_v3  ;;  %114 = vst.msk [vmem:[#allocation2 + $0x1d8] sm:$0x1] %vm56_vm1, %v3351_v3  ;;  %v390_v21 = vrot.slane %v3594_v18, 1  ;;  %v388_v23 = vrot.slane %v134_v19, 1 }
  0x21   :  { %119 = vst.msk [vmem:[#allocation2 + $0x68] sm:$0xff] %vm53_vm0, %v40_v4  ;;  %120 = vst.msk [vmem:[#allocation2 + $0x80] sm:$0xff] %vm53_vm0, %v41_v5  ;;  %v391_v24 = vrot.slane %v137_v20, 1  ;;  %v140_v25 = vld [vmem:[#allocation2 + $0x40] sm:$0x1]  ;;  %v393_v27 = vrot.slane %v3590_v16, 1  ;;  %311 = vrot.lane.b32.xlu1 %v3592_v17, %s3352_s15 }
  0x22   :  { %122 = vst.msk [vmem:[#allocation2 + $0xb0] sm:$0xff] %vm53_vm0, %v43_v6  ;;  %121 = vst.msk [vmem:[#allocation2 + $0x98] sm:$0xff] %vm53_vm0, %v42_v7  ;;  %v143_v26 = vld [vmem:[#allocation2 + $0x58] sm:$0x1]  ;;  %v394_v28 = vrot.slane %v140_v25, 1  ;;  %v232_v29 = vrot.slane %v3590_v16, 7  ;;  %v389_v38 = vsel %vm386_vm2, %v387_v15, %v388_v23 }
  0x23   :  { %123 = vst.msk [vmem:[#allocation2 + $0xc8] sm:$0xff] %vm53_vm0, %v44_v8  ;;  %124 = vst.msk [vmem:[#allocation2 + $0x110] sm:$0xff] %vm53_vm0, %v45_v9  ;;  %v396_v32 = vrot.slane %v3592_v17, 1  ;;  %v397_v33 = vrot.slane %v143_v26, 1  ;;  %v229_v35 = vrot.slane %v3594_v18, 7  ;;  %v3611_v39 = vsel %vm386_vm2, %v390_v21, %v391_v24  ;;  %435 = vrot.lane.b32.xlu0 %v389_v38, %s3353_s16  ;;  %v168_v6 = vld [vmem:[#allocation2 + $0x120] sm:$0xff] }
  0x24   :  { %126 = vst.msk [vmem:[#allocation2 + $0x140] sm:$0xff] %vm53_vm0, %v47_v10  ;;  %125 = vst.msk [vmem:[#allocation2 + $0x128] sm:$0xff] %vm53_vm0, %v46_v11  ;;  %v3614_v40 = vsel %vm224_vm3, %v231_v22, %v232_v29  ;;  %v235_v46 = vrot.slane %v3592_v17, 7  ;;  %v3635_v52 = vsel %vm386_vm2, %v393_v27, %v394_v28  ;;  %v225_v4 = vrot.slane %v132_v60, 7  ;;  %v165_v9 = vld [vmem:[#allocation2 + $0x108] sm:$0xff]  ;;  %v174_v11 = vld [vmem:[#allocation2 + $0x150] sm:$0xff] }
  0x25   :  { %291 = vst.msk [vmem:[#allocation3 + $0x10] sm:$0xff] %vm53_vm0, %v3614_v40  ;;  %v230_v43 = vsel %vm224_vm3, %v228_v34, %v229_v35  ;;  %437 = vrot.lane.b32.xlu1 %v3611_v39, %s3353_s16  ;;  %v3645_v55 = vsel %vm386_vm2, %v396_v32, %v397_v33  ;;  %127 = vst.msk [vmem:[#allocation2 + $0x158] sm:$0xff] %vm53_vm0, %v48_v0  ;;  %v255_v13 = vrot.slane %v168_v6, 7  ;;  %v146_v15 = vld [vmem:[#allocation2 + $0x70] sm:$0x1]  ;;  %v252_v19 = vrot.slane %v165_v9, 7 }
  0x26   :  { %290 = vst.msk [vmem:[#allocation3 + $0x8] sm:$0xff] %vm53_vm0, %v230_v43  ;;  %v3630_v50 = vsel %vm224_vm3, %v234_v45, %v235_v46  ;;  %v227_v5 = vsel %vm224_vm3, %v225_v4, %v226_v61  ;;  %v261_v24 = vrot.slane %v174_v11, 7  ;;  %v258_v27 = vrot.slane %v171_v12, 7 }
  0x27   :  { %292 = vst.msk [vmem:[#allocation3 + $0x18] sm:$0xff] %vm53_vm0, %v3630_v50  ;;  %439 = vrot.lane.b32.xlu0 %v3635_v52, %s3353_s16  ;;  %289 = vst.msk [vmem:[#allocation3] sm:$0xff] %vm53_vm0, %v227_v5  ;;  %v400_v32 = vrot.slane %v146_v15, 1 }
  0x28   :  { %v3601_v31 = vld [vmem:[#allocation2 + $0x68] sm:$0xff]  ;;  %v3616_v42 = vld [vmem:[#allocation2 + $0x80] sm:$0xff] }
  0x29   :  { %v238_v44 = vrot.slane %v3601_v31, 7  ;;  %v241_v48 = vrot.slane %v3616_v42, 7  ;;  %v3649_v56 = vld [vmem:[#allocation2 + $0x98] sm:$0xff]  ;;  %v3651_v58 = vld [vmem:[#allocation2 + $0xb0] sm:$0xff]  ;;  %441 = vrot.lane.b32.xlu1 %v3645_v55, %s3353_s16  ;;  %v399_v10 = vrot.slane %v3601_v31, 1 }
  0x2a   :  { %v244_v59 = vrot.slane %v3649_v56, 7  ;;  %v247_v63 = vrot.slane %v3651_v58, 7  ;;  %v3679_v7 = vld [vmem:[#allocation2 + $0x110] sm:$0xff] }
  0x2b   :  { %v3627_v49 = vsel %vm224_vm3, %v237_v41, %v238_v44  ;;  %v3642_v53 = vsel %vm224_vm3, %v240_v47, %v241_v48  ;;  %510 = vrot.lane.b32.xlu0 %v230_v43, %s3354_s19  ;;  %v3681_v8 = vld [vmem:[#allocation2 + $0x128] sm:$0xff]  ;;  %v253_v20 = vrot.slane %v3679_v7, 7  ;;  %v3692_v22 = vld [vmem:[#allocation2 + $0x140] sm:$0xff] }
  0x2c   :  { %293 = vst.msk [vmem:[#allocation3 + $0x20] sm:$0xff] %vm53_vm0, %v3627_v49  ;;  %294 = vst.msk [vmem:[#allocation3 + $0x28] sm:$0xff] %vm53_vm0, %v3642_v53  ;;  %v3664_v1 = vsel %vm224_vm3, %v243_v57, %v244_v59  ;;  %v3670_v2 = vsel %vm224_vm3, %v246_v62, %v247_v63  ;;  %v256_v14 = vrot.slane %v3681_v8, 7  ;;  %v3688_v21 = vld [vmem:[#allocation2 + $0x158] sm:$0xff]  ;;  %v259_v28 = vrot.slane %v3692_v22, 7 }
  0x2d   :  { %295 = vst.msk [vmem:[#allocation3 + $0x30] sm:$0xff] %vm53_vm0, %v3664_v1  ;;  %296 = vst.msk [vmem:[#allocation3 + $0x38] sm:$0xff] %vm53_vm0, %v3670_v2  ;;  %512 = vrot.lane.b32.xlu1 %v3614_v40, %s3354_s19  ;;  %v262_v25 = vrot.slane %v3688_v21, 7  ;;  %v3701_v26 = vsel %vm224_vm3, %v252_v19, %v253_v20 }
  0x2e   :  { %v3695_v23 = vsel %vm224_vm3, %v255_v13, %v256_v14  ;;  %298 = vst.msk [vmem:[#allocation3 + $0x48] sm:$0xff] %vm53_vm0, %v3701_v26  ;;  %v3714_v30 = vsel %vm224_vm3, %v258_v27, %v259_v28 }
  0x2f   :  { %514 = vrot.lane.b32.xlu0 %v3630_v50, %s3354_s19  ;;  %299 = vst.msk [vmem:[#allocation3 + $0x50] sm:$0xff] %vm53_vm0, %v3695_v23  ;;  %v3707_v29 = vsel %vm224_vm3, %v261_v24, %v262_v25  ;;  %300 = vst.msk [vmem:[#allocation3 + $0x58] sm:$0xff] %vm53_vm0, %v3714_v30 }
  0x30   :  { %301 = vst.msk [vmem:[#allocation3 + $0x60] sm:$0xff] %vm53_vm0, %v3707_v29 }
  0x31   :  { %516 = vrot.lane.b32.xlu1 %v3627_v49, %s3354_s19 }
  0x33   :  { %575 = vrot.lane.b32.xlu0 %v3594_v18, %s3355_s20 }
  0x35   :  { %577 = vrot.lane.b32.xlu1 %v3590_v16, %s3355_s20 }
  0x37   :  { %579 = vrot.lane.b32.xlu0 %v3592_v17, %s3355_s20 }
  0x39   :  { %581 = vrot.lane.b32.xlu1 %v3601_v31, %s3355_s20 }
  0x3a   :  { %15 = vsyncpa [#allocation7], 0  ;;  %s3356_s21 = smov 20   ;;  %v49_v18 = vld [vmem:[%s5113_s0 + $0x60] sm:$0xff]  ;;  %v401_v33 = vsel %vm386_vm2, %v399_v10, %v400_v32  ;;  %s3357_s24 = smov 24   ;;  %v177_v34 = vld [vmem:[#allocation2 + $0x168] sm:$0xff] }
  0x3b   :  { %648 = vrot.lane.b32.xlu0 %v3611_v39, %s3356_s21  ;;  %128 = vst.msk [vmem:[#allocation2 + $0x170] sm:$0xff] %vm53_vm0, %v49_v18  ;;  %v264_v36 = vrot.slane %v177_v34, 7  ;;  %v3294_v39 = vld [vmem:[%s5114_s1] sm:$0xff]   ;;  %s3358_s27 = smov 28   ;;  %v149_v41 = vld [vmem:[#allocation2 + $0x88] sm:$0x1] }
  0x3c   :  { %3129 = vmatprep.subr.bf16.mxu0 %v3294_v39  ;;  %v3296_v43 = vld [vmem:[%s5114_s1 + $0x10] ss:$0 sps:$4 sm:$0x33]   ;;  %vm1002_vm4 = vcmask 1041408   ;;  %v403_v44 = vrot.slane %v149_v41, 1  ;;  %s3359_s12 = smov 32  }
  0x3d   :  { %650 = vrot.lane.b32.xlu1 %v3635_v52, %s3356_s21  ;;  %3130 = vmatpush3.bf16.msra.mxu0 %v3294_v39  ;;  %v1004_v45 = vsel %vm1002_vm4, %v3296_v43, 0  ;;  %v51_v46 = vld [vmem:[%s5113_s0 + $0x70] sm:$0xff]  ;;  %v50_v47 = vld [vmem:[%s5113_s0 + $0x68] sm:$0xff]  ;;  %v152_v48 = vld [vmem:[#allocation2 + $0xa0] sm:$0x1]  ;;  %vm353_vm5 = vcmask 64544  }
  0x3e   :  { %130 = vst.msk [vmem:[#allocation2 + $0x1a0] sm:$0xff] %vm53_vm0, %v51_v46  ;;  %129 = vst.msk [vmem:[#allocation2 + $0x188] sm:$0xff] %vm53_vm0, %v50_v47  ;;  %v406_v51 = vrot.slane %v152_v48, 1  ;;  %v156_v59 = vld [vmem:[#allocation2 + $0xc0] sm:$0xff]  ;;  %v157_v60 = vld [vmem:[#allocation2 + $0xc8] sm:$0xff]  ;;  %vm483_vm6 = vcmask 97344  }
  0x3f   :  { %652 = vrot.lane.b32.xlu0 %v3645_v55, %s3356_s21  ;;  %v180_v62 = vld [vmem:[#allocation2 + $0x180] sm:$0xff]  ;;  %v504_v63 = vrot.slane %v156_v59, 7  ;;  %v505_v0 = vrot.slane %v157_v60, 7  ;;  %v183_v10 = vld [vmem:[#allocation2 + $0x198] sm:$0xff]  ;;  %v158_v14 = vld [vmem:[#allocation2 + $0xd0] sm:$0x1] }
  0x40   :  { %v267_v4 = vrot.slane %v180_v62, 7  ;;  %v270_v12 = vrot.slane %v183_v10, 7  ;;  %v642_v15 = vrot.slane %v157_v60, 1  ;;  %v643_v19 = vrot.slane %v158_v14, 1  ;;  %v159_v24 = vld [vmem:[#allocation2 + $0xd8] sm:$0xff] }
  0x41   :  { %654 = vrot.lane.b32.xlu1 %v401_v33, %s3356_s21  ;;  %v506_v11 = vsel %vm224_vm3, %v504_v63, %v505_v0  ;;  %v717_v25 = vrot.slane %v159_v24, 7  ;;  %v163_v32 = vld [vmem:[#allocation2 + $0xf8] sm:$0xff]  ;;  %vm558_vm7 = vcmask 130144   ;;  %v420_v63 = vrot.slane %v3692_v22, 1 }
  0x42   :  { %v3740_v35 = vld [vmem:[#allocation2 + $0x170] sm:$0xff]  ;;  %v644_v20 = vsel %vm386_vm2, %v642_v15, %v643_v19  ;;  %v250_v18 = vrot.slane %v163_v32, 7  ;;  %v167_v46 = vld [vmem:[#allocation2 + $0x118] sm:$0x1]  ;;  %v411_v47 = vrot.slane %v163_v32, 1  ;;  %vm623_vm8 = vcmask 162944  }
  0x43   :  { %723 = vrot.lane.b32.xlu0 %v3614_v40, %s3357_s24  ;;  %v265_v37 = vrot.slane %v3740_v35, 7  ;;  %v3295_v40 = vld [vmem:[%s5114_s1 + $0x8] sm:$0xff]   ;;  %vm696_vm9 = vcmask 195744   ;;  %vm771_vm10 = vcmask 228544   ;;  %vm836_vm11 = vcmask 261344  }
  0x44   :  { %3131 = vmatprep.subr.bf16.mxu0 %v3295_v40  ;;  %vm909_vm12 = vcmask 294144   ;;  %vm977_vm13 = vcmask 293888   ;;  %vm1119_vm14 = vcmask 261120   ;;  %vm1122_vm15 = vcmask 253952  }
  0x45   :  { %725 = vrot.lane.b32.xlu1 %v3630_v50, %s3357_s24  ;;  %v3746_v38 = vsel %vm224_vm3, %v264_v36, %v265_v37  ;;  %3132 = vmatpush3.bf16.msra.mxu0 %v3295_v40  ;;  %v405_v50 = vrot.slane %v3649_v56, 1  ;;  %v3811_v61 = vld [vmem:[#allocation2 + $0x188] sm:$0xff]  ;;  %v3821_v9 = vld [vmem:[#allocation2 + $0x1a0] sm:$0xff]  ;;  %1121 = vst.msk [vmem:[#allocation4 + $0x8] sm:$0xff] %vm1119_vm14, %v3351_v3  ;;  %1120 = vst.msk [vmem:[#allocation4] sm:$0xff] %vm1119_vm14, %v3351_v3  ;;  %vm1547_vm1 = vcmask 785920  }
  0x46   :  { %302 = vst.msk [vmem:[#allocation3 + $0x68] sm:$0xff] %vm53_vm0, %v3746_v38  ;;  %3278 = vmatprep.subr.msk.bf16.mxu0 %vm1002_vm4, %v3296_v43  ;;  %v268_v5 = vrot.slane %v3811_v61, 7  ;;  %v271_v13 = vrot.slane %v3821_v9, 7  ;;  %v161_v37 = vld [vmem:[#allocation2 + $0xe8] sm:$0x1]  ;;  %vm1622_vm4 = vcmask 1048320  }
  0x47   :  { %727 = vrot.lane.b32.xlu0 %v3627_v49, %s3357_s24  ;;  %v155_v49 = vld [vmem:[#allocation2 + $0xb8] sm:$0x1]  ;;  %v856_v40 = vrot.slane %v161_v37, 1  ;;  %1124 = vst.msk [vmem:[#allocation4 + $0x18] sm:$0xff] %vm1119_vm14, %v3351_v3  ;;  %1125 = vst.msk [vmem:[#allocation4 + $0x20] sm:$0xff] %vm1119_vm14, %v3351_v3 }
  0x48   :  { %v409_v54 = vrot.slane %v155_v49, 1  ;;  %v3817_v6 = vsel %vm224_vm3, %v267_v4, %v268_v5  ;;  %1127 = vst.msk [vmem:[#allocation4 + $0x30] sm:$0xff] %vm1119_vm14, %v3351_v3  ;;  %1128 = vst.msk [vmem:[#allocation4 + $0x38] sm:$0xff] %vm1119_vm14, %v3351_v3 }
  0x49   :  { %729 = vrot.lane.b32.xlu1 %v3642_v53, %s3357_s24  ;;  %3134 = vmatpush3.bf16.msra.mxu0 %v1004_v45  ;;  %303 = vst.msk [vmem:[#allocation3 + $0x70] sm:$0xff] %vm53_vm0, %v3817_v6  ;;  %v164_v45 = vld [vmem:[#allocation2 + $0x100] sm:$0x1] }
  0x4a   :  { %v412_v48 = vrot.slane %v164_v45, 1  ;;  %1130 = vst.msk [vmem:[#allocation4 + $0x48] sm:$0xff] %vm1119_vm14, %v3351_v3  ;;  %1131 = vst.msk [vmem:[#allocation4 + $0x50] sm:$0xff] %vm1119_vm14, %v3351_v3 }
  0x4b   :  { %788 = vrot.lane.b32.xlu0 %v3590_v16, %s3358_s27  ;;  %v402_v16 = vrot.slane %v3616_v42, 1  ;;  %1133 = vst.msk [vmem:[#allocation4 + $0x60] sm:$0xff] %vm1119_vm14, %v3351_v3  ;;  %1134 = vst.msk [vmem:[#allocation4 + $0x68] sm:$0xff] %vm1119_vm14, %v3351_v3 }
  0x4c   :  { %1136 = vst.msk [vmem:[#allocation4 + $0x78] sm:$0xff] %vm1119_vm14, %v3351_v3  ;;  %1137 = vst.msk [vmem:[#allocation4 + $0x80] sm:$0xff] %vm1119_vm14, %v3351_v3 }
  0x4d   :  { %790 = vrot.lane.b32.xlu1 %v3592_v17, %s3358_s27  ;;  %v404_v17 = vsel %vm386_vm2, %v402_v16, %v403_v44  ;;  %1139 = vst.msk [vmem:[#allocation4 + $0x90] sm:$0xff] %vm1119_vm14, %v3351_v3  ;;  %1140 = vst.msk [vmem:[#allocation4 + $0x98] sm:$0xff] %vm1119_vm14, %v3351_v3 }
  0x4e   :  { %1142 = vst.msk [vmem:[#allocation4 + $0xa8] sm:$0xff] %vm1119_vm14, %v3351_v3  ;;  %1143 = vst.msk [vmem:[#allocation4 + $0xb0] sm:$0xff] %vm1119_vm14, %v3351_v3 }
  0x4f   :  { %792 = vrot.lane.b32.xlu0 %v3601_v31, %s3358_s27  ;;  %1145 = vst.msk [vmem:[#allocation4 + $0xc0] sm:$0xff] %vm1119_vm14, %v3351_v3  ;;  %1146 = vst.msk [vmem:[#allocation4 + $0xc8] sm:$0xff] %vm1119_vm14, %v3351_v3 }
  0x50   :  { %1148 = vst.msk [vmem:[#allocation4 + $0xd8] sm:$0xff] %vm1119_vm14, %v3351_v3  ;;  %1149 = vst.msk [vmem:[#allocation4 + $0xe0] sm:$0xff] %vm1119_vm14, %v3351_v3 }
  0x51   :  { %794 = vrot.lane.b32.xlu1 %v3616_v42, %s3358_s27  ;;  %1151 = vst.msk [vmem:[#allocation4 + $0xf0] sm:$0xff] %vm1119_vm14, %v3351_v3  ;;  %1152 = vst.msk [vmem:[#allocation4 + $0xf8] sm:$0xff] %vm1119_vm14, %v3351_v3 }
  0x52   :  { %1154 = vst.msk [vmem:[#allocation4 + $0x108] sm:$0xff] %vm1119_vm14, %v3351_v3  ;;  %1155 = vst.msk [vmem:[#allocation4 + $0x110] sm:$0xff] %vm1119_vm14, %v3351_v3 }
  0x53   :  { %861 = vrot.lane.b32.xlu0 %v3635_v52, %s3359_s12  ;;  %v408_v52 = vrot.slane %v3651_v58, 1  ;;  %1157 = vst.msk [vmem:[#allocation4 + $0x120] sm:$0xff] %vm1119_vm14, %v3351_v3  ;;  %1158 = vst.msk [vmem:[#allocation4 + $0x128] sm:$0xff] %vm1119_vm14, %v3351_v3 }
  0x54   :  { %1160 = vst.msk [vmem:[#allocation4 + $0x138] sm:$0xff] %vm1119_vm14, %v3351_v3  ;;  %1161 = vst.msk [vmem:[#allocation4 + $0x140] sm:$0xff] %vm1119_vm14, %v3351_v3 }
  0x55   :  { %863 = vrot.lane.b32.xlu1 %v3645_v55, %s3359_s12  ;;  %v52_v55 = vld [vmem:[%s5113_s0 + $0x78] sm:$0xff]  ;;  %v3804_v57 = vsel %vm386_vm2, %v408_v52, %v409_v54  ;;  %v170_v52 = vld [vmem:[#allocation2 + $0x130] sm:$0x1]  ;;  %1163 = vst.msk [vmem:[#allocation4 + $0x150] sm:$0xff] %vm1119_vm14, %v3351_v3  ;;  %1164 = vst.msk [vmem:[#allocation4 + $0x158] sm:$0xff] %vm1119_vm14, %v3351_v3  ;;  %s3360_s0 = smov 64  }
  0x56   :  { %131 = vst.msk [vmem:[#allocation2 + $0x1b8] sm:$0xff] %vm53_vm0, %v52_v55  ;;  %v413_v55 = vsel %vm386_vm2, %v411_v47, %v412_v48  ;;  %v418_v59 = vrot.slane %v170_v52, 1  ;;  %v182_v52 = vld [vmem:[#allocation2 + $0x190] sm:$0x1] }
  0x57   :  { %865 = vrot.lane.b32.xlu0 %v401_v33, %s3359_s12  ;;  %1166 = vst.msk [vmem:[#allocation4 + $0x168] sm:$0xff] %vm1119_vm14, %v3351_v3  ;;  %1167 = vst.msk [vmem:[#allocation4 + $0x170] sm:$0xff] %vm1119_vm14, %v3351_v3 }
  0x58   :  { %1169 = vst.msk [vmem:[#allocation4 + $0x180] sm:$0xff] %vm1119_vm14, %v3351_v3  ;;  %1170 = vst.msk [vmem:[#allocation4 + $0x188] sm:$0xff] %vm1119_vm14, %v3351_v3 }
  0x59   :  { %867 = vrot.lane.b32.xlu1 %v404_v17, %s3359_s12  ;;  %1172 = vst.msk [vmem:[#allocation4 + $0x198] sm:$0xff] %vm1119_vm14, %v3351_v3  ;;  %1173 = vst.msk [vmem:[#allocation4 + $0x1a0] sm:$0xff] %vm1119_vm14, %v3351_v3 }
  0x5a   :  { %1175 = vst.msk [vmem:[#allocation4 + $0x1b0] sm:$0xff] %vm1119_vm14, %v3351_v3  ;;  %1176 = vst.msk [vmem:[#allocation4 + $0x1b8] sm:$0xff] %vm1119_vm14, %v3351_v3 }
  0x5b   :  { %313 = vrot.lane.b32.xlu0 %v3601_v31, %s3352_s15  ;;  %v3798_v31 = vsel %vm386_vm2, %v405_v50, %v406_v51  ;;  %v414_v50 = vrot.slane %v3679_v7, 1  ;;  %v415_v51 = vrot.slane %v167_v46, 1  ;;  %1178 = vst.msk [vmem:[#allocation4 + $0x1c8] sm:$0xff] %vm1119_vm14, %v3351_v3  ;;  %1179 = vst.msk [vmem:[#allocation4 + $0x1d0] sm:$0xff] %vm1119_vm14, %v3351_v3 }
  0x5c   :  { %1123 = vst.msk [vmem:[#allocation4 + $0x10] sm:$0x1] %vm1122_vm15, %v3351_v3  ;;  %1126 = vst.msk [vmem:[#allocation4 + $0x28] sm:$0x1] %vm1122_vm15, %v3351_v3 }
  0x5d   :  { %315 = vrot.lane.b32.xlu1 %v3616_v42, %s3352_s15  ;;  %v416_v62 = vsel %vm386_vm2, %v414_v50, %v415_v51  ;;  %1129 = vst.msk [vmem:[#allocation4 + $0x40] sm:$0x1] %vm1122_vm15, %v3351_v3  ;;  %1132 = vst.msk [vmem:[#allocation4 + $0x58] sm:$0x1] %vm1122_vm15, %v3351_v3 }
  0x5e   :  { %1135 = vst.msk [vmem:[#allocation4 + $0x70] sm:$0x1] %vm1122_vm15, %v3351_v3  ;;  %1138 = vst.msk [vmem:[#allocation4 + $0x88] sm:$0x1] %vm1122_vm15, %v3351_v3 }
  0x5f   :  { %317 = vrot.lane.b32.xlu0 %v3649_v56, %s3352_s15  ;;  %1141 = vst.msk [vmem:[#allocation4 + $0xa0] sm:$0x1] %vm1122_vm15, %v3351_v3  ;;  %1144 = vst.msk [vmem:[#allocation4 + $0xb8] sm:$0x1] %vm1122_vm15, %v3351_v3 }
  0x60   :  { %1147 = vst.msk [vmem:[#allocation4 + $0xd0] sm:$0x1] %vm1122_vm15, %v3351_v3  ;;  %1150 = vst.msk [vmem:[#allocation4 + $0xe8] sm:$0x1] %vm1122_vm15, %v3351_v3 }
  0x61   :  { %319 = vrot.lane.b32.xlu1 %v3651_v58, %s3352_s15  ;;  %1153 = vst.msk [vmem:[#allocation4 + $0x100] sm:$0x1] %vm1122_vm15, %v3351_v3  ;;  %1156 = vst.msk [vmem:[#allocation4 + $0x118] sm:$0x1] %vm1122_vm15, %v3351_v3 }
  0x62   :  { %1159 = vst.msk [vmem:[#allocation4 + $0x130] sm:$0x1] %vm1122_vm15, %v3351_v3  ;;  %1162 = vst.msk [vmem:[#allocation4 + $0x148] sm:$0x1] %vm1122_vm15, %v3351_v3 }
  0x63   :  { %443 = vrot.lane.b32.xlu0 %v401_v33, %s3353_s16  ;;  %v162_v33 = vld [vmem:[#allocation2 + $0xf0] sm:$0xff]  ;;  %1165 = vst.msk [vmem:[#allocation4 + $0x160] sm:$0x1] %vm1122_vm15, %v3351_v3  ;;  %1168 = vst.msk [vmem:[#allocation4 + $0x178] sm:$0x1] %vm1122_vm15, %v3351_v3 }
  0x64   :  { %v249_v34 = vrot.slane %v162_v33, 7  ;;  %1171 = vst.msk [vmem:[#allocation4 + $0x190] sm:$0x1] %vm1122_vm15, %v3351_v3  ;;  %1174 = vst.msk [vmem:[#allocation4 + $0x1a8] sm:$0x1] %vm1122_vm15, %v3351_v3 }
  0x65   :  { %445 = vrot.lane.b32.xlu1 %v404_v17, %s3353_s16  ;;  %1177 = vst.msk [vmem:[#allocation4 + $0x1c0] sm:$0x1] %vm1122_vm15, %v3351_v3  ;;  %1180 = vst.msk [vmem:[#allocation4 + $0x1d8] sm:$0x1] %vm1122_vm15, %v3351_v3 }
  0x67   :  { %447 = vrot.lane.b32.xlu0 %v3798_v31, %s3353_s16 }
  0x69   :  { %449 = vrot.lane.b32.xlu1 %v3804_v57, %s3353_s16 }
  0x6b   :  { %518 = vrot.lane.b32.xlu0 %v3642_v53, %s3354_s19  ;;  %v3830_v53 = vsel %vm224_vm3, %v270_v12, %v271_v13 }
  0x6c   :  { %304 = vst.msk [vmem:[#allocation3 + $0x78] sm:$0xff] %vm53_vm0, %v3830_v53 }
  0x6d   :  { %520 = vrot.lane.b32.xlu1 %v3664_v1, %s3354_s19 }
  0x6f   :  { %522 = vrot.lane.b32.xlu0 %v3670_v2, %s3354_s19 }
  0x71   :  { %524 = vrot.lane.b32.xlu1 %v506_v11, %s3354_s19 }
  0x73   :  { %583 = vrot.lane.b32.xlu0 %v3616_v42, %s3355_s20  ;;  %v160_v42 = vld [vmem:[#allocation2 + $0xe0] sm:$0xff] }
  0x74   :  { %v718_v27 = vrot.slane %v160_v42, 7  ;;  %v855_v39 = vrot.slane %v160_v42, 1 }
  0x75   :  { %585 = vrot.lane.b32.xlu1 %v3649_v56, %s3355_s20 }
  0x76   :  { %v719_v28 = vsel %vm224_vm3, %v717_v25, %v718_v27  ;;  %v857_v43 = vsel %vm386_vm2, %v855_v39, %v856_v40  ;;  %v176_v25 = vld [vmem:[#allocation2 + $0x160] sm:$0x1] }
  0x77   :  { %587 = vrot.lane.b32.xlu0 %v3651_v58, %s3355_s20 }
  0x79   :  { %589 = vrot.lane.b32.xlu1 %v157_v60, %s3355_s20 }
  0x7b   :  { %656 = vrot.lane.b32.xlu0 %v404_v17, %s3356_s21 }
  0x7d   :  { %658 = vrot.lane.b32.xlu1 %v3798_v31, %s3356_s21 }
  0x7f   :  { %660 = vrot.lane.b32.xlu0 %v3804_v57, %s3356_s21 }
  0x81   :  { %662 = vrot.lane.b32.xlu1 %v644_v20, %s3356_s21 }
  0x83   :  { %731 = vrot.lane.b32.xlu0 %v3664_v1, %s3357_s24  ;;  %v306_v1 = vpop.permute.xlu0 %305 }
  0x84   :  { %354 = vst.msk [vmem:[#allocation3] sm:$0xff] %vm353_vm5, %v306_v1 }
  0x85   :  { %733 = vrot.lane.b32.xlu1 %v3670_v2, %s3357_s24  ;;  %v251_v2 = vsel %vm224_vm3, %v249_v34, %v250_v18 }
  0x86   :  { %297 = vst.msk [vmem:[#allocation3 + $0x40] sm:$0xff] %vm53_vm0, %v251_v2  ;;  %vm1418_vm0 = vcmask 523520  }
  0x87   :  { %735 = vrot.lane.b32.xlu0 %v506_v11, %s3357_s24 }
  0x89   :  { %737 = vrot.lane.b32.xlu1 %v719_v28, %s3357_s24  ;;  %v424_v28 = vrot.slane %v176_v25, 1 }
  0x8b   :  { %796 = vrot.lane.b32.xlu0 %v3649_v56, %s3358_s27 }
  0x8d   :  { %798 = vrot.lane.b32.xlu1 %v3651_v58, %s3358_s27 }
  0x8f   :  { %v310_v36 = vpop.permute.xlu1 %309  ;;  %800 = vrot.lane.b32.xlu0 %v157_v60, %s3358_s27 }
  0x90   :  { %356 = vst.msk [vmem:[#allocation3 + $0x10] sm:$0xff] %vm353_vm5, %v310_v36  ;;  %v308_v56 = vpop.permute.xlu0 %307 }
  0x91   :  { %802 = vrot.lane.b32.xlu1 %v160_v42, %s3358_s27  ;;  %355 = vst.msk [vmem:[#allocation3 + $0x8] sm:$0xff] %vm353_vm5, %v308_v56 }
  0x93   :  { %v312_v41 = vpop.permute.xlu1 %311  ;;  %869 = vrot.lane.b32.xlu0 %v3798_v31, %s3359_s12  ;;  %v173_v31 = vld [vmem:[#allocation2 + $0x148] sm:$0x1] }
  0x94   :  { %357 = vst.msk [vmem:[#allocation3 + $0x18] sm:$0xff] %vm353_vm5, %v312_v41  ;;  %v421_v0 = vrot.slane %v173_v31, 1  ;;  %v179_v41 = vld [vmem:[#allocation2 + $0x178] sm:$0x1]  ;;  %v185_v31 = vld [vmem:[#allocation2 + $0x1a8] sm:$0x1] }
  0x95   :  { %871 = vrot.lane.b32.xlu1 %v3804_v57, %s3359_s12  ;;  %v436_v58 = vpop.permute.xlu0 %435  ;;  %v417_v57 = vrot.slane %v3681_v8, 1 }
  0x96   :  { %484 = vst.msk [vmem:[#allocation3] sm:$0xff] %vm483_vm6, %v436_v58  ;;  %v3901_v11 = vsel %vm386_vm2, %v420_v63, %v421_v0 }
  0x97   :  { %v438_v16 = vpop.permute.xlu1 %437  ;;  %873 = vrot.lane.b32.xlu0 %v644_v20, %s3359_s12  ;;  %v3898_v5 = vsel %vm386_vm2, %v417_v57, %v418_v59  ;;  %v432_v59 = vrot.slane %v3821_v9, 1 }
  0x98   :  { %485 = vst.msk [vmem:[#allocation3 + $0x8] sm:$0xff] %vm483_vm6, %v438_v16  ;;  %v427_v16 = vrot.slane %v179_v41, 1 }
  0x99   :  { %875 = vrot.lane.b32.xlu1 %v857_v43, %s3359_s12  ;;  %v440_v44 = vpop.permute.xlu0 %439  ;;  %v426_v43 = vrot.slane %v3740_v35, 1 }
  0x9a   :  { %486 = vst.msk [vmem:[#allocation3 + $0x10] sm:$0xff] %vm483_vm6, %v440_v44 }
  0x9b   :  { %v442_v17 = vpop.permute.xlu1 %441  ;;  %321 = vrot.lane.b32.xlu0 %v163_v32, %s3352_s15  ;;  %v3982_v47 = vsel %vm386_vm2, %v426_v43, %v427_v16 }
  0x9c   :  { %487 = vst.msk [vmem:[#allocation3 + $0x18] sm:$0xff] %vm483_vm6, %v442_v17 }
  0x9d   :  { %323 = vrot.lane.b32.xlu1 %v3679_v7, %s3352_s15  ;;  %v511_v49 = vpop.permute.xlu0 %510 }
  0x9e   :  { %559 = vst.msk [vmem:[#allocation3] sm:$0xff] %vm558_vm7, %v511_v49 }
  0x9f   :  { %v513_v54 = vpop.permute.xlu1 %512  ;;  %325 = vrot.lane.b32.xlu0 %v3681_v8, %s3352_s15 }
  0xa0   :  { %560 = vst.msk [vmem:[#allocation3 + $0x8] sm:$0xff] %vm558_vm7, %v513_v54 }
  0xa1   :  { %327 = vrot.lane.b32.xlu1 %v3692_v22, %s3352_s15  ;;  %v515_v60 = vpop.permute.xlu0 %514 }
  0xa2   :  { %561 = vst.msk [vmem:[#allocation3 + $0x10] sm:$0xff] %vm558_vm7, %v515_v60  ;;  %v433_v60 = vrot.slane %v185_v31, 1 }
  0xa3   :  { %v517_v4 = vpop.permute.xlu1 %516  ;;  %451 = vrot.lane.b32.xlu0 %v413_v55, %s3353_s16  ;;  %v429_v55 = vrot.slane %v3811_v61, 1 }
  0xa4   :  { %562 = vst.msk [vmem:[#allocation3 + $0x18] sm:$0xff] %vm558_vm7, %v517_v4  ;;  %v4014_v4 = vsel %vm386_vm2, %v432_v59, %v433_v60 }
  0xa5   :  { %453 = vrot.lane.b32.xlu1 %v416_v62, %s3353_s16  ;;  %v576_v10 = vpop.permute.xlu0 %575 }
  0xa6   :  { %624 = vst.msk [vmem:[#allocation3] sm:$0xff] %vm623_vm8, %v576_v10  ;;  %v186_v10 = vld [vmem:[#allocation2 + $0x1b0] sm:$0xff] }
  0xa7   :  { %v578_v12 = vpop.permute.xlu1 %577  ;;  %455 = vrot.lane.b32.xlu0 %v3898_v5, %s3353_s16 }
  0xa8   :  { %625 = vst.msk [vmem:[#allocation3 + $0x8] sm:$0xff] %vm623_vm8, %v578_v12 }
  0xa9   :  { %457 = vrot.lane.b32.xlu1 %v3901_v11, %s3353_s16  ;;  %v580_v13 = vpop.permute.xlu0 %579 }
  0xaa   :  { %626 = vst.msk [vmem:[#allocation3 + $0x10] sm:$0xff] %vm623_vm8, %v580_v13  ;;  %v507_v13 = vrot.slane %v186_v10, 7 }
  0xab   :  { %v582_v14 = vpop.permute.xlu1 %581  ;;  %526 = vrot.lane.b32.xlu0 %v3701_v26, %s3354_s19 }
  0xac   :  { %627 = vst.msk [vmem:[#allocation3 + $0x18] sm:$0xff] %vm623_vm8, %v582_v14 }
  0xad   :  { %528 = vrot.lane.b32.xlu1 %v3695_v23, %s3354_s19  ;;  %v649_v15 = vpop.permute.xlu0 %648 }
  0xae   :  { %697 = vst.msk [vmem:[#allocation3] sm:$0xff] %vm696_vm9, %v649_v15 }
  0xaf   :  { %v651_v19 = vpop.permute.xlu1 %650  ;;  %530 = vrot.lane.b32.xlu0 %v3714_v30, %s3354_s19 }
  0xb0   :  { %698 = vst.msk [vmem:[#allocation3 + $0x8] sm:$0xff] %vm696_vm9, %v651_v19 }
  0xb1   :  { %532 = vrot.lane.b32.xlu1 %v3707_v29, %s3354_s19  ;;  %v653_v20 = vpop.permute.xlu0 %652 }
  0xb2   :  { %699 = vst.msk [vmem:[#allocation3 + $0x10] sm:$0xff] %vm696_vm9, %v653_v20 }
  0xb3   :  { %v655_v24 = vpop.permute.xlu1 %654  ;;  %591 = vrot.lane.b32.xlu0 %v3679_v7, %s3355_s20  ;;  %v423_v7 = vrot.slane %v3688_v21, 1 }
  0xb4   :  { %700 = vst.msk [vmem:[#allocation3 + $0x18] sm:$0xff] %vm696_vm9, %v655_v24 }
  0xb5   :  { %593 = vrot.lane.b32.xlu1 %v3681_v8, %s3355_s20  ;;  %v724_v26 = vpop.permute.xlu0 %723  ;;  %v3940_v33 = vsel %vm386_vm2, %v423_v7, %v424_v28 }
  0xb6   :  { %772 = vst.msk [vmem:[#allocation3] sm:$0xff] %vm771_vm10, %v724_v26 }
  0xb7   :  { %v726_v42 = vpop.permute.xlu1 %725  ;;  %595 = vrot.lane.b32.xlu0 %v3692_v22, %s3355_s20 }
  0xb8   :  { %773 = vst.msk [vmem:[#allocation3 + $0x8] sm:$0xff] %vm771_vm10, %v726_v42 }
  0xb9   :  { %597 = vrot.lane.b32.xlu1 %v3688_v21, %s3355_s20  ;;  %v728_v27 = vpop.permute.xlu0 %727 }
  0xba   :  { %774 = vst.msk [vmem:[#allocation3 + $0x10] sm:$0xff] %vm771_vm10, %v728_v27  ;;  %v188_v27 = vld [vmem:[#allocation2 + $0x1c0] sm:$0x1] }
  0xbb   :  { %v730_v32 = vpop.permute.xlu1 %729  ;;  %664 = vrot.lane.b32.xlu0 %v416_v62, %s3356_s21 }
  0xbc   :  { %775 = vst.msk [vmem:[#allocation3 + $0x18] sm:$0xff] %vm771_vm10, %v730_v32 }
  0xbd   :  { %666 = vrot.lane.b32.xlu1 %v3898_v5, %s3356_s21  ;;  %v789_v18 = vpop.permute.xlu0 %788 }
  0xbe   :  { %837 = vst.msk [vmem:[#allocation3] sm:$0xff] %vm836_vm11, %v789_v18 }
  0xbf   :  { %v791_v34 = vpop.permute.xlu1 %790  ;;  %668 = vrot.lane.b32.xlu0 %v3901_v11, %s3356_s21 }
  0xc0   :  { %838 = vst.msk [vmem:[#allocation3 + $0x8] sm:$0xff] %vm836_vm11, %v791_v34 }
  0xc1   :  { %670 = vrot.lane.b32.xlu1 %v3940_v33, %s3356_s21  ;;  %v793_v1 = vpop.permute.xlu0 %792 }
  0xc2   :  { %839 = vst.msk [vmem:[#allocation3 + $0x10] sm:$0xff] %vm836_vm11, %v793_v1  ;;  %v189_v1 = vld [vmem:[#allocation2 + $0x1c8] sm:$0xff] }
  0xc3   :  { %v795_v2 = vpop.permute.xlu1 %794  ;;  %739 = vrot.lane.b32.xlu0 %v3695_v23, %s3357_s24 }
  0xc4   :  { %840 = vst.msk [vmem:[#allocation3 + $0x18] sm:$0xff] %vm836_vm11, %v795_v2  ;;  %v190_v2 = vld [vmem:[#allocation2 + $0x1d0] sm:$0xff] }
  0xc5   :  { %741 = vrot.lane.b32.xlu1 %v3714_v30, %s3357_s24  ;;  %v862_v36 = vpop.permute.xlu0 %861 }
  0xc6   :  { %910 = vst.msk [vmem:[#allocation3] sm:$0xff] %vm909_vm12, %v862_v36 }
  0xc7   :  { %v864_v37 = vpop.permute.xlu1 %863  ;;  %743 = vrot.lane.b32.xlu0 %v3707_v29, %s3357_s24 }
  0xc8   :  { %911 = vst.msk [vmem:[#allocation3 + $0x8] sm:$0xff] %vm909_vm12, %v864_v37  ;;  %v720_v37 = vrot.slane %v189_v1, 7 }
  0xc9   :  { %745 = vrot.lane.b32.xlu1 %v3746_v38, %s3357_s24  ;;  %v866_v56 = vpop.permute.xlu0 %865 }
  0xca   :  { %912 = vst.msk [vmem:[#allocation3 + $0x10] sm:$0xff] %vm909_vm12, %v866_v56  ;;  %v721_v56 = vrot.slane %v190_v2, 7 }
  0xcb   :  { %v868_v39 = vpop.permute.xlu1 %867  ;;  %804 = vrot.lane.b32.xlu0 %v3681_v8, %s3358_s27 }
  0xcc   :  { %913 = vst.msk [vmem:[#allocation3 + $0x18] sm:$0xff] %vm909_vm12, %v868_v39 }
  0xcd   :  { %806 = vrot.lane.b32.xlu1 %v3692_v22, %s3358_s27  ;;  %v314_v23 = vpop.permute.xlu0 %313  ;;  %v926_v30 = vld [vmem:[#allocation3] sm:$0xff] }
  0xce   :  { %358 = vst.msk [vmem:[#allocation3 + $0x20] sm:$0xff] %vm353_vm5, %v314_v23 }
  0xcf   :  { %v316_v40 = vpop.permute.xlu1 %315  ;;  %v927_v29 = vld [vmem:[#allocation3 + $0x8] sm:$0xff]  ;;  %808 = vrot.lane.b32.xlu0 %v3688_v21, %s3358_s27 }
  0xd0   :  { %359 = vst.msk [vmem:[#allocation3 + $0x28] sm:$0xff] %vm353_vm5, %v316_v40  ;;  %v942_v58 = vpack.c.bf16 %v927_v29, %v926_v30  ;;  %v722_v30 = vsel %vm224_vm3, %v720_v37, %v721_v56 }
  0xd1   :  { %810 = vrot.lane.b32.xlu1 %v3740_v35, %s3358_s27  ;;  %v318_v8 = vpop.permute.xlu0 %317  ;;  %v928_v22 = vld [vmem:[#allocation3 + $0x10] sm:$0xff] }
  0xd2   :  { %3135 = vmatprep.mubr.msk.bf16.mxu0 %vm977_vm13, %v942_v58  ;;  %360 = vst.msk [vmem:[#allocation3 + $0x30] sm:$0xff] %vm353_vm5, %v318_v8 }
  0xd3   :  { %v320_v44 = vpop.permute.xlu1 %319  ;;  %v929_v45 = vld [vmem:[#allocation3 + $0x18] sm:$0xff]  ;;  %877 = vrot.lane.b32.xlu0 %v3898_v5, %s3359_s12 }
  0xd4   :  { %361 = vst.msk [vmem:[#allocation3 + $0x38] sm:$0xff] %vm353_vm5, %v320_v44  ;;  %v943_v17 = vpack.c.bf16 %v929_v45, %v928_v22  ;;  %v191_v22 = vld [vmem:[#allocation2 + $0x1d8] sm:$0x1] }
  0xd5   :  { %879 = vrot.lane.b32.xlu1 %v3901_v11, %s3359_s12  ;;  %v444_v46 = vpop.permute.xlu0 %443  ;;  %v4017_v11 = vld [vmem:[#allocation2 + $0x1b8] sm:$0xff]  ;;  %v859_v44 = vrot.slane %v191_v22, 1 }
  0xd6   :  { %3136 = vmatmul.mubr.msk.bf16.vlgmr.msra.gmra.mrb[0].mxu0 %vm977_vm13, %v943_v17  ;;  %488 = vst.msk [vmem:[#allocation3 + $0x20] sm:$0xff] %vm483_vm6, %v444_v46  ;;  %v508_v14 = vrot.slane %v4017_v11, 7  ;;  %v645_v28 = vrot.slane %v4017_v11, 1 }
  0xd7   :  { %v446_v48 = vpop.permute.xlu1 %445  ;;  %881 = vrot.lane.b32.xlu0 %v3940_v33, %s3359_s12 }
  0xd8   :  { %489 = vst.msk [vmem:[#allocation3 + $0x28] sm:$0xff] %vm483_vm6, %v446_v48  ;;  %v509_v20 = vsel %vm224_vm3, %v507_v13, %v508_v14 }
  0xd9   :  { %883 = vrot.lane.b32.xlu1 %v3982_v47, %s3359_s12  ;;  %v448_v49 = vpop.permute.xlu0 %447 }
  0xda   :  { %490 = vst.msk [vmem:[#allocation3 + $0x30] sm:$0xff] %vm483_vm6, %v448_v49 }
  0xdb   :  { %v450_v50 = vpop.permute.xlu1 %449  ;;  %329 = vrot.lane.b32.xlu0 %v3688_v21, %s3352_s15  ;;  %v430_v21 = vrot.slane %v182_v52, 1 }
  0xdc   :  { %491 = vst.msk [vmem:[#allocation3 + $0x38] sm:$0xff] %vm483_vm6, %v450_v50 }
  0xdd   :  { %331 = vrot.lane.b32.xlu1 %v3740_v35, %s3352_s15  ;;  %v519_v51 = vpop.permute.xlu0 %518  ;;  %v4011_v63 = vsel %vm386_vm2, %v429_v55, %v430_v21 }
  0xde   :  { %563 = vst.msk [vmem:[#allocation3 + $0x20] sm:$0xff] %vm558_vm7, %v519_v51 }
  0xdf   :  { %v521_v54 = vpop.permute.xlu1 %520  ;;  %333 = vrot.lane.b32.xlu0 %v3811_v61, %s3352_s15 }
  0xe0   :  { %564 = vst.msk [vmem:[#allocation3 + $0x28] sm:$0xff] %vm558_vm7, %v521_v54  ;;  %v4183_v54 = vld [vmem:[#allocation4 + $0x8] sm:$0xff] }
  0xe1   :  { %335 = vrot.lane.b32.xlu1 %v3821_v9, %s3352_s15  ;;  %v523_v57 = vpop.permute.xlu0 %522  ;;  %v1451_v60 = vrot.slane %v4183_v54, 1  ;;  %s3361_s15 = smov 96  }
  0xe2   :  { %565 = vst.msk [vmem:[#allocation3 + $0x30] sm:$0xff] %vm558_vm7, %v523_v57 }
  0xe3   :  { %v525_v62 = vpop.permute.xlu1 %524  ;;  %459 = vrot.lane.b32.xlu0 %v3940_v33, %s3353_s16 }
  0xe4   :  { %566 = vst.msk [vmem:[#allocation3 + $0x38] sm:$0xff] %vm558_vm7, %v525_v62  ;;  %v1200_v62 = vld [vmem:[#allocation4 + $0x10] sm:$0x1] }
  0xe5   :  { %461 = vrot.lane.b32.xlu1 %v3982_v47, %s3353_s16  ;;  %v584_v0 = vpop.permute.xlu0 %583 }
  0xe6   :  { %628 = vst.msk [vmem:[#allocation3 + $0x20] sm:$0xff] %vm623_vm8, %v584_v0 }
  0xe7   :  { %v586_v5 = vpop.permute.xlu1 %585  ;;  %463 = vrot.lane.b32.xlu0 %v4011_v63, %s3353_s16 }
  0xe8   :  { %629 = vst.msk [vmem:[#allocation3 + $0x28] sm:$0xff] %vm623_vm8, %v586_v5  ;;  %v1226_v5 = vld [vmem:[#allocation4 + $0xe0] sm:$0xff] }
  0xe9   :  { %465 = vrot.lane.b32.xlu1 %v4014_v4, %s3353_s16  ;;  %v588_v12 = vpop.permute.xlu0 %587  ;;  %v1732_v13 = vrot.slane %v1226_v5, 7 }
  0xea   :  { %630 = vst.msk [vmem:[#allocation3 + $0x30] sm:$0xff] %vm623_vm8, %v588_v12 }
  0xeb   :  { %v590_v15 = vpop.permute.xlu1 %589  ;;  %534 = vrot.lane.b32.xlu0 %v3746_v38, %s3354_s19 }
  0xec   :  { %631 = vst.msk [vmem:[#allocation3 + $0x38] sm:$0xff] %vm623_vm8, %v590_v15 }
  0xed   :  { %536 = vrot.lane.b32.xlu1 %v3817_v6, %s3354_s19  ;;  %v657_v19 = vpop.permute.xlu0 %656 }
  0xee   :  { %701 = vst.msk [vmem:[#allocation3 + $0x20] sm:$0xff] %vm696_vm9, %v657_v19 }
  0xef   :  { %v659_v24 = vpop.permute.xlu1 %658  ;;  %538 = vrot.lane.b32.xlu0 %v3830_v53, %s3354_s19 }
  0xf0   :  { %702 = vst.msk [vmem:[#allocation3 + $0x28] sm:$0xff] %vm696_vm9, %v659_v24  ;;  %v1230_v24 = vld [vmem:[#allocation4 + $0x100] sm:$0x1] }
  0xf1   :  { %540 = vrot.lane.b32.xlu1 %v509_v20, %s3354_s19  ;;  %v661_v26 = vpop.permute.xlu0 %660 }
  0xf2   :  { %703 = vst.msk [vmem:[#allocation3 + $0x30] sm:$0xff] %vm696_vm9, %v661_v26  ;;  %v1227_v26 = vld [vmem:[#allocation4 + $0xe8] sm:$0x1] }
  0xf3   :  { %v663_v42 = vpop.permute.xlu1 %662  ;;  %599 = vrot.lane.b32.xlu0 %v3740_v35, %s3355_s20  ;;  %v646_v35 = vrot.slane %v188_v27, 1  ;;  %v1868_v27 = vrot.slane %v1227_v26, 1 }
  0xf4   :  { %704 = vst.msk [vmem:[#allocation3 + $0x38] sm:$0xff] %vm696_vm9, %v663_v42  ;;  %v1867_v42 = vrot.slane %v1226_v5, 1 }
  0xf5   :  { %601 = vrot.lane.b32.xlu1 %v3811_v61, %s3355_s20  ;;  %v732_v38 = vpop.permute.xlu0 %731  ;;  %v4057_v33 = vsel %vm386_vm2, %v645_v28, %v646_v35 }
  0xf6   :  { %776 = vst.msk [vmem:[#allocation3 + $0x20] sm:$0xff] %vm771_vm10, %v732_v38  ;;  %v1869_v35 = vsel %vm386_vm2, %v1867_v42, %v1868_v27  ;;  %v1291_v27 = vrot.slane %v4183_v54, 7 }
  0xf7   :  { %v734_v25 = vpop.permute.xlu1 %733  ;;  %603 = vrot.lane.b32.xlu0 %v3821_v9, %s3355_s20  ;;  %1896 = vst.msk [vmem:[#allocation5 + $0xb8] sm:$0xff] %vm1119_vm14, %v1869_v35 }
  0xf8   :  { %777 = vst.msk [vmem:[#allocation3 + $0x28] sm:$0xff] %vm771_vm10, %v734_v25 }
  0xf9   :  { %605 = vrot.lane.b32.xlu1 %v4017_v11, %s3355_s20  ;;  %v736_v7 = vpop.permute.xlu0 %735 }
  0xfa   :  { %778 = vst.msk [vmem:[#allocation3 + $0x30] sm:$0xff] %vm771_vm10, %v736_v7  ;;  %v1476_v7 = vrot.slane %v1230_v24, 1 }
  0xfb   :  { %v738_v32 = vpop.permute.xlu1 %737  ;;  %672 = vrot.lane.b32.xlu0 %v3982_v47, %s3356_s21 }
  0xfc   :  { %779 = vst.msk [vmem:[#allocation3 + $0x38] sm:$0xff] %vm771_vm10, %v738_v32 }
  0xfd   :  { %674 = vrot.lane.b32.xlu1 %v4011_v63, %s3356_s21  ;;  %v797_v18 = vpop.permute.xlu0 %796 }
  0xfe   :  { %841 = vst.msk [vmem:[#allocation3 + $0x20] sm:$0xff] %vm836_vm11, %v797_v18 }
  0xff   :  { %v799_v34 = vpop.permute.xlu1 %798  ;;  %676 = vrot.lane.b32.xlu0 %v4014_v4, %s3356_s21 }
 0x100   :  { %842 = vst.msk [vmem:[#allocation3 + $0x28] sm:$0xff] %vm836_vm11, %v799_v34 }
 0x101   :  { %678 = vrot.lane.b32.xlu1 %v4057_v33, %s3356_s21  ;;  %v801_v36 = vpop.permute.xlu0 %800 }
 0x102   :  { %843 = vst.msk [vmem:[#allocation3 + $0x30] sm:$0xff] %vm836_vm11, %v801_v36 }
 0x103   :  { %v803_v39 = vpop.permute.xlu1 %802  ;;  %747 = vrot.lane.b32.xlu0 %v3817_v6, %s3357_s24 }
 0x104   :  { %844 = vst.msk [vmem:[#allocation3 + $0x38] sm:$0xff] %vm836_vm11, %v803_v39 }
 0x105   :  { %749 = vrot.lane.b32.xlu1 %v3830_v53, %s3357_s24  ;;  %v870_v23 = vpop.permute.xlu0 %869 }
 0x106   :  { %914 = vst.msk [vmem:[#allocation3 + $0x20] sm:$0xff] %vm909_vm12, %v870_v23 }
 0x107   :  { %v872_v40 = vpop.permute.xlu1 %871  ;;  %751 = vrot.lane.b32.xlu0 %v509_v20, %s3357_s24  ;;  %v4241_v20 = vld [vmem:[#allocation4 + $0xf8] sm:$0xff] }
 0x108   :  { %915 = vst.msk [vmem:[#allocation3 + $0x28] sm:$0xff] %vm909_vm12, %v872_v40  ;;  %v1475_v38 = vrot.slane %v4241_v20, 1 }
 0x109   :  { %753 = vrot.lane.b32.xlu1 %v722_v30, %s3357_s24  ;;  %v874_v29 = vpop.permute.xlu0 %873 }
 0x10a   :  { %916 = vst.msk [vmem:[#allocation3 + $0x30] sm:$0xff] %vm909_vm12, %v874_v29  ;;  %v1477_v32 = vsel %vm386_vm2, %v1475_v38, %v1476_v7  ;;  %v1198_v7 = vld [vmem:[#allocation4] sm:$0xff] }
 0x10b   :  { %v876_v41 = vpop.permute.xlu1 %875  ;;  %812 = vrot.lane.b32.xlu0 %v3811_v61, %s3358_s27  ;;  %v1290_v35 = vrot.slane %v1198_v7, 7  ;;  %v3301_v7 = vld [vmem:[%s5116_s3 + $0x50] sm:$0xff]  }
 0x10c   :  { %917 = vst.msk [vmem:[#allocation3 + $0x38] sm:$0xff] %vm909_vm12, %v876_v41 }
 0x10d   :  { %814 = vrot.lane.b32.xlu1 %v3821_v9, %s3358_s27  ;;  %v322_v6 = vpop.permute.xlu0 %321  ;;  %v930_v53 = vld [vmem:[#allocation3 + $0x20] sm:$0xff]  ;;  %v858_v9 = vrot.slane %v190_v2, 1 }
 0x10e   :  { %362 = vst.msk [vmem:[#allocation3 + $0x40] sm:$0xff] %vm353_vm5, %v322_v6 }
 0x10f   :  { %v324_v58 = vpop.permute.xlu1 %323  ;;  %v931_v8 = vld [vmem:[#allocation3 + $0x28] sm:$0xff]  ;;  %816 = vrot.lane.b32.xlu0 %v4017_v11, %s3358_s27  ;;  %v860_v48 = vsel %vm386_vm2, %v858_v9, %v859_v44 }
 0x110   :  { %363 = vst.msk [vmem:[#allocation3 + $0x48] sm:$0xff] %vm353_vm5, %v324_v58  ;;  %v944_v43 = vpack.c.bf16 %v931_v8, %v930_v53 }
 0x111   :  { %818 = vrot.lane.b32.xlu1 %v190_v2, %s3358_s27  ;;  %v326_v61 = vpop.permute.xlu0 %325  ;;  %v932_v16 = vld [vmem:[#allocation3 + $0x30] sm:$0xff] }
 0x112   :  { %3139 = vmatprep.mubr.msk.bf16.mxu0 %vm977_vm13, %v944_v43  ;;  %364 = vst.msk [vmem:[#allocation3 + $0x50] sm:$0xff] %vm353_vm5, %v326_v61 }
 0x113   :  { %v328_v45 = vpop.permute.xlu1 %327  ;;  %v933_v17 = vld [vmem:[#allocation3 + $0x38] sm:$0xff]  ;;  %885 = vrot.lane.b32.xlu0 %v4011_v63, %s3359_s12  ;;  %v1452_v63 = vrot.slane %v1200_v62, 1 }
 0x114   :  { %365 = vst.msk [vmem:[#allocation3 + $0x58] sm:$0xff] %vm353_vm5, %v328_v45  ;;  %v945_v46 = vpack.c.bf16 %v933_v17, %v932_v16 }
 0x115   :  { %887 = vrot.lane.b32.xlu1 %v4014_v4, %s3359_s12  ;;  %v452_v47 = vpop.permute.xlu0 %451  ;;  %v1225_v4 = vld [vmem:[#allocation4 + $0xd8] sm:$0xff]  ;;  %v1453_v11 = vsel %vm386_vm2, %v1451_v60, %v1452_v63 }
 0x116   :  { %3140 = vmatmul.mubr.msk.bf16.gmra.mrb[4].mxu0 %vm977_vm13, %v945_v46  ;;  %492 = vst.msk [vmem:[#allocation3 + $0x40] sm:$0xff] %vm483_vm6, %v452_v47  ;;  %v1731_v12 = vrot.slane %v1225_v4, 7 }
 0x117   :  { %v454_v49 = vpop.permute.xlu1 %453  ;;  %889 = vrot.lane.b32.xlu0 %v4057_v33, %s3359_s12 }
 0x118   :  { %493 = vst.msk [vmem:[#allocation3 + $0x48] sm:$0xff] %vm483_vm6, %v454_v49  ;;  %v1733_v14 = vsel %vm224_vm3, %v1731_v12, %v1732_v13 }
 0x119   :  { %891 = vrot.lane.b32.xlu1 %v860_v48, %s3359_s12  ;;  %v456_v50 = vpop.permute.xlu0 %455 }
 0x11a   :  { %494 = vst.msk [vmem:[#allocation3 + $0x50] sm:$0xff] %vm483_vm6, %v456_v50 }
 0x11b   :  { %v458_v51 = vpop.permute.xlu1 %457  ;;  %1370 = vrot.lane.b32.xlu0 %v4183_v54, %s3359_s12 }
 0x11c   :  { %495 = vst.msk [vmem:[#allocation3 + $0x58] sm:$0xff] %vm483_vm6, %v458_v51 }
 0x11d   :  { %v527_v52 = vpop.permute.xlu0 %526  ;;  %1751 = vrot.lane.b32.xlu1 %v1733_v14, %s3360_s0 }
 0x11e   :  { %567 = vst.msk [vmem:[#allocation3 + $0x40] sm:$0xff] %vm558_vm7, %v527_v52 }
 0x11f   :  { %v529_v31 = vpop.permute.xlu1 %528  ;;  %1499 = vrot.lane.b32.xlu0 %v1453_v11, %s3360_s0 }
 0x120   :  { %568 = vst.msk [vmem:[#allocation3 + $0x48] sm:$0xff] %vm558_vm7, %v529_v31 }
 0x121   :  { %v531_v55 = vpop.permute.xlu0 %530  ;;  %1815 = vrot.lane.b32.xlu1 %v1226_v5, %s3361_s15 }
 0x122   :  { %569 = vst.msk [vmem:[#allocation3 + $0x50] sm:$0xff] %vm558_vm7, %v531_v55 }
 0x123   :  { %v533_v21 = vpop.permute.xlu1 %532  ;;  %1386 = vrot.lane.b32.xlu0 %v4241_v20, %s3359_s12 }
 0x124   :  { %570 = vst.msk [vmem:[#allocation3 + $0x58] sm:$0xff] %vm558_vm7, %v533_v21 }
 0x125   :  { %v592_v57 = vpop.permute.xlu0 %591 }
 0x126   :  { %632 = vst.msk [vmem:[#allocation3 + $0x40] sm:$0xff] %vm623_vm8, %v592_v57 }
 0x127   :  { %v594_v59 = vpop.permute.xlu1 %593  ;;  %1515 = vrot.lane.b32.xlu0 %v1477_v32, %s3360_s0  ;;  %v1292_v32 = vsel %vm224_vm3, %v1290_v35, %v1291_v27 }
 0x128   :  { %633 = vst.msk [vmem:[#allocation3 + $0x48] sm:$0xff] %vm623_vm8, %v594_v59 }
 0x129   :  { %v596_v0 = vpop.permute.xlu0 %595  ;;  %1354 = vst.msk [vmem:[#allocation5] sm:$0xff] %vm1119_vm14, %v1292_v32  ;;  %v3303_v32 = vld [vmem:[%s5116_s3 + $0x58] sm:$0xff]  }
 0x12a   :  { %634 = vst.msk [vmem:[#allocation3 + $0x50] sm:$0xff] %vm623_vm8, %v596_v0 }
 0x12b   :  { %v598_v10 = vpop.permute.xlu1 %597 }
 0x12c   :  { %635 = vst.msk [vmem:[#allocation3 + $0x58] sm:$0xff] %vm623_vm8, %v598_v10 }
 0x12d   :  { %v665_v15 = vpop.permute.xlu0 %664 }
 0x12e   :  { %705 = vst.msk [vmem:[#allocation3 + $0x40] sm:$0xff] %vm696_vm9, %v665_v15 }
 0x12f   :  { %v667_v19 = vpop.permute.xlu1 %666 }
 0x130   :  { %706 = vst.msk [vmem:[#allocation3 + $0x48] sm:$0xff] %vm696_vm9, %v667_v19 }
 0x131   :  { %v669_v25 = vpop.permute.xlu0 %668 }
 0x132   :  { %707 = vst.msk [vmem:[#allocation3 + $0x50] sm:$0xff] %vm696_vm9, %v669_v25 }
 0x133   :  { %v671_v28 = vpop.permute.xlu1 %670 }
 0x134   :  { %708 = vst.msk [vmem:[#allocation3 + $0x58] sm:$0xff] %vm696_vm9, %v671_v28 }
 0x135   :  { %v740_v18 = vpop.permute.xlu0 %739 }
 0x136   :  { %780 = vst.msk [vmem:[#allocation3 + $0x40] sm:$0xff] %vm771_vm10, %v740_v18  ;;  %v1315_v18 = vrot.slane %v4241_v20, 7 }
 0x137   :  { %v742_v33 = vpop.permute.xlu1 %741 }
 0x138   :  { %781 = vst.msk [vmem:[#allocation3 + $0x48] sm:$0xff] %vm771_vm10, %v742_v33 }
 0x139   :  { %v744_v34 = vpop.permute.xlu0 %743 }
 0x13a   :  { %782 = vst.msk [vmem:[#allocation3 + $0x50] sm:$0xff] %vm771_vm10, %v744_v34  ;;  %v1228_v34 = vld [vmem:[#allocation4 + $0xf0] sm:$0xff] }
 0x13b   :  { %v746_v1 = vpop.permute.xlu1 %745 }
 0x13c   :  { %783 = vst.msk [vmem:[#allocation3 + $0x58] sm:$0xff] %vm771_vm10, %v746_v1  ;;  %v1314_v1 = vrot.slane %v1228_v34, 7  ;;  %v3306_v34 = vld [vmem:[%s5116_s3 + $0x20] sm:$0xff]  }
 0x13d   :  { %v805_v2 = vpop.permute.xlu0 %804 }
 0x13e   :  { %845 = vst.msk [vmem:[#allocation3 + $0x40] sm:$0xff] %vm836_vm11, %v805_v2  ;;  %v1316_v54 = vsel %vm224_vm3, %v1314_v1, %v1315_v18  ;;  %v3304_v18 = vld [vmem:[%s5116_s3 + $0x18] sm:$0xff]   ;;  %v3307_v1 = vld [vmem:[%s5116_s3 + $0x68] sm:$0xff]  }
 0x13f   :  { %v807_v36 = vpop.permute.xlu1 %806  ;;  %1362 = vst.msk [vmem:[#allocation5 + $0xc0] sm:$0xff] %vm1119_vm14, %v1316_v54  ;;  %v3308_v54 = vld [vmem:[%s5116_s3 + $0x28] sm:$0xff]  }
 0x140   :  { %846 = vst.msk [vmem:[#allocation3 + $0x48] sm:$0xff] %vm836_vm11, %v807_v36  ;;  %v4314_v36 = vld [vmem:[%s5115_s2] ss:$0 sm:$0xff] }
 0x141   :  { %v809_v37 = vpop.permute.xlu0 %808 }
 0x142   :  { %847 = vst.msk [vmem:[#allocation3 + $0x50] sm:$0xff] %vm836_vm11, %v809_v37 }
 0x143   :  { %v811_v56 = vpop.permute.xlu1 %810 }
 0x144   :  { %848 = vst.msk [vmem:[#allocation3 + $0x58] sm:$0xff] %vm836_vm11, %v811_v56 }
 0x145   :  { %v878_v39 = vpop.permute.xlu0 %877 }
 0x146   :  { %918 = vst.msk [vmem:[#allocation3 + $0x40] sm:$0xff] %vm909_vm12, %v878_v39 }
 0x147   :  { %v880_v23 = vpop.permute.xlu1 %879 }
 0x148   :  { %919 = vst.msk [vmem:[#allocation3 + $0x48] sm:$0xff] %vm909_vm12, %v880_v23 }
 0x149   :  { %v882_v30 = vpop.permute.xlu0 %881 }
 0x14a   :  { %920 = vst.msk [vmem:[#allocation3 + $0x50] sm:$0xff] %vm909_vm12, %v882_v30 }
 0x14b   :  { %v884_v40 = vpop.permute.xlu1 %883 }
 0x14c   :  { %921 = vst.msk [vmem:[#allocation3 + $0x58] sm:$0xff] %vm909_vm12, %v884_v40 }
 0x14d   :  { %v330_v29 = vpop.permute.xlu0 %329  ;;  %v934_v41 = vld [vmem:[#allocation3 + $0x40] sm:$0xff] }
 0x14e   :  { %366 = vst.msk [vmem:[#allocation3 + $0x60] sm:$0xff] %vm353_vm5, %v330_v29 }
 0x14f   :  { %v332_v6 = vpop.permute.xlu1 %331  ;;  %v935_v53 = vld [vmem:[#allocation3 + $0x48] sm:$0xff] }
 0x150   :  { %367 = vst.msk [vmem:[#allocation3 + $0x68] sm:$0xff] %vm353_vm5, %v332_v6  ;;  %v946_v58 = vpack.c.bf16 %v935_v53, %v934_v41 }
 0x151   :  { %v334_v8 = vpop.permute.xlu0 %333  ;;  %v936_v22 = vld [vmem:[#allocation3 + $0x50] sm:$0xff] }
 0x152   :  { %3143 = vmatprep.mubr.msk.bf16.mxu0 %vm977_vm13, %v946_v58  ;;  %368 = vst.msk [vmem:[#allocation3 + $0x70] sm:$0xff] %vm353_vm5, %v334_v8 }
 0x153   :  { %v336_v43 = vpop.permute.xlu1 %335  ;;  %v937_v61 = vld [vmem:[#allocation3 + $0x58] sm:$0xff] }
 0x154   :  { %369 = vst.msk [vmem:[#allocation3 + $0x78] sm:$0xff] %vm353_vm5, %v336_v43  ;;  %v947_v16 = vpack.c.bf16 %v937_v61, %v936_v22  ;;  %v1207_v22 = vld [vmem:[#allocation4 + $0x48] sm:$0xff]  ;;  %v1209_v43 = vld [vmem:[#allocation4 + $0x58] sm:$0x1]  ;;  %vm2875_vm5 = vcmask 25600  }
 0x155   :  { %v460_v9 = vpop.permute.xlu0 %459  ;;  %v1201_v61 = vld [vmem:[#allocation4 + $0x18] sm:$0xff] }
 0x156   :  { %3144 = vmatmul.mubr.msk.bf16.gmra.mrb[8].mxu0 %vm977_vm13, %v947_v16  ;;  %496 = vst.msk [vmem:[#allocation3 + $0x60] sm:$0xff] %vm483_vm6, %v460_v9  ;;  %v1212_v16 = vld [vmem:[#allocation4 + $0x70] sm:$0x1]  ;;  %v1210_v9 = vld [vmem:[#allocation4 + $0x60] sm:$0xff] }
 0x157   :  { %v462_v44 = vpop.permute.xlu1 %461 }
 0x158   :  { %497 = vst.msk [vmem:[#allocation3 + $0x68] sm:$0xff] %vm483_vm6, %v462_v44  ;;  %v1299_v44 = vrot.slane %v1207_v22, 7 }
 0x159   :  { %v464_v45 = vpop.permute.xlu0 %463 }
 0x15a   :  { %498 = vst.msk [vmem:[#allocation3 + $0x70] sm:$0xff] %vm483_vm6, %v464_v45  ;;  %v1461_v45 = vrot.slane %v1209_v43, 1 }
 0x15b   :  { %v466_v17 = vpop.permute.xlu1 %465 }
 0x15c   :  { %499 = vst.msk [vmem:[#allocation3 + $0x78] sm:$0xff] %vm483_vm6, %v466_v17  ;;  %v1206_v17 = vld [vmem:[#allocation4 + $0x40] sm:$0x1] }
 0x15d   :  { %v535_v46 = vpop.permute.xlu0 %534 }
 0x15e   :  { %571 = vst.msk [vmem:[#allocation3 + $0x60] sm:$0xff] %vm558_vm7, %v535_v46  ;;  %v1204_v46 = vld [vmem:[#allocation4 + $0x30] sm:$0xff] }
 0x15f   :  { %v537_v47 = vpop.permute.xlu1 %536 }
 0x160   :  { %572 = vst.msk [vmem:[#allocation3 + $0x68] sm:$0xff] %vm558_vm7, %v537_v47 }
 0x161   :  { %v539_v48 = vpop.permute.xlu0 %538 }
 0x162   :  { %573 = vst.msk [vmem:[#allocation3 + $0x70] sm:$0xff] %vm558_vm7, %v539_v48  ;;  %v1293_v48 = vrot.slane %v1201_v61, 7 }
 0x163   :  { %v541_v49 = vpop.permute.xlu1 %540 }
 0x164   :  { %574 = vst.msk [vmem:[#allocation3 + $0x78] sm:$0xff] %vm558_vm7, %v541_v49 }
 0x165   :  { %v600_v50 = vpop.permute.xlu0 %599 }
 0x166   :  { %636 = vst.msk [vmem:[#allocation3 + $0x60] sm:$0xff] %vm623_vm8, %v600_v50 }
 0x167   :  { %v602_v51 = vpop.permute.xlu1 %601 }
 0x168   :  { %637 = vst.msk [vmem:[#allocation3 + $0x68] sm:$0xff] %vm623_vm8, %v602_v51 }
 0x169   :  { %v604_v52 = vpop.permute.xlu0 %603 }
 0x16a   :  { %638 = vst.msk [vmem:[#allocation3 + $0x70] sm:$0xff] %vm623_vm8, %v604_v52  ;;  %v1464_v52 = vrot.slane %v1212_v16, 1  ;;  %v1221_v16 = vld [vmem:[#allocation4 + $0xb8] sm:$0x1] }
 0x16b   :  { %v606_v31 = vpop.permute.xlu1 %605 }
 0x16c   :  { %639 = vst.msk [vmem:[#allocation3 + $0x78] sm:$0xff] %vm623_vm8, %v606_v31  ;;  %v1302_v31 = vrot.slane %v1210_v9, 7  ;;  %v1219_v9 = vld [vmem:[#allocation4 + $0xa8] sm:$0xff] }
 0x16d   :  { %v673_v55 = vpop.permute.xlu0 %672 }
 0x16e   :  { %709 = vst.msk [vmem:[#allocation3 + $0x60] sm:$0xff] %vm696_vm9, %v673_v55 }
 0x16f   :  { %v675_v21 = vpop.permute.xlu1 %674 }
 0x170   :  { %710 = vst.msk [vmem:[#allocation3 + $0x68] sm:$0xff] %vm696_vm9, %v675_v21 }
 0x171   :  { %v677_v57 = vpop.permute.xlu0 %676 }
 0x172   :  { %711 = vst.msk [vmem:[#allocation3 + $0x70] sm:$0xff] %vm696_vm9, %v677_v57  ;;  %v1458_v57 = vrot.slane %v1206_v17, 1  ;;  %v1224_v17 = vld [vmem:[#allocation4 + $0xd0] sm:$0x1] }
 0x173   :  { %v679_v59 = vpop.permute.xlu1 %678 }
 0x174   :  { %712 = vst.msk [vmem:[#allocation3 + $0x78] sm:$0xff] %vm696_vm9, %v679_v59  ;;  %v1296_v59 = vrot.slane %v1204_v46, 7  ;;  %v1473_v46 = vrot.slane %v1221_v16, 1  ;;  %v1237_v16 = vld [vmem:[#allocation4 + $0x138] sm:$0xff] }
 0x175   :  { %v748_v60 = vpop.permute.xlu0 %747 }
 0x176   :  { %784 = vst.msk [vmem:[#allocation3 + $0x60] sm:$0xff] %vm771_vm10, %v748_v60 }
 0x177   :  { %v750_v62 = vpop.permute.xlu1 %749 }
 0x178   :  { %785 = vst.msk [vmem:[#allocation3 + $0x68] sm:$0xff] %vm771_vm10, %v750_v62 }
 0x179   :  { %v752_v63 = vpop.permute.xlu0 %751 }
 0x17a   :  { %786 = vst.msk [vmem:[#allocation3 + $0x70] sm:$0xff] %vm771_vm10, %v752_v63 }
 0x17b   :  { %v754_v0 = vpop.permute.xlu1 %753 }
 0x17c   :  { %787 = vst.msk [vmem:[#allocation3 + $0x78] sm:$0xff] %vm771_vm10, %v754_v0 }
 0x17d   :  { %v813_v4 = vpop.permute.xlu0 %812 }
 0x17e   :  { %849 = vst.msk [vmem:[#allocation3 + $0x60] sm:$0xff] %vm836_vm11, %v813_v4 }
 0x17f   :  { %v815_v5 = vpop.permute.xlu1 %814 }
 0x180   :  { %850 = vst.msk [vmem:[#allocation3 + $0x68] sm:$0xff] %vm836_vm11, %v815_v5 }
 0x181   :  { %v817_v10 = vpop.permute.xlu0 %816 }
 0x182   :  { %851 = vst.msk [vmem:[#allocation3 + $0x70] sm:$0xff] %vm836_vm11, %v817_v10 }
 0x183   :  { %v819_v11 = vpop.permute.xlu1 %818 }
 0x184   :  { %852 = vst.msk [vmem:[#allocation3 + $0x78] sm:$0xff] %vm836_vm11, %v819_v11 }
 0x185   :  { %v886_v12 = vpop.permute.xlu0 %885 }
 0x186   :  { %922 = vst.msk [vmem:[#allocation3 + $0x60] sm:$0xff] %vm909_vm12, %v886_v12 }
 0x187   :  { %v888_v13 = vpop.permute.xlu1 %887 }
 0x188   :  { %923 = vst.msk [vmem:[#allocation3 + $0x68] sm:$0xff] %vm909_vm12, %v888_v13 }
 0x189   :  { %v890_v14 = vpop.permute.xlu0 %889 }
 0x18a   :  { %924 = vst.msk [vmem:[#allocation3 + $0x70] sm:$0xff] %vm909_vm12, %v890_v14 }
 0x18b   :  { %v892_v15 = vpop.permute.xlu1 %891 }
 0x18c   :  { %925 = vst.msk [vmem:[#allocation3 + $0x78] sm:$0xff] %vm909_vm12, %v892_v15 }
 0x18d   :  { %v938_v19 = vld [vmem:[#allocation3 + $0x60] sm:$0xff]  ;;  %v1371_v28 = vpop.permute.xlu0 %1370 }
 0x18e   :  { %1419 = vst.msk [vmem:[#allocation5] sm:$0xff] %vm1418_vm0, %v1371_v28  ;;  %v3302_v28 = vld [vmem:[%s5116_s3 + $0x10] sm:$0xff]  }
 0x18f   :  { %v939_v24 = vld [vmem:[#allocation3 + $0x68] sm:$0xff] }
 0x190   :  { %v948_v26 = vpack.c.bf16 %v939_v24, %v938_v19  ;;  %v3297_v19 = vld [vmem:[%s5116_s3 + $0x40] sm:$0xff]  }
 0x191   :  { %v940_v42 = vld [vmem:[#allocation3 + $0x70] sm:$0xff]  ;;  %v1500_v33 = vpop.permute.xlu0 %1499  ;;  %v3298_v24 = vld [vmem:[%s5116_s3] sm:$0xff]   ;;  %2958 = vmatprep.subr.bf16.mxu0 %v3297_v19  ;;  %3262 = vmatprep.subr.bf16.mxu1 %v3297_v19 }
 0x192   :  { %3147 = vmatprep.mubr.msk.bf16.mxu0 %vm977_vm13, %v948_v26  ;;  %1548 = vst.msk [vmem:[#allocation5] sm:$0xff] %vm1547_vm1, %v1500_v33  ;;  %2959 = vmatpush3.bf16.msra.mxu0 %v3298_v24  ;;  %v3299_v26 = vld [vmem:[%s5116_s3 + $0x48] sm:$0xff]   ;;  %v3305_v33 = vld [vmem:[%s5116_s3 + $0x60] sm:$0xff]   ;;  %v4460_v19 = vld [vmem:[#allocation4 + $0x1d0] sm:$0xff] }
 0x193   :  { %v941_v38 = vld [vmem:[#allocation3 + $0x78] sm:$0xff]  ;;  %3270 = vmatpush3.bf16.msra.mxu1 %v3298_v24  ;;  %2960 = vmatprep.subr.bf16.mxu0 %v3299_v26 }
 0x194   :  { %v949_v25 = vpack.c.bf16 %v941_v38, %v940_v42  ;;  %v1203_v42 = vld [vmem:[#allocation4 + $0x28] sm:$0x1]  ;;  %3263 = vmatprep.subr.bf16.mxu1 %v3299_v26  ;;  %v1257_v24 = vld [vmem:[#allocation4 + $0x1d8] sm:$0x1] }
 0x195   :  { %v1387_v2 = vpop.permute.xlu0 %1386  ;;  %v3300_v38 = vld [vmem:[%s5116_s3 + $0x8] sm:$0xff]   ;;  %v1455_v27 = vrot.slane %v1203_v42, 1 }
 0x196   :  { %3148 = vmatmul.mubr.msk.bf16.gmra.mrb[12].mxu0 %vm977_vm13, %v949_v25  ;;  %1427 = vst.msk [vmem:[#allocation5 + $0xc0] sm:$0xff] %vm1418_vm0, %v1387_v2  ;;  %v3309_v2 = vld [vmem:[%s5116_s3 + $0x70] sm:$0xff]  }
 0x197   :  { %2961 = vmatpush3.bf16.msra.mxu0 %v3300_v38  ;;  %3271 = vmatpush3.bf16.msra.mxu1 %v3300_v38 }
 0x198   :  { %2962 = vmatprep.subr.bf16.mxu0 %v3301_v7  ;;  %3264 = vmatprep.subr.bf16.mxu1 %v3301_v7 }
 0x199   :  { %v1516_v20 = vpop.permute.xlu0 %1515 }
 0x19a   :  { %1556 = vst.msk [vmem:[#allocation5 + $0xc0] sm:$0xff] %vm1547_vm1, %v1516_v20  ;;  %v3310_v20 = vld [vmem:[%s5116_s3 + $0x30] sm:$0xff]  }
 0x19b   :  { %2963 = vmatpush3.bf16.msra.mxu0 %v3302_v28  ;;  %3272 = vmatpush3.bf16.msra.mxu1 %v3302_v28  ;;  %v1222_v28 = vld [vmem:[#allocation4 + $0xc0] sm:$0xff] }
 0x19c   :  { %2964 = vmatprep.subr.bf16.mxu0 %v3303_v32  ;;  %3265 = vmatprep.subr.bf16.mxu1 %v3303_v32  ;;  %v1568_v32 = vrot.slane %v1222_v28, 7 }
 0x19f   :  { %2965 = vmatpush3.bf16.msra.mxu0 %v3304_v18  ;;  %3273 = vmatpush3.bf16.msra.mxu1 %v3304_v18 }
 0x1a0   :  { %2966 = vmatprep.subr.bf16.mxu0 %v3305_v33  ;;  %3266 = vmatprep.subr.bf16.mxu1 %v3305_v33  ;;  %v4492_v33 = vpop.permute.xlu1 %1751 }
 0x1a3   :  { %2967 = vmatpush3.bf16.msra.mxu0 %v3306_v34  ;;  %3274 = vmatpush3.bf16.msra.mxu1 %v3306_v34 }
 0x1a4   :  { %2968 = vmatprep.subr.bf16.mxu0 %v3307_v1  ;;  %3267 = vmatprep.subr.bf16.mxu1 %v3307_v1  ;;  %v4496_v34 = vpop.permute.xlu1 %1815 }
 0x1a7   :  { %2969 = vmatpush3.bf16.msra.mxu0 %v3308_v54  ;;  %3275 = vmatpush3.bf16.msra.mxu1 %v3308_v54 }
 0x1a8   :  { %2970 = vmatprep.subr.bf16.mxu0 %v3309_v2  ;;  %3268 = vmatprep.subr.bf16.mxu1 %v3309_v2 }
 0x1a9   :  { %v3137_v37 = vpop.f32.mrb[0].mxu0 }
 0x1aa   :  { %v1049_v56 = vadd.f32 %v3137_v37, %v4314_v36  ;;  %v1040_v39 = vpop.f32.mrb[1].mxu0  ;;  %v3311_v37 = vld [vmem:[%s5116_s3 + $0x78] sm:$0xff]  }
 0x1ab   :  { %v1041_v23 = vadd.f32 %v4314_v36, %v1040_v39  ;;  %v3138_v30 = vpop.f32.mrb[2].mxu0  ;;  %2971 = vmatpush3.bf16.msra.mxu0 %v3310_v20  ;;  %3276 = vmatpush3.bf16.msra.mxu1 %v3310_v20  ;;  %v4433_v39 = vld [vmem:[%s5116_s3 + $0x80] sm:$0xff]  }
 0x1ac   :  { %v1105_v40 = vmax.f32 %v1049_v56, 0.0  ;;  %v1052_v29 = vadd.f32 %v3138_v30, %v4314_v36  ;;  %v1043_v41 = vpop.f32.mrb[3].mxu0  ;;  %v3312_v56 = vld [vmem:[%s5116_s3 + $0x38] sm:$0xff]   ;;  %2972 = vmatprep.subr.bf16.mxu0 %v3311_v37  ;;  %3269 = vmatprep.subr.bf16.mxu1 %v3311_v37 }
 0x1ad   :  { %v1103_v6 = vmax.f32 %v1041_v23, 0.0  ;;  %v1044_v53 = vadd.f32 %v4314_v36, %v1043_v41 }
 0x1ae   :  { %1184 = vst.msk [vmem:[#allocation4 + $0x50] sm:$0xff] %vm1119_vm14, %v1105_v40  ;;  %v1106_v58 = vmax.f32 %v1052_v29, 0.0 }
 0x1af   :  { %1182 = vst.msk [vmem:[#allocation4 + $0x20] sm:$0xff] %vm1119_vm14, %v1103_v6  ;;  %v1104_v8 = vmax.f32 %v1044_v53, 0.0  ;;  %2973 = vmatpush3.bf16.msra.mxu0 %v3312_v56  ;;  %3277 = vmatpush3.bf16.msra.mxu1 %v3312_v56 }
 0x1b0   :  { %1185 = vst.msk [vmem:[#allocation4 + $0x68] sm:$0xff] %vm1119_vm14, %v1106_v58  ;;  %3151 = vmatprep.subr.bf16.mxu0 %v4433_v39 }
 0x1b1   :  { %1183 = vst.msk [vmem:[#allocation4 + $0x38] sm:$0xff] %vm1119_vm14, %v1104_v8 }
 0x1b5   :  { %v1208_v47 = vld [vmem:[#allocation4 + $0x50] sm:$0xff] }
 0x1b6   :  { %1803 = vrot.lane.b32.xlu1 %v1208_v47, %s3361_s15  ;;  %1641 = vst.msk [vmem:[#allocation5 + $0x38] sm:$0xff] %vm1119_vm14, %v1208_v47  ;;  %v1202_v49 = vld [vmem:[#allocation4 + $0x20] sm:$0xff]  ;;  %v1300_v50 = vrot.slane %v1208_v47, 7  ;;  %v1460_v51 = vrot.slane %v1208_v47, 1 }
 0x1b7   :  { %v1211_v55 = vld [vmem:[#allocation4 + $0x68] sm:$0xff]  ;;  %v1294_v21 = vrot.slane %v1202_v49, 7  ;;  %1639 = vst.msk [vmem:[#allocation5 + $0x8] sm:$0xff] %vm1119_vm14, %v1202_v49  ;;  %v1454_v25 = vrot.slane %v1202_v49, 1 }
 0x1b8   :  { %1805 = vrot.lane.b32.xlu0 %v1211_v55, %s3361_s15  ;;  %1642 = vst.msk [vmem:[#allocation5 + $0x50] sm:$0xff] %vm1119_vm14, %v1211_v55  ;;  %v1205_v60 = vld [vmem:[#allocation4 + $0x38] sm:$0xff]  ;;  %v1301_v62 = vsel %vm224_vm3, %v1299_v44, %v1300_v50  ;;  %v1462_v63 = vsel %vm386_vm2, %v1460_v51, %v1461_v45  ;;  %v1463_v0 = vrot.slane %v1211_v55, 1  ;;  %v1303_v4 = vrot.slane %v1211_v55, 7  ;;  %v1215_v44 = vld [vmem:[#allocation4 + $0x88] sm:$0x1] }
 0x1b9   :  { %1640 = vst.msk [vmem:[#allocation5 + $0x20] sm:$0xff] %vm1119_vm14, %v1205_v60  ;;  %1357 = vst.msk [vmem:[#allocation5 + $0x48] sm:$0xff] %vm1119_vm14, %v1301_v62  ;;  %v1295_v5 = vsel %vm224_vm3, %v1293_v48, %v1294_v21  ;;  %v1457_v10 = vrot.slane %v1205_v60, 1  ;;  %v1297_v11 = vrot.slane %v1205_v60, 7  ;;  %v1456_v35 = vsel %vm386_vm2, %v1454_v25, %v1455_v27  ;;  %v1213_v45 = vld [vmem:[#allocation4 + $0x78] sm:$0xff]  ;;  %v1216_v48 = vld [vmem:[#allocation4 + $0x90] sm:$0xff] }
 0x1ba   :  { %1890 = vst.msk [vmem:[#allocation5 + $0x28] sm:$0xff] %vm1119_vm14, %v1462_v63  ;;  %1376 = vrot.lane.b32.xlu1 %v1208_v47, %s3359_s12  ;;  %v4338_v12 = vsel %vm386_vm2, %v1463_v0, %v1464_v52  ;;  %v4341_v13 = vsel %vm224_vm3, %v1302_v31, %v1303_v4  ;;  %1355 = vst.msk [vmem:[#allocation5 + $0x18] sm:$0xff] %vm1119_vm14, %v1295_v5  ;;  %v1311_v47 = vrot.slane %v1219_v9, 7  ;;  %v1467_v51 = vrot.slane %v1215_v44, 1  ;;  %v1231_v44 = vld [vmem:[#allocation4 + $0x108] sm:$0xff] }
 0x1bb   :  { %1891 = vst.msk [vmem:[#allocation5 + $0x40] sm:$0xff] %vm1119_vm14, %v4338_v12  ;;  %1358 = vst.msk [vmem:[#allocation5 + $0x60] sm:$0xff] %vm1119_vm14, %v4341_v13  ;;  %v4349_v14 = vsel %vm386_vm2, %v1457_v10, %v1458_v57  ;;  %v4352_v15 = vsel %vm224_vm3, %v1296_v59, %v1297_v11  ;;  %v1305_v52 = vrot.slane %v1213_v45, 7  ;;  %v1658_v57 = vrot.slane %v1224_v17, 1  ;;  %v1240_v45 = vld [vmem:[#allocation4 + $0x150] sm:$0xff] }
 0x1bc   :  { %1378 = vrot.lane.b32.xlu0 %v1211_v55, %s3359_s12  ;;  %1889 = vst.msk [vmem:[#allocation5 + $0x10] sm:$0xff] %vm1119_vm14, %v4349_v14  ;;  %1356 = vst.msk [vmem:[#allocation5 + $0x30] sm:$0xff] %vm1119_vm14, %v4352_v15  ;;  %v1870_v25 = vrot.slane %v4460_v19, 1  ;;  %v1871_v27 = vrot.slane %v1257_v24, 1  ;;  %v1242_v17 = vld [vmem:[#allocation4 + $0x160] sm:$0x1] }
 0x1be   :  { %1372 = vrot.lane.b32.xlu1 %v1202_v49, %s3359_s12  ;;  %v1218_v49 = vld [vmem:[#allocation4 + $0xa0] sm:$0x1]  ;;  %v1872_v7 = vsel %vm386_vm2, %v1870_v25, %v1871_v27 }
 0x1bf   :  { %v1470_v0 = vrot.slane %v1218_v49, 1  ;;  %1904 = vst.msk [vmem:[#allocation5 + $0x178] sm:$0xff] %vm1119_vm14, %v1872_v7  ;;  %v1234_v49 = vld [vmem:[#allocation4 + $0x120] sm:$0xff] }
 0x1c0   :  { %1801 = vrot.lane.b32.xlu0 %v1205_v60, %s3361_s15 }
 0x1c2   :  { %1739 = vrot.lane.b32.xlu1 %v1301_v62, %s3360_s0 }
 0x1c4   :  { %1667 = vrot.lane.b32.xlu0 %v1462_v63, %s3359_s12 }
 0x1c6   :  { %1505 = vrot.lane.b32.xlu1 %v1462_v63, %s3360_s0  ;;  %v1308_v63 = vrot.slane %v1216_v48, 7  ;;  %v1323_v48 = vrot.slane %v1237_v16, 7 }
 0x1c8   :  { %1374 = vrot.lane.b32.xlu0 %v1205_v60, %s3359_s12 }
 0x1ca   :  { %1501 = vrot.lane.b32.xlu1 %v1456_v35, %s3360_s0 }
 0x1cc   :  { %1578 = vrot.lane.b32.xlu0 %v1301_v62, %s3361_s15 }
 0x1ce   :  { %1669 = vrot.lane.b32.xlu1 %v4338_v12, %s3359_s12 }
 0x1d0   :  { %1663 = vrot.lane.b32.xlu0 %v1456_v35, %s3359_s12 }
 0x1d2   :  { %1580 = vrot.lane.b32.xlu1 %v4341_v13, %s3361_s15 }
 0x1d4   :  { %1574 = vrot.lane.b32.xlu0 %v1295_v5, %s3361_s15 }
 0x1d6   :  { %1665 = vrot.lane.b32.xlu1 %v4349_v14, %s3359_s12 }
 0x1d8   :  { %1741 = vrot.lane.b32.xlu0 %v4341_v13, %s3360_s0 }
 0x1da   :  { %1576 = vrot.lane.b32.xlu1 %v4352_v15, %s3361_s15 }
 0x1dc   :  { %1507 = vrot.lane.b32.xlu0 %v4338_v12, %s3360_s0 }
 0x1e0   :  { %1737 = vrot.lane.b32.xlu0 %v4352_v15, %s3360_s0 }
 0x1e4   :  { %1503 = vrot.lane.b32.xlu0 %v4349_v14, %s3360_s0 }
 0x1e9   :  { %v3141_v23 = vpop.f32.mrb[4].mxu0 }
 0x1ea   :  { %v1065_v30 = vadd.f32 %v3141_v23, %v4314_v36  ;;  %v1056_v40 = vpop.f32.mrb[5].mxu0 }
 0x1eb   :  { %v1057_v29 = vadd.f32 %v4314_v36, %v1056_v40  ;;  %v3142_v41 = vpop.f32.mrb[6].mxu0 }
 0x1ec   :  { %v1109_v6 = vmax.f32 %v1065_v30, 0.0  ;;  %v1068_v53 = vadd.f32 %v3142_v41, %v4314_v36  ;;  %v1059_v58 = vpop.f32.mrb[7].mxu0 }
 0x1ed   :  { %v1107_v8 = vmax.f32 %v1057_v29, 0.0  ;;  %v1060_v22 = vadd.f32 %v4314_v36, %v1059_v58 }
 0x1ee   :  { %1188 = vst.msk [vmem:[#allocation4 + $0xb0] sm:$0xff] %vm1119_vm14, %v1109_v6  ;;  %v1110_v43 = vmax.f32 %v1068_v53, 0.0 }
 0x1ef   :  { %1186 = vst.msk [vmem:[#allocation4 + $0x80] sm:$0xff] %vm1119_vm14, %v1107_v8  ;;  %v1108_v61 = vmax.f32 %v1060_v22, 0.0 }
 0x1f0   :  { %1189 = vst.msk [vmem:[#allocation4 + $0xc8] sm:$0xff] %vm1119_vm14, %v1110_v43 }
 0x1f1   :  { %1187 = vst.msk [vmem:[#allocation4 + $0x98] sm:$0xff] %vm1119_vm14, %v1108_v61  ;;  %v1239_v61 = vld [vmem:[#allocation4 + $0x148] sm:$0x1] }
 0x1f5   :  { %v1220_v50 = vld [vmem:[#allocation4 + $0xb0] sm:$0xff] }
 0x1f6   :  { %1811 = vrot.lane.b32.xlu1 %v1220_v50, %s3361_s15  ;;  %1645 = vst.msk [vmem:[#allocation5 + $0x98] sm:$0xff] %vm1119_vm14, %v1220_v50  ;;  %v1214_v31 = vld [vmem:[#allocation4 + $0x80] sm:$0xff]  ;;  %v1472_v55 = vrot.slane %v1220_v50, 1  ;;  %v1312_v21 = vrot.slane %v1220_v50, 7 }
 0x1f7   :  { %v1223_v59 = vld [vmem:[#allocation4 + $0xc8] sm:$0xff]  ;;  %1643 = vst.msk [vmem:[#allocation5 + $0x68] sm:$0xff] %vm1119_vm14, %v1214_v31  ;;  %v1466_v60 = vrot.slane %v1214_v31, 1  ;;  %v1306_v62 = vrot.slane %v1214_v31, 7 }
 0x1f8   :  { %v1657_v4 = vrot.slane %v1223_v59, 1  ;;  %1813 = vrot.lane.b32.xlu0 %v1223_v59, %s3361_s15  ;;  %1646 = vst.msk [vmem:[#allocation5 + $0xb0] sm:$0xff] %vm1119_vm14, %v1223_v59  ;;  %v1217_v5 = vld [vmem:[#allocation4 + $0x98] sm:$0xff]  ;;  %v1474_v10 = vsel %vm386_vm2, %v1472_v55, %v1473_v46  ;;  %v1313_v11 = vsel %vm224_vm3, %v1311_v47, %v1312_v21  ;;  %v1569_v35 = vrot.slane %v1223_v59, 7 }
 0x1f9   :  { %1644 = vst.msk [vmem:[#allocation5 + $0x80] sm:$0xff] %vm1119_vm14, %v1217_v5  ;;  %1894 = vst.msk [vmem:[#allocation5 + $0x88] sm:$0xff] %vm1119_vm14, %v1474_v10  ;;  %v1468_v12 = vsel %vm386_vm2, %v1466_v60, %v1467_v51  ;;  %v1307_v13 = vsel %vm224_vm3, %v1305_v52, %v1306_v62  ;;  %v1309_v14 = vrot.slane %v1217_v5, 7  ;;  %v1469_v15 = vrot.slane %v1217_v5, 1 }
 0x1fa   :  { %1361 = vst.msk [vmem:[#allocation5 + $0xa8] sm:$0xff] %vm1119_vm14, %v1313_v11  ;;  %1384 = vrot.lane.b32.xlu1 %v1220_v50, %s3359_s12  ;;  %1892 = vst.msk [vmem:[#allocation5 + $0x58] sm:$0xff] %vm1119_vm14, %v1468_v12  ;;  %v1659_v26 = vsel %vm386_vm2, %v1657_v4, %v1658_v57  ;;  %v1570_v18 = vsel %vm224_vm3, %v1568_v32, %v1569_v35  ;;  %v1485_v47 = vrot.slane %v1239_v61, 1  ;;  %v1236_v50 = vld [vmem:[#allocation4 + $0x130] sm:$0x1]  ;;  %v1317_v52 = vrot.slane %v1231_v44, 7 }
 0x1fb   :  { %1359 = vst.msk [vmem:[#allocation5 + $0x78] sm:$0xff] %vm1119_vm14, %v1307_v13  ;;  %1895 = vst.msk [vmem:[#allocation5 + $0xa0] sm:$0xff] %vm1119_vm14, %v1659_v26  ;;  %v1310_v42 = vsel %vm224_vm3, %v1308_v63, %v1309_v14  ;;  %v1471_v38 = vsel %vm386_vm2, %v1469_v15, %v1470_v0  ;;  %v1326_v59 = vrot.slane %v1240_v45, 7  ;;  %v1488_v60 = vrot.slane %v1242_v17, 1  ;;  %v1233_v35 = vld [vmem:[#allocation4 + $0x118] sm:$0x1] }
 0x1fc   :  { %1809 = vrot.lane.b32.xlu0 %v1217_v5, %s3361_s15  ;;  %1360 = vst.msk [vmem:[#allocation5 + $0x90] sm:$0xff] %vm1119_vm14, %v1310_v42  ;;  %1893 = vst.msk [vmem:[#allocation5 + $0x70] sm:$0xff] %vm1119_vm14, %v1471_v38  ;;  %v1320_v0 = vrot.slane %v1234_v49, 7  ;;  %v1482_v4 = vrot.slane %v1236_v50, 1  ;;  %v3314_v44 = vld [vmem:[%s5116_s3 + $0x88] sm:$0xff]  }
 0x1fe   :  { %1807 = vrot.lane.b32.xlu1 %v1214_v31, %s3361_s15 }
 0x200   :  { %1675 = vrot.lane.b32.xlu0 %v1474_v10, %s3359_s12  ;;  %v1922_v49 = vld [vmem:[#allocation5 + $0x88] sm:$0xff] }
 0x201   :  { %v1916_v17 = vld [vmem:[#allocation5 + $0x58] sm:$0xff] }
 0x202   :  { %1380 = vrot.lane.b32.xlu1 %v1214_v31, %s3359_s12 }
 0x204   :  { %1382 = vrot.lane.b32.xlu0 %v1217_v5, %s3359_s12 }
 0x206   :  { %1747 = vrot.lane.b32.xlu1 %v1313_v11, %s3360_s0 }
 0x208   :  { %1586 = vrot.lane.b32.xlu0 %v1313_v11, %s3361_s15 }
 0x20a   :  { %1513 = vrot.lane.b32.xlu1 %v1474_v10, %s3360_s0 }
 0x20c   :  { %1671 = vrot.lane.b32.xlu0 %v1468_v12, %s3359_s12 }
 0x20e   :  { %1743 = vrot.lane.b32.xlu1 %v1307_v13, %s3360_s0 }
 0x210   :  { %1582 = vrot.lane.b32.xlu0 %v1307_v13, %s3361_s15 }
 0x212   :  { %1509 = vrot.lane.b32.xlu1 %v1468_v12, %s3360_s0 }
 0x214   :  { %1749 = vrot.lane.b32.xlu0 %v1570_v18, %s3360_s0 }
 0x216   :  { %1677 = vrot.lane.b32.xlu1 %v1659_v26, %s3359_s12 }
 0x218   :  { %1745 = vrot.lane.b32.xlu0 %v1310_v42, %s3360_s0 }
 0x21a   :  { %1588 = vrot.lane.b32.xlu1 %v1570_v18, %s3361_s15 }
 0x21c   :  { %1511 = vrot.lane.b32.xlu0 %v1471_v38, %s3360_s0 }
 0x21e   :  { %1673 = vrot.lane.b32.xlu1 %v1471_v38, %s3359_s12 }
 0x222   :  { %1584 = vrot.lane.b32.xlu1 %v1310_v42, %s3361_s15 }
 0x228   :  { %v4498_v1 = vpop.permute.xlu1 %1803 }
 0x229   :  { %v3145_v54 = vpop.f32.mrb[8].mxu0 }
 0x22a   :  { %v1081_v2 = vadd.f32 %v3145_v54, %v4314_v36  ;;  %v4501_v20 = vpop.permute.xlu0 %1805  ;;  %v1072_v37 = vpop.f32.mrb[9].mxu0 }
 0x22b   :  { %v1073_v56 = vadd.f32 %v4314_v36, %v1072_v37  ;;  %v3146_v23 = vpop.f32.mrb[10].mxu0 }
 0x22c   :  { %v1113_v30 = vmax.f32 %v1081_v2, 0.0  ;;  %v1084_v40 = vadd.f32 %v3146_v23, %v4314_v36  ;;  %v1377_v29 = vpop.permute.xlu1 %1376  ;;  %v1075_v41 = vpop.f32.mrb[11].mxu0  ;;  %v1479_v2 = vrot.slane %v1233_v35, 1  ;;  %v1243_v35 = vld [vmem:[#allocation4 + $0x168] sm:$0xff] }
 0x22d   :  { %v1111_v6 = vmax.f32 %v1073_v56, 0.0  ;;  %1422 = vst.msk [vmem:[#allocation5 + $0x48] sm:$0xff] %vm1418_vm0, %v1377_v29  ;;  %v1076_v53 = vadd.f32 %v4314_v36, %v1075_v41 }
 0x22e   :  { %1192 = vst.msk [vmem:[#allocation4 + $0x140] sm:$0xff] %vm1119_vm14, %v1113_v30  ;;  %v1114_v58 = vmax.f32 %v1084_v40, 0.0  ;;  %v1379_v8 = vpop.permute.xlu0 %1378 }
 0x22f   :  { %1190 = vst.msk [vmem:[#allocation4 + $0x110] sm:$0xff] %vm1119_vm14, %v1111_v6  ;;  %v1112_v22 = vmax.f32 %v1076_v53, 0.0 }
 0x230   :  { %1423 = vst.msk [vmem:[#allocation5 + $0x60] sm:$0xff] %vm1418_vm0, %v1379_v8  ;;  %v1373_v43 = vpop.permute.xlu1 %1372 }
 0x231   :  { %1193 = vst.msk [vmem:[#allocation4 + $0x158] sm:$0xff] %vm1119_vm14, %v1114_v58  ;;  %1191 = vst.msk [vmem:[#allocation4 + $0x128] sm:$0xff] %vm1119_vm14, %v1112_v22  ;;  %v1907_v22 = vld [vmem:[#allocation5 + $0x10] sm:$0xff] }
 0x232   :  { %1420 = vst.msk [vmem:[#allocation5 + $0x18] sm:$0xff] %vm1418_vm0, %v1373_v43  ;;  %v4513_v9 = vpop.permute.xlu0 %1801 }
 0x234   :  { %v4515_v46 = vpop.permute.xlu1 %1739 }
 0x235   :  { %v1238_v51 = vld [vmem:[#allocation4 + $0x140] sm:$0xff] }
 0x236   :  { %v1668_v31 = vpop.permute.xlu0 %1667  ;;  %1819 = vrot.lane.b32.xlu1 %v1238_v51, %s3361_s15  ;;  %1649 = vst.msk [vmem:[#allocation5 + $0xf8] sm:$0xff] %vm1119_vm14, %v1238_v51  ;;  %v1484_v55 = vrot.slane %v1238_v51, 1  ;;  %v1232_v21 = vld [vmem:[#allocation4 + $0x110] sm:$0xff]  ;;  %v1324_v57 = vrot.slane %v1238_v51, 7 }
 0x237   :  { %1713 = vst.msk [vmem:[#allocation5 + $0x38] sm:$0xff] %vm1418_vm0, %v1668_v31  ;;  %v1318_v62 = vrot.slane %v1232_v21, 7  ;;  %v1478_v18 = vrot.slane %v1232_v21, 1 }
 0x238   :  { %1647 = vst.msk [vmem:[#allocation5 + $0xc8] sm:$0xff] %vm1119_vm14, %v1232_v21  ;;  %v4521_v63 = vld [vmem:[#allocation4 + $0x158] sm:$0xff]  ;;  %v1506_v5 = vpop.permute.xlu1 %1505  ;;  %v1235_v10 = vld [vmem:[#allocation4 + $0x128] sm:$0xff]  ;;  %v1486_v11 = vsel %vm386_vm2, %v1484_v55, %v1485_v47  ;;  %v4525_v12 = vsel %vm224_vm3, %v1323_v48, %v1324_v57  ;;  %v1913_v47 = vld [vmem:[#allocation5 + $0x40] sm:$0xff] }
 0x239   :  { %v1327_v13 = vrot.slane %v4521_v63, 7  ;;  %1650 = vst.msk [vmem:[#allocation5 + $0x110] sm:$0xff] %vm1119_vm14, %v4521_v63  ;;  %v1487_v14 = vrot.slane %v4521_v63, 1  ;;  %1817 = vrot.lane.b32.xlu0 %v1235_v10, %s3361_s15  ;;  %1648 = vst.msk [vmem:[#allocation5 + $0xe0] sm:$0xff] %vm1119_vm14, %v1235_v10  ;;  %v1319_v15 = vsel %vm224_vm3, %v1317_v52, %v1318_v62  ;;  %v1321_v24 = vrot.slane %v1235_v10, 7  ;;  %v1928_v57 = vld [vmem:[#allocation5 + $0xb8] sm:$0xff] }
 0x23a   :  { %1551 = vst.msk [vmem:[#allocation5 + $0x48] sm:$0xff] %vm1547_vm1, %v1506_v5  ;;  %v1481_v26 = vrot.slane %v1235_v10, 1  ;;  %v1375_v42 = vpop.permute.xlu0 %1374  ;;  %1392 = vrot.lane.b32.xlu1 %v1238_v51, %s3359_s12  ;;  %v1480_v23 = vsel %vm386_vm2, %v1478_v18, %v1479_v2  ;;  %v1958_v48 = vpack.c.bf16 %v1916_v17, %v1913_v47  ;;  %v1246_v2 = vld [vmem:[#allocation4 + $0x180] sm:$0xff] }
 0x23b   :  { %1898 = vst.msk [vmem:[#allocation5 + $0xe8] sm:$0xff] %vm1119_vm14, %v1486_v11  ;;  %1365 = vst.msk [vmem:[#allocation5 + $0x108] sm:$0xff] %vm1119_vm14, %v4525_v12  ;;  %v1328_v38 = vsel %vm224_vm3, %v1326_v59, %v1327_v13  ;;  %v4542_v25 = vsel %vm386_vm2, %v1487_v14, %v1488_v60  ;;  %v1322_v27 = vsel %vm224_vm3, %v1320_v0, %v1321_v24 }
 0x23c   :  { %1363 = vst.msk [vmem:[#allocation5 + $0xd8] sm:$0xff] %vm1119_vm14, %v1319_v15  ;;  %1366 = vst.msk [vmem:[#allocation5 + $0x120] sm:$0xff] %vm1119_vm14, %v1328_v38  ;;  %v1483_v7 = vsel %vm386_vm2, %v1481_v26, %v1482_v4  ;;  %v1502_v28 = vpop.permute.xlu1 %1501 }
 0x23d   :  { %1421 = vst.msk [vmem:[#allocation5 + $0x30] sm:$0xff] %vm1418_vm0, %v1375_v42  ;;  %1683 = vrot.lane.b32.xlu0 %v1486_v11, %s3359_s12 }
 0x23e   :  { %1899 = vst.msk [vmem:[#allocation5 + $0x100] sm:$0xff] %vm1119_vm14, %v4542_v25  ;;  %1364 = vst.msk [vmem:[#allocation5 + $0xf0] sm:$0xff] %vm1119_vm14, %v1322_v27  ;;  %v1579_v32 = vpop.permute.xlu0 %1578  ;;  %1388 = vrot.lane.b32.xlu1 %v1232_v21, %s3359_s12  ;;  %v1925_v21 = vld [vmem:[#allocation5 + $0xa0] sm:$0xff] }
 0x23f   :  { %1897 = vst.msk [vmem:[#allocation5 + $0xd0] sm:$0xff] %vm1119_vm14, %v1483_v7  ;;  %v1964_v13 = vpack.c.bf16 %v1928_v57, %v1925_v21 }
 0x240   :  { %1549 = vst.msk [vmem:[#allocation5 + $0x18] sm:$0xff] %vm1547_vm1, %v1502_v28  ;;  %v1670_v54 = vpop.permute.xlu1 %1669  ;;  %v1245_v28 = vld [vmem:[#allocation4 + $0x178] sm:$0x1] }
 0x241   :  { %1714 = vst.msk [vmem:[#allocation5 + $0x50] sm:$0xff] %vm1418_vm0, %v1670_v54  ;;  %1390 = vrot.lane.b32.xlu0 %v1235_v10, %s3359_s12  ;;  %v1248_v54 = vld [vmem:[#allocation4 + $0x190] sm:$0x1] }
 0x242   :  { %1755 = vrot.lane.b32.xlu1 %v4525_v12, %s3360_s0  ;;  %v1664_v37 = vpop.permute.xlu0 %1663  ;;  %v1934_v14 = vld [vmem:[#allocation5 + $0xe8] sm:$0xff] }
 0x243   :  { %1711 = vst.msk [vmem:[#allocation5 + $0x8] sm:$0xff] %vm1418_vm0, %v1664_v37 }
 0x244   :  { %v1581_v56 = vpop.permute.xlu1 %1580 }
 0x245   :  { %1626 = vst.msk [vmem:[#allocation5 + $0x48] sm:$0xff] %vm1622_vm4, %v1581_v56  ;;  %1679 = vrot.lane.b32.xlu0 %v1480_v23, %s3359_s12 }
 0x246   :  { %1521 = vrot.lane.b32.xlu1 %v1486_v11, %s3360_s0  ;;  %v1575_v30 = vpop.permute.xlu0 %1574  ;;  %v1931_v62 = vld [vmem:[#allocation5 + $0xd0] sm:$0xff] }
 0x247   :  { %1623 = vst.msk [vmem:[#allocation5] sm:$0xff] %vm1622_vm4, %v1575_v30  ;;  %v1967_v26 = vpack.c.bf16 %v1934_v14, %v1931_v62  ;;  %v1491_v30 = vrot.slane %v1245_v28, 1 }
 0x248   :  { %v1666_v40 = vpop.permute.xlu1 %1665 }
 0x249   :  { %1712 = vst.msk [vmem:[#allocation5 + $0x20] sm:$0xff] %vm1418_vm0, %v1666_v40  ;;  %1590 = vrot.lane.b32.xlu0 %v1319_v15, %s3361_s15  ;;  %v1329_v40 = vrot.slane %v1243_v35, 7 }
 0x24a   :  { %1786 = vst.msk [vmem:[#allocation5 + $0x20] sm:$0xff] %vm1547_vm1, %v4515_v46  ;;  %1517 = vrot.lane.b32.xlu1 %v1480_v23, %s3360_s0  ;;  %v1742_v29 = vpop.permute.xlu0 %1741  ;;  %v1919_v46 = vld [vmem:[#allocation5 + $0x70] sm:$0xff] }
 0x24b   :  { %1850 = vst.msk [vmem:[#allocation5 + $0x20] sm:$0xff] %vm1622_vm4, %v4498_v1  ;;  %v1961_v50 = vpack.c.bf16 %v1922_v49, %v1919_v46 }
 0x24c   :  { %1787 = vst.msk [vmem:[#allocation5 + $0x38] sm:$0xff] %vm1547_vm1, %v1742_v29  ;;  %v1577_v41 = vpop.permute.xlu1 %1576 }
 0x24d   :  { %1851 = vst.msk [vmem:[#allocation5 + $0x38] sm:$0xff] %vm1622_vm4, %v4501_v20  ;;  %1624 = vst.msk [vmem:[#allocation5 + $0x18] sm:$0xff] %vm1622_vm4, %v1577_v41  ;;  %1757 = vrot.lane.b32.xlu0 %v1328_v38, %s3360_s0 }
 0x24e   :  { %1685 = vrot.lane.b32.xlu1 %v4542_v25, %s3359_s12  ;;  %v1508_v6 = vpop.permute.xlu0 %1507  ;;  %v1905_v61 = vld [vmem:[#allocation5] sm:$0xff] }
 0x24f   :  { %1552 = vst.msk [vmem:[#allocation5 + $0x60] sm:$0xff] %vm1547_vm1, %v1508_v6 }
 0x251   :  { %1753 = vrot.lane.b32.xlu0 %v1322_v27, %s3360_s0 }
 0x252   :  { %1681 = vrot.lane.b32.xlu1 %v1483_v7, %s3359_s12  ;;  %v1738_v1 = vpop.permute.xlu0 %1737  ;;  %v1909_v8 = vld [vmem:[#allocation5 + $0x20] sm:$0xff] }
 0x253   :  { %1785 = vst.msk [vmem:[#allocation5 + $0x8] sm:$0xff] %vm1547_vm1, %v1738_v1 }
 0x254   :  { %1849 = vst.msk [vmem:[#allocation5 + $0x8] sm:$0xff] %vm1622_vm4, %v4513_v9  ;;  %v1908_v53 = vld [vmem:[#allocation5 + $0x18] sm:$0xff]  ;;  %v1910_v9 = vld [vmem:[#allocation5 + $0x28] sm:$0xff] }
 0x255   :  { %1519 = vrot.lane.b32.xlu0 %v1483_v7, %s3360_s0  ;;  %v1953_v16 = vpack.c.bf16 %v1908_v53, %v1905_v61  ;;  %v1955_v45 = vpack.c.bf16 %v1910_v9, %v1907_v22  ;;  %v1494_v22 = vrot.slane %v1248_v54, 1 }
 0x256   :  { %1592 = vrot.lane.b32.xlu1 %v1322_v27, %s3361_s15  ;;  %v1504_v20 = vpop.permute.xlu0 %1503  ;;  %v1249_v27 = vld [vmem:[#allocation4 + $0x198] sm:$0xff] }
 0x257   :  { %1550 = vst.msk [vmem:[#allocation5 + $0x30] sm:$0xff] %vm1547_vm1, %v1504_v20  ;;  %v1335_v56 = vrot.slane %v1249_v27, 7  ;;  %v1914_v27 = vld [vmem:[#allocation5 + $0x48] sm:$0xff] }
 0x258   :  { %1625 = vst.msk [vmem:[#allocation5 + $0x30] sm:$0xff] %vm1622_vm4, %v1579_v32  ;;  %v1254_v32 = vld [vmem:[#allocation4 + $0x1c0] sm:$0x1] }
 0x259   :  { %1821 = vrot.lane.b32.xlu0 %v4521_v63, %s3361_s15  ;;  %v1661_v20 = vrot.slane %v1254_v32, 1 }
 0x25a   :  { %1596 = vrot.lane.b32.xlu1 %v1328_v38, %s3361_s15 }
 0x25b   :  { %v1906_v58 = vld [vmem:[#allocation5 + $0x8] sm:$0xff] }
 0x25c   :  { %v1954_v43 = vpack.c.bf16 %v1909_v8, %v1906_v58 }
 0x25d   :  { %1594 = vrot.lane.b32.xlu0 %v4525_v12, %s3361_s15 }
 0x25e   :  { %2184 = vmatprep.mubr.bf16.mxu0 %v1954_v43  ;;  %v1332_v43 = vrot.slane %v1246_v2, 7  ;;  %v1735_v2 = vrot.slane %v4460_v19, 7 }
 0x25f   :  { %2185 = vmatmul.mubr.bf16.vlgmr.msra.gmra.mrb[16].mxu0 %v1953_v16 }
 0x260   :  { %3152 = vmatpush3.bf16.msra.mxu0 %v4433_v39  ;;  %3155 = vmatprep.mubr.msk.bf16.mxu0 %vm1119_vm14, %v1955_v45 }
 0x261   :  { %3153 = vmatprep.subr.bf16.mxu0 %v3314_v44 }
 0x264   :  { %3154 = vmatpush3.bf16.msra.mxu0 %v3314_v44 }
 0x267   :  { %3156 = vmatmul.mubr.msk.bf16.vlgmr.msra.gmra.mrb[20].mxu0 %vm1119_vm14, %v1958_v48 }
 0x268   :  { %v4600_v51 = vpop.permute.xlu1 %1811  ;;  %3159 = vmatprep.mubr.msk.bf16.mxu0 %vm1119_vm14, %v1961_v50 }
 0x269   :  { %v3149_v52 = vpop.f32.mrb[12].mxu0 }
 0x26a   :  { %v1097_v31 = vadd.f32 %v3149_v52, %v4314_v36  ;;  %v1088_v39 = vpop.f32.mrb[13].mxu0  ;;  %v4604_v55 = vpop.permute.xlu0 %1813 }
 0x26b   :  { %v1089_v59 = vadd.f32 %v4314_v36, %v1088_v39  ;;  %v3150_v60 = vpop.f32.mrb[14].mxu0 }
 0x26c   :  { %v1117_v0 = vmax.f32 %v1097_v31, 0.0  ;;  %v1100_v4 = vadd.f32 %v3150_v60, %v4314_v36  ;;  %v1091_v5 = vpop.f32.mrb[15].mxu0  ;;  %v1385_v10 = vpop.permute.xlu1 %1384 }
 0x26d   :  { %v1115_v11 = vmax.f32 %v1089_v59, 0.0  ;;  %v1092_v12 = vadd.f32 %v4314_v36, %v1091_v5  ;;  %1426 = vst.msk [vmem:[#allocation5 + $0xa8] sm:$0xff] %vm1418_vm0, %v1385_v10  ;;  %v1251_v36 = vld [vmem:[#allocation4 + $0x1a8] sm:$0x1]  ;;  %v1937_v59 = vld [vmem:[#allocation5 + $0x100] sm:$0xff] }
 0x26e   :  { %1196 = vst.msk [vmem:[#allocation4 + $0x1a0] sm:$0xff] %vm1119_vm14, %v1117_v0  ;;  %v1118_v15 = vmax.f32 %v1100_v4, 0.0  ;;  %v4611_v24 = vpop.permute.xlu0 %1809  ;;  %v1497_v37 = vrot.slane %v1251_v36, 1 }
 0x26f   :  { %1194 = vst.msk [vmem:[#allocation4 + $0x170] sm:$0xff] %vm1119_vm14, %v1115_v11  ;;  %v1116_v42 = vmax.f32 %v1092_v12, 0.0  ;;  %3160 = vmatmul.mubr.msk.bf16.gmra.mrb[24].mxu0 %vm1119_vm14, %v1964_v13  ;;  %v1952_v13 = vld [vmem:[#allocation5 + $0x178] sm:$0xff] }
 0x270   :  { %1197 = vst.msk [vmem:[#allocation4 + $0x1b8] sm:$0xff] %vm1119_vm14, %v1118_v15  ;;  %v4616_v38 = vpop.permute.xlu1 %1807  ;;  %3163 = vmatprep.mubr.msk.bf16.mxu0 %vm1119_vm14, %v1967_v26  ;;  %v1911_v15 = vld [vmem:[#allocation5 + $0x30] sm:$0xff]  ;;  %v1912_v26 = vld [vmem:[#allocation5 + $0x38] sm:$0xff] }
 0x271   :  { %1195 = vst.msk [vmem:[#allocation4 + $0x188] sm:$0xff] %vm1119_vm14, %v1116_v42 }
 0x272   :  { %v1676_v7 = vpop.permute.xlu0 %1675 }
 0x273   :  { %1717 = vst.msk [vmem:[#allocation5 + $0x98] sm:$0xff] %vm1418_vm0, %v1676_v7 }
 0x274   :  { %v1381_v18 = vpop.permute.xlu1 %1380 }
 0x275   :  { %v4621_v23 = vld [vmem:[#allocation4 + $0x1a0] sm:$0xff]  ;;  %1424 = vst.msk [vmem:[#allocation5 + $0x78] sm:$0xff] %vm1418_vm0, %v1381_v18  ;;  %v1255_v18 = vld [vmem:[#allocation4 + $0x1c8] sm:$0xff] }
 0x276   :  { %v1496_v29 = vrot.slane %v4621_v23, 1  ;;  %1653 = vst.msk [vmem:[#allocation5 + $0x158] sm:$0xff] %vm1119_vm14, %v4621_v23  ;;  %v1383_v41 = vpop.permute.xlu0 %1382  ;;  %v1244_v6 = vld [vmem:[#allocation4 + $0x170] sm:$0xff]  ;;  %v1336_v1 = vrot.slane %v4621_v23, 7  ;;  %v1734_v54 = vrot.slane %v1255_v18, 7 }
 0x277   :  { %v4628_v53 = vld [vmem:[#allocation4 + $0x1b8] sm:$0xff]  ;;  %1425 = vst.msk [vmem:[#allocation5 + $0x90] sm:$0xff] %vm1418_vm0, %v1383_v41  ;;  %1823 = vrot.lane.b32.xlu1 %v1244_v6, %s3361_s15  ;;  %v1490_v58 = vrot.slane %v1244_v6, 1  ;;  %v1330_v8 = vrot.slane %v1244_v6, 7 }
 0x278   :  { %1651 = vst.msk [vmem:[#allocation5 + $0x128] sm:$0xff] %vm1119_vm14, %v1244_v6  ;;  %v1660_v61 = vrot.slane %v4628_v53, 1  ;;  %1654 = vst.msk [vmem:[#allocation5 + $0x170] sm:$0xff] %vm1119_vm14, %v4628_v53  ;;  %v4636_v16 = vpop.permute.xlu1 %1747  ;;  %v4638_v9 = vld [vmem:[#allocation4 + $0x188] sm:$0xff]  ;;  %v4641_v44 = vsel %vm386_vm2, %v1496_v29, %v1497_v37  ;;  %v4644_v45 = vsel %vm224_vm3, %v1335_v56, %v1336_v1  ;;  %v1572_v32 = vrot.slane %v4628_v53, 7 }
 0x279   :  { %v1492_v17 = vsel %vm386_vm2, %v1490_v58, %v1491_v30  ;;  %v4648_v46 = vsel %vm224_vm3, %v1329_v40, %v1330_v8  ;;  %v1493_v47 = vrot.slane %v4638_v9, 1  ;;  %1652 = vst.msk [vmem:[#allocation5 + $0x140] sm:$0xff] %vm1119_vm14, %v4638_v9  ;;  %v1333_v48 = vrot.slane %v4638_v9, 7  ;;  %1902 = vst.msk [vmem:[#allocation5 + $0x148] sm:$0xff] %vm1119_vm14, %v4641_v44 }
 0x27a   :  { %1369 = vst.msk [vmem:[#allocation5 + $0x168] sm:$0xff] %vm1119_vm14, %v4644_v45  ;;  %1900 = vst.msk [vmem:[#allocation5 + $0x118] sm:$0xff] %vm1119_vm14, %v1492_v17  ;;  %1687 = vrot.lane.b32.xlu0 %v1492_v17, %s3359_s12  ;;  %v4660_v49 = vpop.permute.xlu0 %1586  ;;  %v4665_v50 = vsel %vm386_vm2, %v1660_v61, %v1661_v20  ;;  %v1736_v29 = vsel %vm224_vm3, %v1734_v54, %v1735_v2 }
 0x27b   :  { %1367 = vst.msk [vmem:[#allocation5 + $0x138] sm:$0xff] %vm1119_vm14, %v4648_v46  ;;  %1759 = vrot.lane.b32.xlu1 %v4648_v46, %s3360_s0  ;;  %v4670_v52 = vsel %vm386_vm2, %v1493_v47, %v1494_v22  ;;  %v4673_v31 = vsel %vm224_vm3, %v1332_v43, %v1333_v48  ;;  %1903 = vst.msk [vmem:[#allocation5 + $0x160] sm:$0xff] %vm1119_vm14, %v4665_v50  ;;  %v3320_v47 = vld [vmem:[%s5118_s5 + $0x14] ss:$8 sps:$4 sm:$0xff]   ;;  %vm2418_vm2 = vcmask 523264  }
 0x27c   :  { %v1514_v39 = vpop.permute.xlu1 %1513  ;;  %1901 = vst.msk [vmem:[#allocation5 + $0x130] sm:$0xff] %vm1119_vm14, %v4670_v52  ;;  %1368 = vst.msk [vmem:[#allocation5 + $0x150] sm:$0xff] %vm1119_vm14, %v4673_v31 }
 0x27d   :  { %1555 = vst.msk [vmem:[#allocation5 + $0xa8] sm:$0xff] %vm1547_vm1, %v1514_v39 }
 0x27e   :  { %1394 = vrot.lane.b32.xlu0 %v4521_v63, %s3359_s12  ;;  %v1672_v21 = vpop.permute.xlu0 %1671 }
 0x27f   :  { %1715 = vst.msk [vmem:[#allocation5 + $0x68] sm:$0xff] %vm1418_vm0, %v1672_v21  ;;  %1689 = vrot.lane.b32.xlu1 %v4670_v52, %s3359_s12  ;;  %v3326_v21 = vld [vmem:[%s5118_s5 + $0x34] ss:$8 sps:$4 sm:$0xff]  }
 0x280   :  { %v1744_v57 = vpop.permute.xlu1 %1743  ;;  %v1946_v4 = vld [vmem:[#allocation5 + $0x148] sm:$0xff] }
 0x281   :  { %1788 = vst.msk [vmem:[#allocation5 + $0x50] sm:$0xff] %vm1547_vm1, %v1744_v57  ;;  %v1940_v60 = vld [vmem:[#allocation5 + $0x118] sm:$0xff] }
 0x282   :  { %1852 = vst.msk [vmem:[#allocation5 + $0x50] sm:$0xff] %vm1622_vm4, %v4616_v38  ;;  %1761 = vrot.lane.b32.xlu0 %v4673_v31, %s3360_s0  ;;  %v1583_v62 = vpop.permute.xlu0 %1582  ;;  %v1970_v0 = vpack.c.bf16 %v1940_v60, %v1937_v59  ;;  %v1949_v12 = vld [vmem:[#allocation5 + $0x160] sm:$0xff]  ;;  %v3324_v59 = vld [vmem:[%s5118_s5 + $0x30] ss:$8 sps:$4 sm:$0xff]  }
 0x283   :  { %1627 = vst.msk [vmem:[#allocation5 + $0x60] sm:$0xff] %vm1622_vm4, %v1583_v62  ;;  %1396 = vrot.lane.b32.xlu1 %v1244_v6, %s3359_s12  ;;  %v1943_v63 = vld [vmem:[#allocation5 + $0x130] sm:$0xff]  ;;  %v1976_v36 = vpack.c.bf16 %v1952_v13, %v1949_v12 }
 0x284   :  { %v1510_v5 = vpop.permute.xlu1 %1509  ;;  %3164 = vmatmul.mubr.msk.bf16.gmra.mrb[28].mxu0 %vm1119_vm14, %v1970_v0  ;;  %v1973_v10 = vpack.c.bf16 %v1946_v4, %v1943_v63  ;;  %v3362_v0 = vmov 0  }
 0x285   :  { %1553 = vst.msk [vmem:[#allocation5 + $0x78] sm:$0xff] %vm1547_vm1, %v1510_v5 }
 0x286   :  { %1523 = vrot.lane.b32.xlu0 %v4542_v25, %s3360_s0  ;;  %v1750_v11 = vpop.permute.xlu0 %1749  ;;  %3167 = vmatprep.mubr.msk.bf16.mxu0 %vm1119_vm14, %v1973_v10 }
 0x287   :  { %1791 = vst.msk [vmem:[#allocation5 + $0x98] sm:$0xff] %vm1547_vm1, %v1750_v11  ;;  %1763 = vrot.lane.b32.xlu1 %v4644_v45, %s3360_s0 }
 0x288   :  { %1855 = vst.msk [vmem:[#allocation5 + $0x98] sm:$0xff] %vm1622_vm4, %v4604_v55  ;;  %v1678_v14 = vpop.permute.xlu1 %1677  ;;  %v1956_v55 = vpack.c.bf16 %v1914_v27, %v1911_v15 }
 0x289   :  { %1718 = vst.msk [vmem:[#allocation5 + $0xb0] sm:$0xff] %vm1418_vm0, %v1678_v14  ;;  %v1915_v42 = vld [vmem:[#allocation5 + $0x50] sm:$0xff] }
 0x28a   :  { %1792 = vst.msk [vmem:[#allocation5 + $0xb0] sm:$0xff] %vm1547_vm1, %v4492_v33  ;;  %1825 = vrot.lane.b32.xlu0 %v4638_v9, %s3361_s15  ;;  %v1746_v25 = vpop.permute.xlu0 %1745  ;;  %v1957_v38 = vpack.c.bf16 %v1915_v42, %v1912_v26  ;;  %v1917_v41 = vld [vmem:[#allocation5 + $0x60] sm:$0xff] }
 0x28b   :  { %1856 = vst.msk [vmem:[#allocation5 + $0xb0] sm:$0xff] %vm1622_vm4, %v4496_v34  ;;  %1525 = vrot.lane.b32.xlu1 %v1492_v17, %s3360_s0 }
 0x28c   :  { %1789 = vst.msk [vmem:[#allocation5 + $0x68] sm:$0xff] %vm1547_vm1, %v1746_v25  ;;  %v1589_v7 = vpop.permute.xlu1 %1588  ;;  %2192 = vmatprep.mubr.bf16.mxu1 %v1957_v38  ;;  %3168 = vmatmul.mubr.msk.bf16.gmra.mrb[32].mxu0 %vm1119_vm14, %v1976_v36 }
 0x28d   :  { %1853 = vst.msk [vmem:[#allocation5 + $0x68] sm:$0xff] %vm1622_vm4, %v4611_v24  ;;  %1630 = vst.msk [vmem:[#allocation5 + $0xa8] sm:$0xff] %vm1622_vm4, %v1589_v7  ;;  %2193 = vmatmul.mubr.bf16.vlgmr.msra.gmra.mrb[0].mxu1 %v1956_v55  ;;  %v1252_v24 = vld [vmem:[#allocation4 + $0x1b0] sm:$0xff]  ;;  %2475 = vmatprep.mubr.bf16.mxu0 %v3362_v0 }
 0x28e   :  { %1598 = vrot.lane.b32.xlu0 %v4648_v46, %s3361_s15  ;;  %v1512_v33 = vpop.permute.xlu0 %1511  ;;  %v1571_v35 = vrot.slane %v1252_v24, 7  ;;  %v3318_v46 = vld [vmem:[%s5118_s5 + $0x10] ss:$8 sps:$4 sm:$0xff]  }
 0x28f   :  { %1554 = vst.msk [vmem:[#allocation5 + $0x90] sm:$0xff] %vm1547_vm1, %v1512_v33  ;;  %1827 = vrot.lane.b32.xlu1 %v4621_v23, %s3361_s15  ;;  %v1924_v20 = vld [vmem:[#allocation5 + $0x98] sm:$0xff] }
 0x290   :  { %1629 = vst.msk [vmem:[#allocation5 + $0x90] sm:$0xff] %vm1622_vm4, %v4660_v49  ;;  %v1674_v34 = vpop.permute.xlu1 %1673 }
 0x291   :  { %1716 = vst.msk [vmem:[#allocation5 + $0x80] sm:$0xff] %vm1418_vm0, %v1674_v34 }
 0x292   :  { %1790 = vst.msk [vmem:[#allocation5 + $0x80] sm:$0xff] %vm1547_vm1, %v4636_v16  ;;  %1691 = vrot.lane.b32.xlu0 %v4641_v44, %s3359_s12  ;;  %v1927_v40 = vld [vmem:[#allocation5 + $0xb0] sm:$0xff] }
 0x293   :  { %1854 = vst.msk [vmem:[#allocation5 + $0x80] sm:$0xff] %vm1622_vm4, %v4600_v51  ;;  %1600 = vrot.lane.b32.xlu1 %v4673_v31, %s3361_s15  ;;  %v1573_v51 = vsel %vm224_vm3, %v1571_v35, %v1572_v32  ;;  %v1963_v58 = vpack.c.bf16 %v1927_v40, %v1924_v20  ;;  %v3321_v31 = vld [vmem:[%s5118_s5 + $0x20] ss:$8 sps:$4 sm:$0xff]   ;;  %vm3364_vm3 = vmmov 0  }
 0x294   :  { %v1585_v28 = vpop.permute.xlu1 %1584  ;;  %v1918_v37 = vld [vmem:[#allocation5 + $0x68] sm:$0xff] }
 0x295   :  { %1628 = vst.msk [vmem:[#allocation5 + $0x78] sm:$0xff] %vm1622_vm4, %v1585_v28  ;;  %v1926_v8 = vld [vmem:[#allocation5 + $0xa8] sm:$0xff] }
 0x296   :  { %1398 = vrot.lane.b32.xlu0 %v4638_v9, %s3359_s12 }
 0x297   :  { %1693 = vrot.lane.b32.xlu1 %v4665_v50, %s3359_s12  ;;  %v3323_v50 = vld [vmem:[%s5118_s5 + $0x24] ss:$8 sps:$4 sm:$0xff]  }
 0x29a   :  { %1765 = vrot.lane.b32.xlu0 %v1573_v51, %s3360_s0  ;;  %v1921_v56 = vld [vmem:[#allocation5 + $0x80] sm:$0xff] }
 0x29b   :  { %1400 = vrot.lane.b32.xlu1 %v4621_v23, %s3359_s12  ;;  %v1960_v30 = vpack.c.bf16 %v1921_v56, %v1918_v37  ;;  %v1923_v23 = vld [vmem:[#allocation5 + $0x90] sm:$0xff] }
 0x29c   :  { %v1920_v6 = vld [vmem:[#allocation5 + $0x78] sm:$0xff]  ;;  %v1962_v22 = vpack.c.bf16 %v1926_v8, %v1923_v23 }
 0x29d   :  { %2200 = vmatprep.mubr.bf16.mxu1 %v1960_v30  ;;  %v1959_v1 = vpack.c.bf16 %v1920_v6, %v1917_v41 }
 0x29e   :  { %1527 = vrot.lane.b32.xlu0 %v4670_v52, %s3360_s0 }
 0x29f   :  { %1767 = vrot.lane.b32.xlu1 %v1736_v29, %s3360_s0  ;;  %2201 = vmatmul.mubr.bf16.gmra.mrb[4].mxu1 %v1959_v1 }
 0x2a0   :  { %2208 = vmatprep.mubr.bf16.mxu1 %v1963_v58 }
 0x2a2   :  { %1829 = vrot.lane.b32.xlu0 %v4628_v53, %s3361_s15 }
 0x2a3   :  { %1529 = vrot.lane.b32.xlu1 %v4641_v44, %s3360_s0  ;;  %v3317_v44 = vld [vmem:[%s5118_s5 + $0x4] ss:$8 sps:$4 sm:$0xff]  }
 0x2a4   :  { %2443 = vmatprep.subr.bf16.mxu0 %v3317_v44 }
 0x2a6   :  { %1602 = vrot.lane.b32.xlu0 %v4644_v45, %s3361_s15 }
 0x2a7   :  { %1831 = vrot.lane.b32.xlu1 %v4460_v19, %s3361_s15  ;;  %2209 = vmatmul.mubr.bf16.gmra.mrb[8].mxu1 %v1962_v22  ;;  %v3315_v19 = vld [vmem:[%s5118_s5] ss:$8 sps:$4 sm:$0xff]   ;;  %s3365_s5 = smov [#allocation6]  }
 0x2a8   :  { %v1820_v43 = vpop.permute.xlu1 %1819  ;;  %2444 = vmatpush1.bf16.msra.mxu0 %v3315_v19  ;;  %s2883_s28 = sshll.u32 %s3365_s5, 4  ;;  %s2884_s28 = int_to_ptr.vmem [resolvable:$true] %s2883_s28 }
 0x2a9   :  { %2445 = vmatprep.subr.bf16.mxu0 %v3320_v47  ;;  %p3332_p1 = scmp.lt.s32.totalorder %s2884_s28, %s2884_s28 }
 0x2ab   :  { %1604 = vrot.lane.b32.xlu1 %v1573_v51, %s3361_s15  ;;  %v1818_v61 = vpop.permute.xlu0 %1817 }
 0x2ac   :  { %v1393_v16 = vpop.permute.xlu1 %1392  ;;  %2446 = vmatpush1.bf16.msra.mxu0 %v3318_v46 }
 0x2ad   :  { %1430 = vst.msk [vmem:[#allocation5 + $0x108] sm:$0xff] %vm1418_vm0, %v1393_v16  ;;  %2447 = vmatprep.subr.bf16.mxu0 %v3323_v50 }
 0x2af   :  { %v1684_v53 = vpop.permute.xlu0 %1683 }
 0x2b0   :  { %1721 = vst.msk [vmem:[#allocation5 + $0xf8] sm:$0xff] %vm1418_vm0, %v1684_v53  ;;  %v1389_v9 = vpop.permute.xlu1 %1388  ;;  %2448 = vmatpush1.bf16.msra.mxu0 %v3321_v31 }
 0x2b1   :  { %1428 = vst.msk [vmem:[#allocation5 + $0xd8] sm:$0xff] %vm1418_vm0, %v1389_v9  ;;  %2449 = vmatprep.subr.bf16.mxu0 %v3326_v21 }
 0x2b3   :  { %v1391_v45 = vpop.permute.xlu0 %1390 }
 0x2b4   :  { %1429 = vst.msk [vmem:[#allocation5 + $0xf0] sm:$0xff] %vm1418_vm0, %v1391_v45  ;;  %v1756_v17 = vpop.permute.xlu1 %1755  ;;  %2450 = vmatpush1.bf16.msra.mxu0 %v3324_v59 }
 0x2b7   :  { %v1680_v48 = vpop.permute.xlu0 %1679 }
 0x2b8   :  { %1719 = vst.msk [vmem:[#allocation5 + $0xc8] sm:$0xff] %vm1418_vm0, %v1680_v48  ;;  %v1522_v49 = vpop.permute.xlu1 %1521 }
 0x2b9   :  { %1559 = vst.msk [vmem:[#allocation5 + $0x108] sm:$0xff] %vm1547_vm1, %v1522_v49 }
 0x2bb   :  { %v1591_v52 = vpop.permute.xlu0 %1590 }
 0x2bc   :  { %1631 = vst.msk [vmem:[#allocation5 + $0xc0] sm:$0xff] %vm1622_vm4, %v1591_v52  ;;  %v1518_v39 = vpop.permute.xlu1 %1517 }
 0x2bd   :  { %1557 = vst.msk [vmem:[#allocation5 + $0xd8] sm:$0xff] %vm1547_vm1, %v1518_v39 }
 0x2bf   :  { %v1758_v57 = vpop.permute.xlu0 %1757 }
 0x2c0   :  { %1795 = vst.msk [vmem:[#allocation5 + $0xf8] sm:$0xff] %vm1547_vm1, %v1758_v57  ;;  %v1686_v60 = vpop.permute.xlu1 %1685 }
 0x2c1   :  { %1722 = vst.msk [vmem:[#allocation5 + $0x110] sm:$0xff] %vm1418_vm0, %v1686_v60 }
 0x2c3   :  { %v1754_v62 = vpop.permute.xlu0 %1753  ;;  %v1929_v26 = vld [vmem:[#allocation5 + $0xc0] sm:$0xff] }
 0x2c4   :  { %1793 = vst.msk [vmem:[#allocation5 + $0xc8] sm:$0xff] %vm1547_vm1, %v1754_v62  ;;  %v1682_v63 = vpop.permute.xlu1 %1681 }
 0x2c5   :  { %1857 = vst.msk [vmem:[#allocation5 + $0xc8] sm:$0xff] %vm1622_vm4, %v1818_v61 }
 0x2c6   :  { %1720 = vst.msk [vmem:[#allocation5 + $0xe0] sm:$0xff] %vm1418_vm0, %v1682_v63  ;;  %v4831_v63 = vld [vmem:[%s5117_s4] ss:$0 sm:$0xff]  ;;  %s3327_s4 = scalar_lea.vmem %s2884_s28, 32 }
 0x2c7   :  { %1794 = vst.msk [vmem:[#allocation5 + $0xe0] sm:$0xff] %vm1547_vm1, %v1756_v17  ;;  %v1520_v4 = vpop.permute.xlu0 %1519  ;;  %p3328_p0 = scmp.ne.s32.totalorder %s2884_s28, %s3327_s4  ;;  %p3333_p2 = scmp.lt.s32.totalorder %s3327_s4, %s3327_s4 }
 0x2c8   :  { %1858 = vst.msk [vmem:[#allocation5 + $0xe0] sm:$0xff] %vm1622_vm4, %v1820_v43  ;;  %v1593_v5 = vpop.permute.xlu1 %1592 }
 0x2c9   :  { %1558 = vst.msk [vmem:[#allocation5 + $0xf0] sm:$0xff] %vm1547_vm1, %v1520_v4  ;;  %p3334_p3 = por %p3333_p2, %p3332_p1 }
 0x2ca   :  { %1632 = vst.msk [vmem:[#allocation5 + $0xd8] sm:$0xff] %vm1622_vm4, %v1593_v5 }
 0x2cb   :  { %v1822_v10 = vpop.permute.xlu0 %1821  ;;  %p3335_p4 = pnand %p3334_p3, %p3328_p0 }
 0x2cc   :  { %1859 = vst.msk [vmem:[#allocation5 + $0xf8] sm:$0xff] %vm1622_vm4, %v1822_v10  ;;  %v1597_v11 = vpop.permute.xlu1 %1596  ;;  %v1930_v12 = vld [vmem:[#allocation5 + $0xc8] sm:$0xff] }
 0x2cd   :  { %1634 = vst.msk [vmem:[#allocation5 + $0x108] sm:$0xff] %vm1622_vm4, %v1597_v11 }
 0x2cf   :  { %v1933_v13 = vld [vmem:[#allocation5 + $0xe0] sm:$0xff]  ;;  %v1595_v14 = vpop.permute.xlu0 %1594 }
 0x2d0   :  { %v1966_v15 = vpack.c.bf16 %v1933_v13, %v1930_v12  ;;  %1633 = vst.msk [vmem:[#allocation5 + $0xf0] sm:$0xff] %vm1622_vm4, %v1595_v14 }
 0x2d1   :  { %v1932_v42 = vld [vmem:[#allocation5 + $0xd8] sm:$0xff] }
 0x2d2   :  { %2216 = vmatprep.mubr.bf16.mxu1 %v1966_v15  ;;  %v1965_v25 = vpack.c.bf16 %v1932_v42, %v1929_v26 }
 0x2d3   :  { %v1936_v28 = vld [vmem:[#allocation5 + $0xf8] sm:$0xff] }
 0x2d4   :  { %2217 = vmatmul.mubr.bf16.gmra.mrb[12].mxu1 %v1965_v25  ;;  %v1938_v18 = vld [vmem:[#allocation5 + $0x108] sm:$0xff] }
 0x2d7   :  { %v1935_v24 = vld [vmem:[#allocation5 + $0xf0] sm:$0xff] }
 0x2d8   :  { %v1968_v2 = vpack.c.bf16 %v1938_v18, %v1935_v24 }
 0x2e9   :  { %v1824_v38 = vpop.permute.xlu1 %1823 }
 0x2ec   :  { %v1688_v36 = vpop.permute.xlu0 %1687 }
 0x2ed   :  { %1723 = vst.msk [vmem:[#allocation5 + $0x128] sm:$0xff] %vm1418_vm0, %v1688_v36  ;;  %v1760_v27 = vpop.permute.xlu1 %1759 }
 0x2ee   :  { %1796 = vst.msk [vmem:[#allocation5 + $0x110] sm:$0xff] %vm1547_vm1, %v1760_v27 }
 0x2ef   :  { %1860 = vst.msk [vmem:[#allocation5 + $0x110] sm:$0xff] %vm1622_vm4, %v1824_v38 }
 0x2f0   :  { %v1395_v55 = vpop.permute.xlu0 %1394 }
 0x2f1   :  { %1431 = vst.msk [vmem:[#allocation5 + $0x120] sm:$0xff] %vm1418_vm0, %v1395_v55  ;;  %v1690_v7 = vpop.permute.xlu1 %1689 }
 0x2f2   :  { %1724 = vst.msk [vmem:[#allocation5 + $0x140] sm:$0xff] %vm1418_vm0, %v1690_v7 }
 0x2f4   :  { %v1762_v33 = vpop.permute.xlu0 %1761 }
 0x2f5   :  { %1797 = vst.msk [vmem:[#allocation5 + $0x128] sm:$0xff] %vm1547_vm1, %v1762_v33  ;;  %v1397_v34 = vpop.permute.xlu1 %1396 }
 0x2f6   :  { %1432 = vst.msk [vmem:[#allocation5 + $0x138] sm:$0xff] %vm1418_vm0, %v1397_v34  ;;  %v1939_v35 = vld [vmem:[#allocation5 + $0x110] sm:$0xff] }
 0x2f7   :  { %v1969_v32 = vpack.c.bf16 %v1939_v35, %v1936_v28 }
 0x2f8   :  { %v1524_v54 = vpop.permute.xlu0 %1523 }
 0x2f9   :  { %1560 = vst.msk [vmem:[#allocation5 + $0x120] sm:$0xff] %vm1547_vm1, %v1524_v54  ;;  %v1764_v51 = vpop.permute.xlu1 %1763  ;;  %2224 = vmatprep.mubr.bf16.mxu1 %v1969_v32 }
 0x2fa   :  { %1798 = vst.msk [vmem:[#allocation5 + $0x140] sm:$0xff] %vm1547_vm1, %v1764_v51  ;;  %2225 = vmatmul.mubr.bf16.gmra.mrb[16].mxu1 %v1968_v2 }
 0x2fc   :  { %v1826_v37 = vpop.permute.xlu0 %1825 }
 0x2fd   :  { %1861 = vst.msk [vmem:[#allocation5 + $0x128] sm:$0xff] %vm1622_vm4, %v1826_v37  ;;  %v1526_v56 = vpop.permute.xlu1 %1525 }
 0x2fe   :  { %1561 = vst.msk [vmem:[#allocation5 + $0x138] sm:$0xff] %vm1547_vm1, %v1526_v56 }
 0x300   :  { %v1599_v30 = vpop.permute.xlu0 %1598 }
 0x301   :  { %1635 = vst.msk [vmem:[#allocation5 + $0x120] sm:$0xff] %vm1622_vm4, %v1599_v30  ;;  %v1828_v40 = vpop.permute.xlu1 %1827 }
 0x302   :  { %1862 = vst.msk [vmem:[#allocation5 + $0x140] sm:$0xff] %vm1622_vm4, %v1828_v40 }
 0x304   :  { %v1692_v29 = vpop.permute.xlu0 %1691  ;;  %v1942_v20 = vld [vmem:[#allocation5 + $0x128] sm:$0xff] }
 0x305   :  { %1725 = vst.msk [vmem:[#allocation5 + $0x158] sm:$0xff] %vm1418_vm0, %v1692_v29  ;;  %v1601_v41 = vpop.permute.xlu1 %1600 }
 0x306   :  { %1636 = vst.msk [vmem:[#allocation5 + $0x138] sm:$0xff] %vm1622_vm4, %v1601_v41 }
 0x308   :  { %v1399_v6 = vpop.permute.xlu0 %1398  ;;  %v1941_v43 = vld [vmem:[#allocation5 + $0x120] sm:$0xff] }
 0x309   :  { %1433 = vst.msk [vmem:[#allocation5 + $0x150] sm:$0xff] %vm1418_vm0, %v1399_v6  ;;  %v1694_v1 = vpop.permute.xlu1 %1693  ;;  %v1945_v58 = vld [vmem:[#allocation5 + $0x140] sm:$0xff] }
 0x30a   :  { %1726 = vst.msk [vmem:[#allocation5 + $0x170] sm:$0xff] %vm1418_vm0, %v1694_v1  ;;  %v1972_v23 = vpack.c.bf16 %v1945_v58, %v1942_v20 }
 0x30c   :  { %2232 = vmatprep.mubr.bf16.mxu1 %v1972_v23  ;;  %v1766_v8 = vpop.permute.xlu0 %1765 }
 0x30d   :  { %1799 = vst.msk [vmem:[#allocation5 + $0x158] sm:$0xff] %vm1547_vm1, %v1766_v8  ;;  %v1401_v22 = vpop.permute.xlu1 %1400  ;;  %v1944_v61 = vld [vmem:[#allocation5 + $0x138] sm:$0xff] }
 0x30e   :  { %1434 = vst.msk [vmem:[#allocation5 + $0x168] sm:$0xff] %vm1418_vm0, %v1401_v22  ;;  %v1971_v16 = vpack.c.bf16 %v1944_v61, %v1941_v43 }
 0x310   :  { %2233 = vmatmul.mubr.bf16.gmra.mrb[20].mxu1 %v1971_v16  ;;  %v1528_v53 = vpop.permute.xlu0 %1527 }
 0x311   :  { %1562 = vst.msk [vmem:[#allocation5 + $0x150] sm:$0xff] %vm1547_vm1, %v1528_v53  ;;  %v1768_v9 = vpop.permute.xlu1 %1767 }
 0x312   :  { %1800 = vst.msk [vmem:[#allocation5 + $0x170] sm:$0xff] %vm1547_vm1, %v1768_v9 }
 0x314   :  { %v1830_v44 = vpop.permute.xlu0 %1829 }
 0x315   :  { %1863 = vst.msk [vmem:[#allocation5 + $0x158] sm:$0xff] %vm1622_vm4, %v1830_v44  ;;  %v1530_v45 = vpop.permute.xlu1 %1529 }
 0x316   :  { %1563 = vst.msk [vmem:[#allocation5 + $0x168] sm:$0xff] %vm1547_vm1, %v1530_v45  ;;  %v2636_v45 = vld [vmem:[%s5120_s7 + $0x80] sm:$0xff] }
 0x318   :  { %v1603_v19 = vpop.permute.xlu0 %1602 }
 0x319   :  { %1637 = vst.msk [vmem:[#allocation5 + $0x150] sm:$0xff] %vm1622_vm4, %v1603_v19  ;;  %v1832_v17 = vpop.permute.xlu1 %1831  ;;  %v2637_v19 = vld [vmem:[%s5120_s7 + $0x88] sm:$0xff] }
 0x31a   :  { %1864 = vst.msk [vmem:[#allocation5 + $0x170] sm:$0xff] %vm1622_vm4, %v1832_v17 }
 0x31c   :  { %v1948_v47 = vld [vmem:[#allocation5 + $0x158] sm:$0xff] }
 0x31d   :  { %v1605_v46 = vpop.permute.xlu1 %1604 }
 0x31e   :  { %1638 = vst.msk [vmem:[#allocation5 + $0x168] sm:$0xff] %vm1622_vm4, %v1605_v46 }
 0x320   :  { %v1947_v50 = vld [vmem:[#allocation5 + $0x150] sm:$0xff] }
 0x321   :  { %v1951_v48 = vld [vmem:[#allocation5 + $0x170] sm:$0xff] }
 0x322   :  { %v1975_v49 = vpack.c.bf16 %v1951_v48, %v1948_v47  ;;  %v3206_v47 = vpack.c.bf16 %v2637_v19, %v2636_v45  ;;  %v2620_v48 = vld [vmem:[%s5120_s7] sm:$0xff]  ;;  %v2649_v45 = vld [vmem:[%s5120_s7 + $0xe8] sm:$0xff] }
 0x324   :  { %2240 = vmatprep.mubr.bf16.mxu1 %v1975_v49  ;;  %v2621_v49 = vld [vmem:[%s5120_s7 + $0x8] sm:$0xff]  ;;  %3207 = vmatprep.subr.bf16.mxu1 %v3206_v47 }
 0x325   :  { %v1950_v52 = vld [vmem:[#allocation5 + $0x168] sm:$0xff] }
 0x326   :  { %v1974_v31 = vpack.c.bf16 %v1950_v52, %v1947_v50  ;;  %v3208_v52 = vpack.c.bf16 %v2621_v49, %v2620_v48  ;;  %v2633_v47 = vld [vmem:[%s5120_s7 + $0x68] sm:$0xff]  ;;  %v2650_v49 = vld [vmem:[%s5120_s7 + $0xf0] sm:$0xff] }
 0x328   :  { %2241 = vmatmul.mubr.bf16.gmra.mrb[24].mxu1 %v1974_v31 }
 0x329   :  { %3209 = vmatpush3.bf16.msra.mxu1 %v3208_v52 }
 0x332   :  { %v2974_v39 = vpop.f32.mrb[16].mxu0 }
 0x333   :  { %v2975_v21 = vpop.f32.mrb[17].mxu0 }
 0x334   :  { %v2976_v57 = vadd.f32 %v2975_v21, %v2974_v39  ;;  %v2977_v59 = vpop.f32.mrb[18].mxu0 }
 0x335   :  { %v2978_v60 = vpop.f32.mrb[19].mxu0 }
 0x336   :  { %v2979_v62 = vadd.f32 %v2978_v60, %v2977_v59  ;;  %v2187_v5 = vadd.f32 %v2976_v57, %v4831_v63  ;;  %v2638_v60 = vld [vmem:[%s5120_s7 + $0x90] sm:$0xff] }
 0x338   :  { %v2190_v13 = vadd.f32 %v2979_v62, %v4831_v63  ;;  %v2639_v62 = vld [vmem:[%s5120_s7 + $0x98] sm:$0xff] }
 0x33a   :  { %v3157_v4 = vpop.f32.mrb[20].mxu0 }
 0x33b   :  { %v2283_v10 = vpop.f32.mrb[21].mxu0 }
 0x33c   :  { %v2284_v11 = vadd.f32 %v2283_v10, %v2187_v5  ;;  %v3158_v12 = vpop.f32.mrb[22].mxu0 }
 0x33d   :  { %v2286_v14 = vpop.f32.mrb[23].mxu0 }
 0x33e   :  { %v2287_v15 = vadd.f32 %v2286_v14, %v2190_v13  ;;  %v2346_v26 = vmax.f32 %v2284_v11, 0.0  ;;  %v3210_v11 = vpack.c.bf16 %v2639_v62, %v2638_v60  ;;  %v2623_v13 = vld [vmem:[%s5120_s7 + $0x18] sm:$0xff] }
 0x340   :  { %v2347_v42 = vmax.f32 %v2287_v15, 0.0  ;;  %3211 = vmatprep.subr.bf16.mxu1 %v3210_v11 }
 0x342   :  { %v2362_v25 = vpack.c.bf16 %v2347_v42, %v2346_v26  ;;  %v4835_v38 = vpop.f32.mrb[24].mxu0  ;;  %v2640_v42 = vld [vmem:[%s5120_s7 + $0xa0] sm:$0xff] }
 0x343   :  { %v2299_v36 = vpop.f32.mrb[25].mxu0 }
 0x344   :  { %v4837_v27 = vpop.f32.mrb[26].mxu0  ;;  %2938 = vmatmul.mubr.msk.bf16.vlgmr.msra.gmra.mrb[36].mxu0 %vm2418_vm2, %v2362_v25  ;;  %v2641_v25 = vld [vmem:[%s5120_s7 + $0xa8] sm:$0xff] }
 0x345   :  { %v2302_v55 = vpop.f32.mrb[27].mxu0  ;;  %2485 = vmatprep.mubr.bf16.mxu0 %v3362_v0 }
 0x357   :  { %v4841_v7 = vpop.f32.mrb[28].mxu0 }
 0x358   :  { %v4843_v33 = vpop.f32.mrb[29].mxu0 }
 0x359   :  { %v4845_v34 = vpop.f32.mrb[30].mxu0 }
 0x35a   :  { %v4847_v24 = vpop.f32.mrb[31].mxu0 }
 0x35f   :  { %v4849_v28 = vpop.f32.mrb[32].mxu0 }
 0x360   :  { %v2980_v35 = vpop.f32.mrb[0].mxu1  ;;  %v4851_v32 = vpop.f32.mrb[33].mxu0 }
 0x361   :  { %v2981_v18 = vpop.f32.mrb[1].mxu1  ;;  %v4853_v54 = vpop.f32.mrb[34].mxu0 }
 0x362   :  { %v2982_v2 = vadd.f32 %v2981_v18, %v2980_v35  ;;  %v2983_v51 = vpop.f32.mrb[2].mxu1  ;;  %v4855_v37 = vpop.f32.mrb[35].mxu0  ;;  %v2625_v35 = vld [vmem:[%s5120_s7 + $0x28] sm:$0xff] }
 0x363   :  { %v2984_v56 = vpop.f32.mrb[3].mxu1 }
 0x364   :  { %v2195_v30 = vadd.f32 %v2982_v2, %v4831_v63  ;;  %v2985_v40 = vadd.f32 %v2984_v56, %v2983_v51  ;;  %v2642_v56 = vld [vmem:[%s5120_s7 + $0xb0] sm:$0xff] }
 0x366   :  { %v2292_v29 = vadd.f32 %v3157_v4, %v2195_v30  ;;  %v2198_v41 = vadd.f32 %v2985_v40, %v4831_v63 }
 0x368   :  { %v2295_v6 = vadd.f32 %v3158_v12, %v2198_v41  ;;  %v2348_v1 = vmax.f32 %v2292_v29, 0.0  ;;  %v2622_v12 = vld [vmem:[%s5120_s7 + $0x10] sm:$0xff]  ;;  %v2627_v41 = vld [vmem:[%s5120_s7 + $0x38] sm:$0xff] }
 0x369   :  { %v3212_v14 = vpack.c.bf16 %v2623_v13, %v2622_v12  ;;  %v2626_v29 = vld [vmem:[%s5120_s7 + $0x30] sm:$0xff] }
 0x36a   :  { %v2349_v20 = vmax.f32 %v2295_v6, 0.0  ;;  %v3220_v6 = vpack.c.bf16 %v2627_v41, %v2626_v29 }
 0x36b   :  { %3213 = vmatpush3.bf16.msra.mxu1 %v3212_v14 }
 0x36c   :  { %v2363_v58 = vpack.c.bf16 %v2349_v20, %v2348_v1  ;;  %v2644_v1 = vld [vmem:[%s5120_s7 + $0xc0] sm:$0xff]  ;;  %v2645_v20 = vld [vmem:[%s5120_s7 + $0xc8] sm:$0xff] }
 0x36e   :  { %2939 = vmatmul.mubr.msk.bf16.gmra.mrb[40].mxu0 %vm2418_vm2, %v2363_v58  ;;  %v2628_v58 = vld [vmem:[%s5120_s7 + $0x40] sm:$0xff] }
 0x36f   :  { %2495 = vmatprep.mubr.bf16.mxu0 %v3362_v0 }
 0x372   :  { %v2986_v23 = vpop.f32.mrb[4].mxu1 }
 0x373   :  { %v2987_v8 = vpop.f32.mrb[5].mxu1 }
 0x374   :  { %v2988_v22 = vadd.f32 %v2987_v8, %v2986_v23  ;;  %v2989_v43 = vpop.f32.mrb[6].mxu1  ;;  %v3222_v23 = vpack.c.bf16 %v2645_v20, %v2644_v1  ;;  %v2629_v8 = vld [vmem:[%s5120_s7 + $0x48] sm:$0xff] }
 0x375   :  { %v2990_v61 = vpop.f32.mrb[7].mxu1 }
 0x376   :  { %v2203_v16 = vadd.f32 %v2988_v22, %v4831_v63  ;;  %v2991_v53 = vadd.f32 %v2990_v61, %v2989_v43  ;;  %v2646_v22 = vld [vmem:[%s5120_s7 + $0xd0] sm:$0xff]  ;;  %v2647_v43 = vld [vmem:[%s5120_s7 + $0xd8] sm:$0xff]  ;;  %v3224_v61 = vpack.c.bf16 %v2629_v8, %v2628_v58 }
 0x378   :  { %v2300_v9 = vadd.f32 %v2299_v36, %v2203_v16  ;;  %v2206_v44 = vadd.f32 %v2991_v53, %v4831_v63  ;;  %v3226_v16 = vpack.c.bf16 %v2647_v43, %v2646_v22  ;;  %v2630_v53 = vld [vmem:[%s5120_s7 + $0x50] sm:$0xff] }
 0x37a   :  { %v2303_v17 = vadd.f32 %v2302_v55, %v2206_v44  ;;  %v2992_v46 = vpop.f32.mrb[8].mxu1  ;;  %v2350_v31 = vmax.f32 %v2300_v9, 0.0  ;;  %v3214_v55 = vpack.c.bf16 %v2641_v25, %v2640_v42  ;;  %v2631_v9 = vld [vmem:[%s5120_s7 + $0x58] sm:$0xff]  ;;  %v2648_v44 = vld [vmem:[%s5120_s7 + $0xe0] sm:$0xff] }
 0x37b   :  { %v2993_v50 = vpop.f32.mrb[9].mxu1  ;;  %v3228_v19 = vpack.c.bf16 %v2631_v9, %v2630_v53 }
 0x37c   :  { %v2351_v39 = vmax.f32 %v2303_v17, 0.0  ;;  %v2994_v21 = vadd.f32 %v2993_v50, %v2992_v46  ;;  %v2995_v57 = vpop.f32.mrb[10].mxu1  ;;  %3215 = vmatprep.subr.bf16.mxu1 %v3214_v55  ;;  %v3230_v17 = vpack.c.bf16 %v2649_v45, %v2648_v44  ;;  %v2632_v46 = vld [vmem:[%s5120_s7 + $0x60] sm:$0xff]  ;;  %v2651_v50 = vld [vmem:[%s5120_s7 + $0xf8] sm:$0xff] }
 0x37d   :  { %v2996_v59 = vpop.f32.mrb[11].mxu1  ;;  %v3232_v48 = vpack.c.bf16 %v2633_v47, %v2632_v46  ;;  %v3234_v52 = vpack.c.bf16 %v2651_v50, %v2650_v49  ;;  %v2556_v49 = vld [vmem:[%s5119_s6] sm:$0xff] }
 0x37e   :  { %v2364_v4 = vpack.c.bf16 %v2351_v39, %v2350_v31  ;;  %v2211_v5 = vadd.f32 %v2994_v21, %v4831_v63  ;;  %v2997_v10 = vadd.f32 %v2996_v59, %v2995_v57  ;;  %v2634_v31 = vld [vmem:[%s5120_s7 + $0x70] sm:$0xff]  ;;  %v2635_v39 = vld [vmem:[%s5120_s7 + $0x78] sm:$0xff] }
 0x37f   :  { %v3236_v21 = vpack.c.bf16 %v2635_v39, %v2634_v31  ;;  %v2558_v39 = vld [vmem:[%s5119_s6 + $0x10] sm:$0xff] }
 0x380   :  { %v2308_v15 = vadd.f32 %v4835_v38, %v2211_v5  ;;  %v2214_v26 = vadd.f32 %v2997_v10, %v4831_v63  ;;  %2940 = vmatmul.mubr.msk.bf16.gmra.mrb[44].mxu0 %vm2418_vm2, %v2364_v4  ;;  %v2624_v38 = vld [vmem:[%s5120_s7 + $0x20] sm:$0xff] }
 0x381   :  { %2505 = vmatprep.mubr.bf16.mxu0 %v3362_v0  ;;  %v3216_v18 = vpack.c.bf16 %v2625_v35, %v2624_v38 }
 0x382   :  { %v2311_v36 = vadd.f32 %v4837_v27, %v2214_v26  ;;  %v2352_v2 = vmax.f32 %v2308_v15, 0.0  ;;  %v2643_v27 = vld [vmem:[%s5120_s7 + $0xb8] sm:$0xff] }
 0x383   :  { %3217 = vmatpush3.bf16.msra.mxu1 %v3216_v18  ;;  %v3218_v40 = vpack.c.bf16 %v2643_v27, %v2642_v56 }
 0x384   :  { %v2353_v51 = vmax.f32 %v2311_v36, 0.0 }
 0x385   :  { %3219 = vmatprep.subr.bf16.mxu1 %v3218_v40 }
 0x386   :  { %v2365_v30 = vpack.c.bf16 %v2353_v51, %v2352_v2 }
 0x387   :  { %3221 = vmatpush3.bf16.msra.mxu1 %v3220_v6 }
 0x388   :  { %2941 = vmatmul.mubr.msk.bf16.gmra.mrb[48].mxu0 %vm2418_vm2, %v2365_v30  ;;  %3223 = vmatprep.subr.bf16.mxu1 %v3222_v23 }
 0x389   :  { %2515 = vmatprep.mubr.bf16.mxu0 %v3362_v0 }
 0x38b   :  { %3225 = vmatpush3.bf16.msra.mxu1 %v3224_v61 }
 0x38c   :  { %3227 = vmatprep.subr.bf16.mxu1 %v3226_v16 }
 0x38f   :  { %3229 = vmatpush3.bf16.msra.mxu1 %v3228_v19 }
 0x390   :  { %3231 = vmatprep.subr.bf16.mxu1 %v3230_v17 }
 0x393   :  { %3233 = vmatpush3.bf16.msra.mxu1 %v3232_v48 }
 0x394   :  { %3235 = vmatprep.subr.bf16.mxu1 %v3234_v52 }
 0x397   :  { %3237 = vmatpush3.bf16.msra.mxu1 %v3236_v21 }
 0x3a7   :  { %v2998_v57 = vpop.f32.mrb[12].mxu1 }
 0x3a8   :  { %v2999_v59 = vpop.f32.mrb[13].mxu1 }
 0x3a9   :  { %v3000_v60 = vadd.f32 %v2999_v59, %v2998_v57  ;;  %v3001_v62 = vpop.f32.mrb[14].mxu1  ;;  %v2561_v59 = vld [vmem:[%s5119_s6 + $0x28] sm:$0xff] }
 0x3aa   :  { %v3002_v4 = vpop.f32.mrb[15].mxu1 }
 0x3ab   :  { %v2219_v5 = vadd.f32 %v3000_v60, %v4831_v63  ;;  %v3003_v10 = vadd.f32 %v3002_v4, %v3001_v62  ;;  %v2560_v62 = vld [vmem:[%s5119_s6 + $0x20] sm:$0xff] }
 0x3ad   :  { %v2316_v11 = vadd.f32 %v4843_v33, %v2219_v5  ;;  %v2222_v12 = vadd.f32 %v3003_v10, %v4831_v63  ;;  %v2563_v5 = vld [vmem:[%s5119_s6 + $0x38] sm:$0xff] }
 0x3af   :  { %v2319_v13 = vadd.f32 %v4847_v24, %v2222_v12  ;;  %v2354_v14 = vmax.f32 %v2316_v11, 0.0 }
 0x3b1   :  { %v2355_v15 = vmax.f32 %v2319_v13, 0.0 }
 0x3b3   :  { %v2366_v26 = vpack.c.bf16 %v2355_v15, %v2354_v14  ;;  %v2562_v14 = vld [vmem:[%s5119_s6 + $0x30] sm:$0xff] }
 0x3b5   :  { %2942 = vmatmul.mubr.msk.bf16.gmra.mrb[52].mxu0 %vm2418_vm2, %v2366_v26 }
 0x3b6   :  { %2525 = vmatprep.mubr.bf16.mxu0 %v3362_v0 }
 0x3cd   :  { %v3004_v42 = vpop.f32.mrb[16].mxu1 }
 0x3ce   :  { %v3005_v25 = vpop.f32.mrb[17].mxu1 }
 0x3cf   :  { %v3006_v36 = vadd.f32 %v3005_v25, %v3004_v42  ;;  %v3007_v55 = vpop.f32.mrb[18].mxu1  ;;  %v2565_v42 = vld [vmem:[%s5119_s6 + $0x48] sm:$0xff] }
 0x3d0   :  { %v3008_v38 = vpop.f32.mrb[19].mxu1 }
 0x3d1   :  { %v2227_v35 = vadd.f32 %v3006_v36, %v4831_v63  ;;  %v3009_v18 = vadd.f32 %v3008_v38, %v3007_v55  ;;  %v2564_v36 = vld [vmem:[%s5119_s6 + $0x40] sm:$0xff]  ;;  %v2567_v38 = vld [vmem:[%s5119_s6 + $0x58] sm:$0xff] }
 0x3d3   :  { %v2324_v33 = vadd.f32 %v4841_v7, %v2227_v35  ;;  %v2230_v2 = vadd.f32 %v3009_v18, %v4831_v63 }
 0x3d5   :  { %v2327_v24 = vadd.f32 %v4845_v34, %v2230_v2  ;;  %v2356_v51 = vmax.f32 %v2324_v33, 0.0 }
 0x3d7   :  { %v2357_v56 = vmax.f32 %v2327_v24, 0.0  ;;  %v2566_v24 = vld [vmem:[%s5119_s6 + $0x50] sm:$0xff] }
 0x3d9   :  { %v2367_v27 = vpack.c.bf16 %v2357_v56, %v2356_v51 }
 0x3db   :  { %2943 = vmatmul.mubr.msk.bf16.gmra.mrb[56].mxu0 %vm2418_vm2, %v2367_v27  ;;  %v2569_v27 = vld [vmem:[%s5119_s6 + $0x68] sm:$0xff] }
 0x3dc   :  { %2535 = vmatprep.mubr.bf16.mxu0 %v3362_v0 }
 0x3e3   :  { %v3010_v30 = vpop.f32.mrb[20].mxu1 }
 0x3e4   :  { %v3011_v40 = vpop.f32.mrb[21].mxu1 }
 0x3e5   :  { %v3012_v29 = vadd.f32 %v3011_v40, %v3010_v30  ;;  %v3013_v41 = vpop.f32.mrb[22].mxu1  ;;  %v2568_v40 = vld [vmem:[%s5119_s6 + $0x60] sm:$0xff] }
 0x3e6   :  { %v3014_v6 = vpop.f32.mrb[23].mxu1 }
 0x3e7   :  { %v2235_v1 = vadd.f32 %v3012_v29, %v4831_v63  ;;  %v3015_v20 = vadd.f32 %v3014_v6, %v3013_v41  ;;  %v2571_v41 = vld [vmem:[%s5119_s6 + $0x78] sm:$0xff] }
 0x3e9   :  { %v2332_v7 = vadd.f32 %v4851_v32, %v2235_v1  ;;  %v2238_v58 = vadd.f32 %v3015_v20, %v4831_v63 }
 0x3eb   :  { %v2335_v34 = vadd.f32 %v4855_v37, %v2238_v58  ;;  %v2358_v23 = vmax.f32 %v2332_v7, 0.0  ;;  %v2570_v58 = vld [vmem:[%s5119_s6 + $0x70] sm:$0xff] }
 0x3ed   :  { %v2359_v8 = vmax.f32 %v2335_v34, 0.0 }
 0x3ef   :  { %v2368_v22 = vpack.c.bf16 %v2359_v8, %v2358_v23  ;;  %v3363_v8 = vmov 0.0|0.0  }
 0x3f0   :  { %3238 = vmatprep.subr.bf16.mxu0 %v3363_v8 }
 0x3f1   :  { %2944 = vmatmul.mubr.msk.bf16.gmra.mrb[60].mxu0 %vm2418_vm2, %v2368_v22  ;;  %v2573_v22 = vld [vmem:[%s5119_s6 + $0x88] sm:$0xff] }
 0x3f2   :  { %2545 = vmatprep.mubr.bf16.mxu0 %v3362_v0  ;;  %v2557_v0 = vld [vmem:[%s5119_s6 + $0x8] sm:$0xff] }
 0x3fb   :  { %v3016_v43 = vpop.f32.mrb[24].mxu1 }
 0x3fc   :  { %v3017_v61 = vpop.f32.mrb[25].mxu1 }
 0x3fd   :  { %v3018_v16 = vadd.f32 %v3017_v61, %v3016_v43  ;;  %v3019_v53 = vpop.f32.mrb[26].mxu1  ;;  %v2572_v61 = vld [vmem:[%s5119_s6 + $0x80] sm:$0xff] }
 0x3fe   :  { %v3020_v9 = vpop.f32.mrb[27].mxu1 }
 0x3ff   :  { %v2243_v44 = vadd.f32 %v3018_v16, %v4831_v63  ;;  %v3021_v45 = vadd.f32 %v3020_v9, %v3019_v53  ;;  %v2575_v53 = vld [vmem:[%s5119_s6 + $0x98] sm:$0xff] }
 0x401   :  { %v2340_v32 = vadd.f32 %v4849_v28, %v2243_v44  ;;  %v2246_v19 = vadd.f32 %v3021_v45, %v4831_v63  ;;  %v2559_v63 = vld [vmem:[%s5119_s6 + $0x18] sm:$0xff] }
 0x403   :  { %v2343_v37 = vadd.f32 %v4853_v54, %v2246_v19  ;;  %v2360_v17 = vmax.f32 %v2340_v32, 0.0  ;;  %v2574_v19 = vld [vmem:[%s5119_s6 + $0x90] sm:$0xff] }
 0x405   :  { %v2361_v46 = vmax.f32 %v2343_v37, 0.0 }
 0x407   :  { %v2369_v47 = vpack.c.bf16 %v2361_v46, %v2360_v17  ;;  %v2577_v46 = vld [vmem:[%s5119_s6 + $0xa8] sm:$0xff] }
 0x409   :  { %2945 = vmatmul.mubr.msk.bf16.gmra.mrb[64].mxu0 %vm2418_vm2, %v2369_v47 }
 0x40a   :  { %3203 = vmatprep.mubr.msk.f32.mxu0 %vm3364_vm3, %v3351_v3 }
 0x417   :  { %v2477_v48 = vpop.f32.mrb[36].mxu0 }
 0x418   :  { %v2479_v50 = vpop.f32.mrb[37].mxu0  ;;  %v2588_v52 = vmul.f32 %v2556_v49, %v2477_v48  ;;  %v2579_v49 = vld [vmem:[%s5119_s6 + $0xb8] sm:$0xff] }
 0x419   :  { %v2589_v28 = vmul.f32 %v2557_v0, %v2479_v50  ;;  %v2481_v54 = vpop.f32.mrb[38].mxu0  ;;  %v2576_v0 = vld [vmem:[%s5119_s6 + $0xa0] sm:$0xff] }
 0x41a   :  { %v2483_v31 = vpop.f32.mrb[39].mxu0  ;;  %v2590_v57 = vmul.f32 %v2558_v39, %v2481_v54 }
 0x41b   :  { %v2591_v21 = vmul.f32 %v2559_v63, %v2483_v31  ;;  %2716 = vmatprep.mubr.f32.mxu1 %v2589_v28 }
 0x41c   :  { %2717 = vmatmul.mubr.f32.vlgmr.msra.gmra.mrb[28].mxu1 %v2588_v52  ;;  %v2578_v52 = vld [vmem:[%s5119_s6 + $0xb0] sm:$0xff] }
 0x41d   :  { %2721 = vmatprep.mubr.f32.mxu1 %v2591_v21  ;;  %v2581_v21 = vld [vmem:[%s5119_s6 + $0xc8] sm:$0xff] }
 0x420   :  { %2722 = vmatmul.mubr.f32.gmra.mrb[30].mxu1 %v2590_v57 }
 0x441   :  { %v2487_v60 = vpop.f32.mrb[40].mxu0 }
 0x442   :  { %v2489_v4 = vpop.f32.mrb[41].mxu0  ;;  %v2592_v12 = vmul.f32 %v2560_v62, %v2487_v60  ;;  %v2583_v62 = vld [vmem:[%s5119_s6 + $0xd8] sm:$0xff] }
 0x443   :  { %v2593_v10 = vmul.f32 %v2561_v59, %v2489_v4  ;;  %v2491_v11 = vpop.f32.mrb[42].mxu0  ;;  %v2580_v59 = vld [vmem:[%s5119_s6 + $0xc0] sm:$0xff] }
 0x444   :  { %v2493_v13 = vpop.f32.mrb[43].mxu0  ;;  %v2594_v26 = vmul.f32 %v2562_v14, %v2491_v11 }
 0x445   :  { %v2595_v15 = vmul.f32 %v2563_v5, %v2493_v13  ;;  %2726 = vmatprep.mubr.f32.mxu1 %v2593_v10 }
 0x446   :  { %2727 = vmatmul.mubr.f32.gmra.mrb[32].mxu1 %v2592_v12  ;;  %v2582_v12 = vld [vmem:[%s5119_s6 + $0xd0] sm:$0xff] }
 0x447   :  { %2731 = vmatprep.mubr.f32.mxu1 %v2595_v15  ;;  %v2585_v15 = vld [vmem:[%s5119_s6 + $0xe8] sm:$0xff] }
 0x44a   :  { %2732 = vmatmul.mubr.f32.gmra.mrb[34].mxu1 %v2594_v26 }
 0x453   :  { %v2497_v25 = vpop.f32.mrb[44].mxu0 }
 0x454   :  { %v2499_v55 = vpop.f32.mrb[45].mxu0  ;;  %v2596_v33 = vmul.f32 %v2564_v36, %v2497_v25  ;;  %v2587_v36 = vld [vmem:[%s5119_s6 + $0xf8] sm:$0xff] }
 0x455   :  { %v2597_v35 = vmul.f32 %v2565_v42, %v2499_v55  ;;  %v2501_v18 = vpop.f32.mrb[46].mxu0  ;;  %v2584_v42 = vld [vmem:[%s5119_s6 + $0xe0] sm:$0xff] }
 0x456   :  { %v2503_v2 = vpop.f32.mrb[47].mxu0  ;;  %v2598_v56 = vmul.f32 %v2566_v24, %v2501_v18 }
 0x457   :  { %v2599_v51 = vmul.f32 %v2567_v38, %v2503_v2  ;;  %2736 = vmatprep.mubr.f32.mxu1 %v2597_v35 }
 0x458   :  { %2737 = vmatmul.mubr.f32.gmra.mrb[36].mxu1 %v2596_v33  ;;  %v2586_v33 = vld [vmem:[%s5119_s6 + $0xf0] sm:$0xff] }
 0x459   :  { %2741 = vmatprep.mubr.f32.mxu1 %v2599_v51 }
 0x45b   :  { %v2507_v30 = vpop.f32.mrb[48].mxu0 }
 0x45c   :  { %v2509_v29 = vpop.f32.mrb[49].mxu0  ;;  %2742 = vmatmul.mubr.f32.gmra.mrb[38].mxu1 %v2598_v56  ;;  %v2600_v20 = vmul.f32 %v2568_v40, %v2507_v30 }
 0x45d   :  { %v2601_v6 = vmul.f32 %v2569_v27, %v2509_v29  ;;  %v2511_v1 = vpop.f32.mrb[50].mxu0 }
 0x45e   :  { %v2513_v7 = vpop.f32.mrb[51].mxu0  ;;  %v2602_v23 = vmul.f32 %v2570_v58, %v2511_v1 }
 0x45f   :  { %v2603_v34 = vmul.f32 %v2571_v41, %v2513_v7  ;;  %2746 = vmatprep.mubr.f32.mxu1 %v2601_v6 }
 0x460   :  { %2747 = vmatmul.mubr.f32.gmra.mrb[40].mxu1 %v2600_v20 }
 0x461   :  { %2751 = vmatprep.mubr.f32.mxu1 %v2603_v34 }
 0x464   :  { %2752 = vmatmul.mubr.f32.gmra.mrb[42].mxu1 %v2602_v23 }
 0x488   :  { %v2517_v43 = vpop.f32.mrb[52].mxu0 }
 0x489   :  { %v2519_v16 = vpop.f32.mrb[53].mxu0  ;;  %v2604_v45 = vmul.f32 %v2572_v61, %v2517_v43 }
 0x48a   :  { %v2605_v9 = vmul.f32 %v2573_v22, %v2519_v16  ;;  %v2521_v44 = vpop.f32.mrb[54].mxu0 }
 0x48b   :  { %v2523_v32 = vpop.f32.mrb[55].mxu0  ;;  %v2606_v17 = vmul.f32 %v2574_v19, %v2521_v44 }
 0x48c   :  { %v2607_v37 = vmul.f32 %v2575_v53, %v2523_v32  ;;  %2756 = vmatprep.mubr.f32.mxu1 %v2605_v9 }
 0x48d   :  { %2757 = vmatmul.mubr.f32.gmra.mrb[44].mxu1 %v2604_v45 }
 0x48e   :  { %2761 = vmatprep.mubr.f32.mxu1 %v2607_v37 }
 0x491   :  { %2762 = vmatmul.mubr.f32.gmra.mrb[46].mxu1 %v2606_v17 }
 0x4ae   :  { %v2527_v47 = vpop.f32.mrb[56].mxu0 }
 0x4af   :  { %v2529_v48 = vpop.f32.mrb[57].mxu0  ;;  %v2608_v28 = vmul.f32 %v2576_v0, %v2527_v47 }
 0x4b0   :  { %v2609_v50 = vmul.f32 %v2577_v46, %v2529_v48  ;;  %v2531_v63 = vpop.f32.mrb[58].mxu0 }
 0x4b1   :  { %v2533_v54 = vpop.f32.mrb[59].mxu0  ;;  %v2610_v39 = vmul.f32 %v2578_v52, %v2531_v63 }
 0x4b2   :  { %v2611_v31 = vmul.f32 %v2579_v49, %v2533_v54  ;;  %2766 = vmatprep.mubr.f32.mxu1 %v2609_v50 }
 0x4b3   :  { %2767 = vmatmul.mubr.f32.gmra.mrb[48].mxu1 %v2608_v28 }
 0x4b4   :  { %2771 = vmatprep.mubr.f32.mxu1 %v2611_v31 }
 0x4b7   :  { %2772 = vmatmul.mubr.f32.gmra.mrb[50].mxu1 %v2610_v39 }
 0x4c4   :  { %v2537_v57 = vpop.f32.mrb[60].mxu0 }
 0x4c5   :  { %v2539_v60 = vpop.f32.mrb[61].mxu0  ;;  %v2612_v10 = vmul.f32 %v2580_v59, %v2537_v57 }
 0x4c6   :  { %v2613_v4 = vmul.f32 %v2581_v21, %v2539_v60  ;;  %v2541_v5 = vpop.f32.mrb[62].mxu0 }
 0x4c7   :  { %v2543_v11 = vpop.f32.mrb[63].mxu0  ;;  %v2614_v14 = vmul.f32 %v2582_v12, %v2541_v5 }
 0x4c8   :  { %v2615_v13 = vmul.f32 %v2583_v62, %v2543_v11  ;;  %2776 = vmatprep.mubr.f32.mxu1 %v2613_v4 }
 0x4c9   :  { %2777 = vmatmul.mubr.f32.gmra.mrb[52].mxu1 %v2612_v10 }
 0x4ca   :  { %2781 = vmatprep.mubr.f32.mxu1 %v2615_v13 }
 0x4cd   :  { %2782 = vmatmul.mubr.f32.gmra.mrb[54].mxu1 %v2614_v14 }
 0x4dc   :  { %v2547_v26 = vpop.f32.mrb[64].mxu0 }
 0x4dd   :  { %v2549_v25 = vpop.f32.mrb[65].mxu0  ;;  %v2616_v35 = vmul.f32 %v2584_v42, %v2547_v26 }
 0x4de   :  { %v2617_v55 = vmul.f32 %v2585_v15, %v2549_v25  ;;  %v2551_v38 = vpop.f32.mrb[66].mxu0 }
 0x4df   :  { %v2553_v18 = vpop.f32.mrb[67].mxu0  ;;  %v2618_v24 = vmul.f32 %v2586_v33, %v2551_v38  ;;  %v2946_v38 = vld [vmem:[%s5122_s9] ss:$0 sm:$0xff] }
 0x4e0   :  { %v2619_v2 = vmul.f32 %v2587_v36, %v2553_v18  ;;  %2786 = vmatprep.mubr.f32.mxu1 %v2617_v55  ;;  %v2797_v55 = vld [vmem:[%s5121_s8] sm:$0x3] }
 0x4e1   :  { %2787 = vmatmul.mubr.f32.gmra.mrb[56].mxu1 %v2616_v35 }
 0x4e2   :  { %2791 = vmatprep.mubr.f32.mxu1 %v2619_v2 }
 0x4e5   :  { %2792 = vmatmul.mubr.f32.gmra.mrb[58].mxu1 %v2618_v24 }
 0x4ef   :  { %v3064_v51 = vpop.f32.mrb[28].mxu1 }
 0x4f0   :  { %v3065_v56 = vpop.f32.mrb[29].mxu1 }
 0x4f1   :  { %v3066_v27 = vadd.f32 %v3065_v56, %v3064_v51 }
 0x4f3   :  { %v3067_v30 = vpop.f32.mrb[30].mxu1 }
 0x4f4   :  { %v3068_v40 = vpop.f32.mrb[31].mxu1 }
 0x4f5   :  { %v3069_v29 = vadd.f32 %v3068_v40, %v3067_v30 }
 0x4f7   :  { %v3239_v41 = vpack.c.bf16 %v3069_v29, %v3066_v27 }
 0x4f9   :  { %3240 = vmatpush3.bf16.msra.mxu0 %v3239_v41 }
 0x4fa   :  { %3241 = vmatprep.subr.bf16.mxu0 %v3363_v8 }
 0x519   :  { %v3070_v6 = vpop.f32.mrb[32].mxu1 }
 0x51a   :  { %v3071_v1 = vpop.f32.mrb[33].mxu1 }
 0x51b   :  { %v3072_v20 = vadd.f32 %v3071_v1, %v3070_v6 }
 0x51d   :  { %v3073_v7 = vpop.f32.mrb[34].mxu1 }
 0x51e   :  { %v3074_v58 = vpop.f32.mrb[35].mxu1 }
 0x51f   :  { %v3075_v34 = vadd.f32 %v3074_v58, %v3073_v7 }
 0x521   :  { %v3242_v23 = vpack.c.bf16 %v3075_v34, %v3072_v20 }
 0x523   :  { %3243 = vmatpush3.bf16.msra.mxu0 %v3242_v23 }
 0x524   :  { %3244 = vmatprep.subr.bf16.mxu0 %v3363_v8 }
 0x52b   :  { %v3076_v22 = vpop.f32.mrb[36].mxu1 }
 0x52c   :  { %v3077_v43 = vpop.f32.mrb[37].mxu1 }
 0x52d   :  { %v3078_v61 = vadd.f32 %v3077_v43, %v3076_v22 }
 0x52f   :  { %v3079_v16 = vpop.f32.mrb[38].mxu1 }
 0x530   :  { %v3080_v53 = vpop.f32.mrb[39].mxu1 }
 0x531   :  { %v3081_v9 = vadd.f32 %v3080_v53, %v3079_v16 }
 0x533   :  { %v3245_v44 = vpack.c.bf16 %v3081_v9, %v3078_v61  ;;  %v3082_v45 = vpop.f32.mrb[40].mxu1 }
 0x534   :  { %v3083_v32 = vpop.f32.mrb[41].mxu1 }
 0x535   :  { %v3084_v19 = vadd.f32 %v3083_v32, %v3082_v45  ;;  %3246 = vmatpush3.bf16.msra.mxu0 %v3245_v44 }
 0x536   :  { %3247 = vmatprep.subr.bf16.mxu0 %v3363_v8 }
 0x537   :  { %v3085_v37 = vpop.f32.mrb[42].mxu1 }
 0x538   :  { %v3086_v17 = vpop.f32.mrb[43].mxu1 }
 0x539   :  { %v3087_v46 = vadd.f32 %v3086_v17, %v3085_v37 }
 0x53b   :  { %v3248_v47 = vpack.c.bf16 %v3087_v46, %v3084_v19 }
 0x53d   :  { %3249 = vmatpush3.bf16.msra.mxu0 %v3248_v47 }
 0x53e   :  { %3250 = vmatprep.subr.bf16.mxu0 %v3363_v8 }
 0x560   :  { %v3088_v0 = vpop.f32.mrb[44].mxu1 }
 0x561   :  { %v3089_v48 = vpop.f32.mrb[45].mxu1 }
 0x562   :  { %v3090_v49 = vadd.f32 %v3089_v48, %v3088_v0 }
 0x564   :  { %v3091_v50 = vpop.f32.mrb[46].mxu1 }
 0x565   :  { %v3092_v63 = vpop.f32.mrb[47].mxu1 }
 0x566   :  { %v3093_v28 = vadd.f32 %v3092_v63, %v3091_v50 }
 0x568   :  { %v3251_v54 = vpack.c.bf16 %v3093_v28, %v3090_v49 }
 0x56a   :  { %3252 = vmatpush3.bf16.msra.mxu0 %v3251_v54 }
 0x56b   :  { %3253 = vmatprep.subr.bf16.mxu0 %v3363_v8 }
 0x586   :  { %v3094_v52 = vpop.f32.mrb[48].mxu1 }
 0x587   :  { %v3095_v31 = vpop.f32.mrb[49].mxu1 }
 0x588   :  { %v3096_v39 = vadd.f32 %v3095_v31, %v3094_v52 }
 0x58a   :  { %v3097_v21 = vpop.f32.mrb[50].mxu1 }
 0x58b   :  { %v3098_v57 = vpop.f32.mrb[51].mxu1 }
 0x58c   :  { %v3099_v59 = vadd.f32 %v3098_v57, %v3097_v21 }
 0x58e   :  { %v3254_v60 = vpack.c.bf16 %v3099_v59, %v3096_v39 }
 0x590   :  { %3255 = vmatpush3.bf16.msra.mxu0 %v3254_v60 }
 0x591   :  { %3256 = vmatprep.subr.bf16.mxu0 %v3363_v8 }
 0x59c   :  { %v3100_v3 = vpop.f32.mrb[52].mxu1 }
 0x59d   :  { %v3101_v62 = vpop.f32.mrb[53].mxu1 }
 0x59e   :  { %v3102_v4 = vadd.f32 %v3101_v62, %v3100_v3 }
 0x5a0   :  { %v3103_v5 = vpop.f32.mrb[54].mxu1 }
 0x5a1   :  { %v3104_v10 = vpop.f32.mrb[55].mxu1 }
 0x5a2   :  { %v3105_v11 = vadd.f32 %v3104_v10, %v3103_v5 }
 0x5a4   :  { %v3257_v12 = vpack.c.bf16 %v3105_v11, %v3102_v4 }
 0x5a6   :  { %3258 = vmatpush3.bf16.msra.mxu0 %v3257_v12 }
 0x5a7   :  { %3259 = vmatprep.subr.bf16.mxu0 %v3363_v8 }
 0x5b4   :  { %v3106_v13 = vpop.f32.mrb[56].mxu1 }
 0x5b5   :  { %v3107_v14 = vpop.f32.mrb[57].mxu1 }
 0x5b6   :  { %v3108_v15 = vadd.f32 %v3107_v14, %v3106_v13 }
 0x5b8   :  { %v3109_v26 = vpop.f32.mrb[58].mxu1 }
 0x5b9   :  { %v3110_v42 = vpop.f32.mrb[59].mxu1 }
 0x5ba   :  { %v3111_v25 = vadd.f32 %v3110_v42, %v3109_v26 }
 0x5bc   :  { %v3260_v36 = vpack.c.bf16 %v3111_v25, %v3108_v15 }
 0x5be   :  { %3261 = vmatpush3.bf16.msra.mxu0 %v3260_v36 }
 0x5c1   :  { %3204 = vmatmul.mubr.f32.vlgmr.msra.gmra.mrb[68].mxu0 %v2797_v55 }
 0x694   :  { %v2871_v8 = vpop.f32.mrb[68].mxu0 }
 0x695   :  { %v2872_v35 = vadd.f32 %v2946_v38, %v2871_v8  ;;  %v3205_v18 = vpop.f32.mrb[69].mxu0 }
 0x697   :  { %2876 = vst.msk [vmem:[#allocation6] sm:$0x3] %vm2875_vm5, %v2872_v35 }
 0x698   :  { %3338 = shalt.err (!%p3335_p4)
}
 0x699   :  { %s3339_s30 = scalar_lea.hbm %s5123_s10, 32 }
 0x69a   :  { %p3340_p5 = scmp.ne.s32.totalorder %s5123_s10, %s3339_s30  ;;  %p3343_p6 = scmp.lt.u32.totalorder %s3339_s30, %s5123_s10 }
 0x69c   :  { %p3345_p7 = pnand %p3343_p6, %p3340_p5 }
 0x69e   :  { %3348 = shalt.err (!%p3345_p7)
}
 0x69f   :  { %2886 = dma.vmem_to_hbm [thread:$0]  %s2884_s28, 32, %s5123_s10, [#allocation7]  }
 0x6a0   :  { %3349 = dma.done.wait [#allocation7], 32  }
 0x6a1   :  { %3350 = vsyncadd [#allocation7], 4294967264 }
 0x6a2   :  { %2890 = vsyncpa [#allocation7], 1 }

</bundles_post_ra>
